<compile_context>
chip_gen: v6e
topology: v6e:2x2x1
jax: 0.10.0
libtpu: 0.0.40
codegen_flags: <defaults>
</compile_context>

<pallas_src>
import functools
import numpy as np

import jax
import jax.numpy as jnp
from jax import lax
from jax.experimental import pallas as pl
from jax.experimental.pallas import tpu as pltpu


# ----------------------------------------------------------- elementwise math

def _gelu_tanh(x):
    # tanh-approx GELU: ~3 VALU ops + 1 EUP tanh per element (vs ~12 VALU for
    # the rational-erf version).  |delta| vs exact erf GELU ~1e-3.
    c = np.float32(0.7978845608028654)      # sqrt(2/pi)
    return 0.5 * x * (1.0 + jnp.tanh(c * (x + np.float32(0.044715) * x * x * x)))


def _layernorm(x, g, b, eps):
    mean = jnp.mean(x, axis=-1, keepdims=True)
    var = jnp.mean(jnp.square(x - mean), axis=-1, keepdims=True)
    return (x - mean) * lax.rsqrt(var + eps) * g + b


# ------------------------------------------------------------ fused block kernel

def _block_kernel(x_ref, n1g_ref, n1b_ref, qw_ref, qb_ref, kvw_ref, kvb_ref,
                  projw_ref, projb_ref, n2g_ref, n2b_ref,
                  fc1w_ref, fc1b_ref, fc2w_ref, fc2b_ref,
                  o_ref, *, num_heads, eps):
    f32, bf16 = jnp.float32, jnp.bfloat16
    x = x_ref[0]                                   # (N, C) f32
    N, C = x.shape
    hd = C // num_heads

    # ---- LN1 (f32 elementwise) ----
    h = _layernorm(x, n1g_ref[...], n1b_ref[...], eps)
    h_bf = h.astype(bf16)

    # ---- K,V for all heads, computed TRANSPOSED: (2C, N).
    #      Per-head slices below are sublane-aligned major-dim slices (cheap).
    #      Single bulk bf16 cast of the whole activation. ----
    kvT = lax.dot_general(kvw_ref[...], h_bf, (((1,), (1,)), ((), ())),
                          preferred_element_type=f32) + kvb_ref[...]
    kvT = kvT.astype(bf16)                         # (2C, N), rows: [k | v], head-major

    # ---- multi-head attention with the output projection folded into the
    #      head loop: accumulate into one f32 (N, C) accumulator. ----
    acc = jnp.zeros((N, C), f32)
    for hh in range(num_heads):
        lo = hh * hd
        # q for this head produced directly by a tiny matmul (no lane slicing);
        # the attention scale is pre-folded into qw/qb on the host.
        q_h = (lax.dot_general(h_bf, qw_ref[hh], (((1,), (0,)), ((), ())),
                               preferred_element_type=f32)
               + qb_ref[hh]).astype(bf16)                        # (N, hd)
        k_hT = kvT[lo:lo + hd, :]                                # (hd, N)
        v_hT = kvT[C + lo:C + lo + hd, :]                        # (hd, N)

        s = lax.dot_general(q_h, k_hT, (((1,), (0,)), ((), ())),
                            preferred_element_type=f32)          # (N, N)
        s = s - jnp.max(s, axis=-1, keepdims=True)
        p = jnp.exp(s)
        denom = jnp.sum(p, axis=-1, keepdims=True)

        oh = lax.dot_general(p.astype(bf16), v_hT, (((1,), (1,)), ((), ())),
                             preferred_element_type=f32)         # (N, hd)
        # normalize the smaller post-PV tensor (EUP reciprocal, half the muls)
        oh = oh * pl.reciprocal(denom, approx=True)

        acc = acc + lax.dot_general(oh.astype(bf16), projw_ref[hh],
                                    (((1,), (0,)), ((), ())),
                                    preferred_element_type=f32)  # (N, C)

    x = x + acc + projb_ref[...]                   # residual 1

    # ---- LN2 -> fc1 + GELU(tanh) -> fc2 -> residual ----
    h2 = _layernorm(x, n2g_ref[...], n2b_ref[...], eps)
    h2 = jnp.dot(h2.astype(bf16), fc1w_ref[...],
                 preferred_element_type=f32) + fc1b_ref[...]
    h2 = _gelu_tanh(h2)                            # f32 elementwise (v5e-safe)
    mlp = jnp.dot(h2.astype(bf16), fc2w_ref[...],
                  preferred_element_type=f32) + fc2b_ref[...]

    o_ref[0] = (x + mlp).astype(o_ref.dtype)


# ---------------------------------------------------- one-time host weight prep

def prepare_block_params(p, *, num_heads=8):
    """One-time weight preprocessing (transpose / bf16 cast / scale fold).

    Hoisted out of the per-call jitted forward so the hot path sees only the
    pallas_call.  PyTorch weights use the (out, in) convention.
    """
    f32, bf16 = jnp.float32, jnp.bfloat16
    C = int(p['n1_g'].shape[0])
    hd = C // num_heads
    scale = np.float32(hd ** -0.5)

    qkv_w = jnp.asarray(p['qkv_w'], f32)           # (3C, C), rows: [q | k | v], head-major
    qkv_b = jnp.asarray(p['qkv_b'], f32)           # (3C,)

    # Q: per-head (in, out) weights (H, C, hd); attention scale folded in.
    q_w = (qkv_w[:C] * scale).reshape(num_heads, hd, C).transpose(0, 2, 1).astype(bf16)
    q_b = (qkv_b[:C] * scale).reshape(num_heads, 1, hd).astype(f32)
    # K,V: kept out-major (2C, C) so the kernel computes kvT = W_kv @ h^T directly.
    kv_w = qkv_w[C:].astype(bf16)
    kv_b = qkv_b[C:].reshape(2 * C, 1).astype(f32)

    # Proj: per-head (hd, C) input-row slices of W_proj^T.
    proj_w = jnp.asarray(p['proj_w'], f32).T.reshape(num_heads, hd, C).astype(bf16)

    row = lambda v: jnp.asarray(v, f32).reshape(1, -1)
    return dict(
        n1_g=row(p['n1_g']), n1_b=row(p['n1_b']),
        q_w=q_w, q_b=q_b, kv_w=kv_w, kv_b=kv_b,
        proj_w=proj_w, proj_b=row(p['proj_b']),
        n2_g=row(p['n2_g']), n2_b=row(p['n2_b']),
        fc1_w=jnp.asarray(p['fc1_w'], f32).T.astype(bf16), fc1_b=row(p['fc1_b']),
        fc2_w=jnp.asarray(p['fc2_w'], f32).T.astype(bf16), fc2_b=row(p['fc2_b']),
    )


# ----------------------------------------------------------------- forward pass

def block_forward(prepped, x, *, num_heads=8, eps=1e-5):
    """x: [B, N, C] f32; `prepped` from prepare_block_params."""
    B, N, C = x.shape
    hd = C // num_heads
    hidden = prepped['fc1_w'].shape[1]

    def wspec(shape):
        zeros = (0,) * len(shape)
        return pl.BlockSpec(shape, lambda b, _z=zeros: _z)   # weight resident across grid

    kernel = functools.partial(_block_kernel, num_heads=num_heads, eps=eps)

    return pl.pallas_call(
        kernel,
        out_shape=jax.ShapeDtypeStruct((B, N, C), jnp.float32),
        grid=(B,),
        in_specs=[
            pl.BlockSpec((1, N, C), lambda b: (b, 0, 0)),       # x
            wspec((1, C)), wspec((1, C)),                       # LN1 gamma/beta
            wspec((num_heads, C, hd)), wspec((num_heads, 1, hd)),  # per-head Q weight/bias
            wspec((2 * C, C)), wspec((2 * C, 1)),               # K,V weight/bias (out-major)
            wspec((num_heads, hd, C)), wspec((1, C)),           # per-head proj weight / bias
            wspec((1, C)), wspec((1, C)),                       # LN2 gamma/beta
            wspec((C, hidden)), wspec((1, hidden)),             # fc1 weight/bias
            wspec((hidden, C)), wspec((1, C)),                  # fc2 weight/bias
        ],
        out_specs=pl.BlockSpec((1, N, C), lambda b: (b, 0, 0)),
        compiler_params=pltpu.CompilerParams(
            dimension_semantics=("parallel",)),                 # 2 parallel steps for v7x
    )(x,
      prepped['n1_g'], prepped['n1_b'],
      prepped['q_w'], prepped['q_b'],
      prepped['kv_w'], prepped['kv_b'],
      prepped['proj_w'], prepped['proj_b'],
      prepped['n2_g'], prepped['n2_b'],
      prepped['fc1_w'], prepped['fc1_b'],
      prepped['fc2_w'], prepped['fc2_b'])


# --------------------------------------------------------------- pure-JAX reference

def block_reference(p, x, num_heads=8, eps=1e-5):
    B, N, C = x.shape
    hd = C // num_heads
    scale = hd ** (-0.5)

    def ln(v, g, b):
        m = jnp.mean(v, axis=-1, keepdims=True)
        var = jnp.mean(jnp.square(v - m), axis=-1, keepdims=True)
        return (v - m) / jnp.sqrt(var + eps) * g + b

    h = ln(x, p['n1_g'], p['n1_b'])
    qkv = h @ p['qkv_w'].T + p['qkv_b']
    qkv = qkv.reshape(B, N, 3, num_heads, hd).transpose(2, 0, 3, 1, 4)
    q, k, v = qkv[0], qkv[1], qkv[2]
    attn = jnp.einsum('bhqd,bhkd->bhqk', q, k) * scale
    attn = jax.nn.softmax(attn, axis=-1)
    o = jnp.einsum('bhqk,bhkd->bhqd', attn, v)
    o = o.transpose(0, 2, 1, 3).reshape(B, N, C)
    o = o @ p['proj_w'].T + p['proj_b']
    x = x + o
    h = ln(x, p['n2_g'], p['n2_b'])
    h = h @ p['fc1_w'].T + p['fc1_b']
    h = jax.nn.gelu(h, approximate=False)
    h = h @ p['fc2_w'].T + p['fc2_b']
    return x + h


# ----------------------------------------------------------------- parameters

def init_block_params(key, embed_dim=128, mlp_ratio=4.0):
    hidden = int(embed_dim * mlp_ratio)
    ks = jax.random.split(key, 8)
    nrm = lambda k, shape, s=0.02: jax.random.normal(k, shape, jnp.float32) * s
    return dict(
        n1_g=jnp.ones((embed_dim,), jnp.float32),
        n1_b=nrm(ks[0], (embed_dim,)),
        qkv_w=nrm(ks[1], (3 * embed_dim, embed_dim)),
        qkv_b=nrm(ks[2], (3 * embed_dim,)),
        proj_w=nrm(ks[3], (embed_dim, embed_dim)),
        proj_b=nrm(ks[4], (embed_dim,)),
        n2_g=jnp.ones((embed_dim,), jnp.float32),
        n2_b=nrm(ks[5], (embed_dim,)),
        fc1_w=nrm(ks[6], (hidden, embed_dim)),
        fc1_b=jnp.zeros((hidden,), jnp.float32),
        fc2_w=nrm(ks[7], (embed_dim, hidden)),
        fc2_b=jnp.zeros((embed_dim,), jnp.float32),
    )


# ----------------------------------------------------------------------- main

if __name__ == "__main__":
    key = jax.random.PRNGKey(0)
    kp, kx = jax.random.split(key)

    B, N, C, HEADS = 2, 32, 128, 8          # embed_dim=128, num_heads=8 (module defaults)

    params = init_block_params(kp, embed_dim=C)
    x = jax.random.normal(kx, (B, N, C), jnp.float32)

    prepped = prepare_block_params(params, num_heads=HEADS)   # one-time, outside hot path
    fwd = jax.jit(functools.partial(block_forward, num_heads=HEADS))
    out = fwd(prepped, x)
    jax.block_until_ready(out)

    assert out.shape == (B, N, C), out.shape
    assert bool(jnp.all(jnp.isfinite(out)))

    ref = block_reference(params, x, num_heads=HEADS)
    err = float(jnp.max(jnp.abs(out - ref)))
    assert err < 5e-2, f"max abs err vs f32 reference: {err}"

    print("KERNEL_OK")
</pallas_src>

<mosaic_0001>
module attributes {stable_mosaic.version = 11 : i64} {
  func.func @_block_kernel(%arg0: i32, %arg1: memref<1x32x128xf32, #tpu.memory_space<vmem>>, %arg2: memref<1x128xf32, #tpu.memory_space<vmem>>, %arg3: memref<1x128xf32, #tpu.memory_space<vmem>>, %arg4: memref<8x128x16xbf16, #tpu.memory_space<vmem>>, %arg5: memref<8x1x16xf32, #tpu.memory_space<vmem>>, %arg6: memref<256x128xbf16, #tpu.memory_space<vmem>>, %arg7: memref<256x1xf32, #tpu.memory_space<vmem>>, %arg8: memref<8x16x128xbf16, #tpu.memory_space<vmem>>, %arg9: memref<1x128xf32, #tpu.memory_space<vmem>>, %arg10: memref<1x128xf32, #tpu.memory_space<vmem>>, %arg11: memref<1x128xf32, #tpu.memory_space<vmem>>, %arg12: memref<128x512xbf16, #tpu.memory_space<vmem>>, %arg13: memref<1x512xf32, #tpu.memory_space<vmem>>, %arg14: memref<512x128xbf16, #tpu.memory_space<vmem>>, %arg15: memref<1x128xf32, #tpu.memory_space<vmem>>, %arg16: memref<1x32x128xf32, #tpu.memory_space<vmem>>) attributes {dimension_semantics = [#tpu.dimension_semantics<parallel>], iteration_bounds = array<i64: 2>, scalar_prefetch = 0 : i64, scratch_operands = 0 : i64, tpu.core_type = #tpu.core_type<tc>, window_params = [{transform_indices = @transform_0, window_bounds = array<i64: 1, 32, 128>}, {pipeline_mode = #tpu.pipeline_mode<synchronous>, transform_indices = @transform_1, window_bounds = array<i64: 1, 128>}, {pipeline_mode = #tpu.pipeline_mode<synchronous>, transform_indices = @transform_2, window_bounds = array<i64: 1, 128>}, {pipeline_mode = #tpu.pipeline_mode<synchronous>, transform_indices = @transform_3, window_bounds = array<i64: 8, 128, 16>}, {pipeline_mode = #tpu.pipeline_mode<synchronous>, transform_indices = @transform_4, window_bounds = array<i64: 8, 1, 16>}, {pipeline_mode = #tpu.pipeline_mode<synchronous>, transform_indices = @transform_5, window_bounds = array<i64: 256, 128>}, {pipeline_mode = #tpu.pipeline_mode<synchronous>, transform_indices = @transform_6, window_bounds = array<i64: 256, 1>}, {pipeline_mode = #tpu.pipeline_mode<synchronous>, transform_indices = @transform_7, window_bounds = array<i64: 8, 16, 128>}, {pipeline_mode = #tpu.pipeline_mode<synchronous>, transform_indices = @transform_8, window_bounds = array<i64: 1, 128>}, {pipeline_mode = #tpu.pipeline_mode<synchronous>, transform_indices = @transform_9, window_bounds = array<i64: 1, 128>}, {pipeline_mode = #tpu.pipeline_mode<synchronous>, transform_indices = @transform_10, window_bounds = array<i64: 1, 128>}, {pipeline_mode = #tpu.pipeline_mode<synchronous>, transform_indices = @transform_11, window_bounds = array<i64: 128, 512>}, {pipeline_mode = #tpu.pipeline_mode<synchronous>, transform_indices = @transform_12, window_bounds = array<i64: 1, 512>}, {pipeline_mode = #tpu.pipeline_mode<synchronous>, transform_indices = @transform_13, window_bounds = array<i64: 512, 128>}, {pipeline_mode = #tpu.pipeline_mode<synchronous>, transform_indices = @transform_14, window_bounds = array<i64: 1, 128>}, {transform_indices = @transform_15, window_bounds = array<i64: 1, 32, 128>}]} {
    %c0 = arith.constant 0 : index
    %c0_0 = arith.constant 0 : index
    %c0_1 = arith.constant 0 : index
    %0 = vector.load %arg1[%c0, %c0_0, %c0_1] : memref<1x32x128xf32, #tpu.memory_space<vmem>>, vector<1x32x128xf32>
    %1 = vector.shape_cast %0 : vector<1x32x128xf32> to vector<32x128xf32>
    %c0_2 = arith.constant 0 : index
    %c0_3 = arith.constant 0 : index
    %2 = vector.load %arg2[%c0_2, %c0_3] : memref<1x128xf32, #tpu.memory_space<vmem>>, vector<1x128xf32>
    %c0_4 = arith.constant 0 : index
    %c0_5 = arith.constant 0 : index
    %3 = vector.load %arg3[%c0_4, %c0_5] : memref<1x128xf32, #tpu.memory_space<vmem>>, vector<1x128xf32>
    %cst = arith.constant dense<0.000000e+00> : vector<32xf32>
    %4 = vector.multi_reduction <add>, %1, %cst [1] : vector<32x128xf32> to vector<32xf32>
    %5 = vector.shape_cast %4 : vector<32xf32> to vector<32x1xf32>
    %cst_6 = arith.constant 1.280000e+02 : f32
    %6 = vector.broadcast %cst_6 : f32 to vector<32x1xf32>
    %7 = arith.divf %5, %6 : vector<32x1xf32>
    %8 = vector.broadcast %7 : vector<32x1xf32> to vector<32x128xf32>
    %9 = arith.subf %1, %8 : vector<32x128xf32>
    %10 = arith.mulf %9, %9 : vector<32x128xf32>
    %cst_7 = arith.constant dense<0.000000e+00> : vector<32xf32>
    %11 = vector.multi_reduction <add>, %10, %cst_7 [1] : vector<32x128xf32> to vector<32xf32>
    %12 = vector.shape_cast %11 : vector<32xf32> to vector<32x1xf32>
    %cst_8 = arith.constant 1.280000e+02 : f32
    %13 = vector.broadcast %cst_8 : f32 to vector<32x1xf32>
    %14 = arith.divf %12, %13 : vector<32x1xf32>
    %15 = vector.broadcast %7 : vector<32x1xf32> to vector<32x128xf32>
    %16 = arith.subf %1, %15 : vector<32x128xf32>
    %cst_9 = arith.constant 9.99999974E-6 : f32
    %17 = vector.broadcast %cst_9 : f32 to vector<32x1xf32>
    %18 = arith.addf %14, %17 : vector<32x1xf32>
    %19 = math.rsqrt %18 : vector<32x1xf32>
    %20 = vector.broadcast %19 : vector<32x1xf32> to vector<32x128xf32>
    %21 = arith.mulf %16, %20 : vector<32x128xf32>
    %22 = vector.broadcast %2 : vector<1x128xf32> to vector<32x128xf32>
    %23 = arith.mulf %21, %22 : vector<32x128xf32>
    %24 = vector.broadcast %3 : vector<1x128xf32> to vector<32x128xf32>
    %25 = arith.addf %23, %24 : vector<32x128xf32>
    %26 = arith.truncf %25 : vector<32x128xf32> to vector<32x128xbf16>
    %c0_10 = arith.constant 0 : index
    %c0_11 = arith.constant 0 : index
    %27 = vector.load %arg6[%c0_10, %c0_11] : memref<256x128xbf16, #tpu.memory_space<vmem>>, vector<256x128xbf16>
    %cst_12 = arith.constant dense<0.000000e+00> : vector<256x32xf32>
    %28 = tpu.matmul %27, %26, %cst_12 {dimension_numbers = #tpu.dot_dimension_numbers<[1], [1], [0], [0], [0, 0, 1, 0], [], []>} : vector<256x128xbf16>, vector<32x128xbf16>, vector<256x32xf32> -> vector<256x32xf32>
    %c0_13 = arith.constant 0 : index
    %c0_14 = arith.constant 0 : index
    %29 = vector.load %arg7[%c0_13, %c0_14] : memref<256x1xf32, #tpu.memory_space<vmem>>, vector<256x1xf32>
    %30 = vector.broadcast %29 : vector<256x1xf32> to vector<256x32xf32>
    %31 = arith.addf %28, %30 : vector<256x32xf32>
    %32 = arith.truncf %31 : vector<256x32xf32> to vector<256x32xbf16>
    %cst_15 = arith.constant 0.000000e+00 : f32
    %33 = vector.broadcast %cst_15 : f32 to vector<32x128xf32>
    %c0_16 = arith.constant 0 : index
    %c0_17 = arith.constant 0 : index
    %c0_18 = arith.constant 0 : index
    %34 = vector.load %arg4[%c0_16, %c0_17, %c0_18] : memref<8x128x16xbf16, #tpu.memory_space<vmem>>, vector<1x128x16xbf16>
    %35 = vector.shape_cast %34 : vector<1x128x16xbf16> to vector<128x16xbf16>
    %cst_19 = arith.constant dense<0.000000e+00> : vector<32x16xf32>
    %36 = tpu.matmul %26, %35, %cst_19 {dimension_numbers = #tpu.dot_dimension_numbers<[1], [0], [0], [1], [0, 0, 1, 1], [], []>} : vector<32x128xbf16>, vector<128x16xbf16>, vector<32x16xf32> -> vector<32x16xf32>
    %c0_20 = arith.constant 0 : index
    %c0_21 = arith.constant 0 : index
    %c0_22 = arith.constant 0 : index
    %37 = vector.load %arg5[%c0_20, %c0_21, %c0_22] : memref<8x1x16xf32, #tpu.memory_space<vmem>>, vector<1x1x16xf32>
    %38 = vector.shape_cast %37 : vector<1x1x16xf32> to vector<1x16xf32>
    %39 = vector.broadcast %38 : vector<1x16xf32> to vector<32x16xf32>
    %40 = arith.addf %36, %39 : vector<32x16xf32>
    %41 = arith.truncf %40 : vector<32x16xf32> to vector<32x16xbf16>
    %42 = vector.extract_strided_slice %32 {offsets = [0, 0], sizes = [16, 32], strides = [1, 1]} : vector<256x32xbf16> to vector<16x32xbf16>
    %43 = vector.extract_strided_slice %32 {offsets = [128, 0], sizes = [16, 32], strides = [1, 1]} : vector<256x32xbf16> to vector<16x32xbf16>
    %cst_23 = arith.constant dense<0.000000e+00> : vector<32x32xf32>
    %44 = tpu.matmul %41, %42, %cst_23 {dimension_numbers = #tpu.dot_dimension_numbers<[1], [0], [0], [1], [0, 0, 1, 1], [], []>} : vector<32x16xbf16>, vector<16x32xbf16>, vector<32x32xf32> -> vector<32x32xf32>
    %cst_24 = arith.constant dense<0xFF800000> : vector<32xf32>
    %45 = vector.multi_reduction <maximumf>, %44, %cst_24 [1] : vector<32x32xf32> to vector<32xf32>
    %46 = vector.shape_cast %45 : vector<32xf32> to vector<32x1xf32>
    %47 = vector.broadcast %46 : vector<32x1xf32> to vector<32x32xf32>
    %48 = arith.subf %44, %47 : vector<32x32xf32>
    %49 = math.exp %48 : vector<32x32xf32>
    %cst_25 = arith.constant dense<0.000000e+00> : vector<32xf32>
    %50 = vector.multi_reduction <add>, %49, %cst_25 [1] : vector<32x32xf32> to vector<32xf32>
    %51 = vector.shape_cast %50 : vector<32xf32> to vector<32x1xf32>
    %52 = arith.truncf %49 : vector<32x32xf32> to vector<32x32xbf16>
    %cst_26 = arith.constant dense<0.000000e+00> : vector<32x16xf32>
    %53 = tpu.matmul %52, %43, %cst_26 {dimension_numbers = #tpu.dot_dimension_numbers<[1], [1], [0], [0], [0, 0, 1, 0], [], []>} : vector<32x32xbf16>, vector<16x32xbf16>, vector<32x16xf32> -> vector<32x16xf32>
    %54 = tpu.reciprocal %51 {approx = true} : vector<32x1xf32> -> vector<32x1xf32>
    %55 = vector.broadcast %54 : vector<32x1xf32> to vector<32x16xf32>
    %56 = arith.mulf %53, %55 : vector<32x16xf32>
    %57 = arith.truncf %56 : vector<32x16xf32> to vector<32x16xbf16>
    %c0_27 = arith.constant 0 : index
    %c0_28 = arith.constant 0 : index
    %c0_29 = arith.constant 0 : index
    %58 = vector.load %arg8[%c0_27, %c0_28, %c0_29] : memref<8x16x128xbf16, #tpu.memory_space<vmem>>, vector<1x16x128xbf16>
    %59 = vector.shape_cast %58 : vector<1x16x128xbf16> to vector<16x128xbf16>
    %cst_30 = arith.constant dense<0.000000e+00> : vector<32x128xf32>
    %60 = tpu.matmul %57, %59, %cst_30 {dimension_numbers = #tpu.dot_dimension_numbers<[1], [0], [0], [1], [0, 0, 1, 1], [], []>} : vector<32x16xbf16>, vector<16x128xbf16>, vector<32x128xf32> -> vector<32x128xf32>
    %61 = arith.addf %33, %60 : vector<32x128xf32>
    %c1 = arith.constant 1 : index
    %c0_31 = arith.constant 0 : index
    %c0_32 = arith.constant 0 : index
    %62 = vector.load %arg4[%c1, %c0_31, %c0_32] : memref<8x128x16xbf16, #tpu.memory_space<vmem>>, vector<1x128x16xbf16>
    %63 = vector.shape_cast %62 : vector<1x128x16xbf16> to vector<128x16xbf16>
    %cst_33 = arith.constant dense<0.000000e+00> : vector<32x16xf32>
    %64 = tpu.matmul %26, %63, %cst_33 {dimension_numbers = #tpu.dot_dimension_numbers<[1], [0], [0], [1], [0, 0, 1, 1], [], []>} : vector<32x128xbf16>, vector<128x16xbf16>, vector<32x16xf32> -> vector<32x16xf32>
    %c1_34 = arith.constant 1 : index
    %c0_35 = arith.constant 0 : index
    %c0_36 = arith.constant 0 : index
    %65 = vector.load %arg5[%c1_34, %c0_35, %c0_36] : memref<8x1x16xf32, #tpu.memory_space<vmem>>, vector<1x1x16xf32>
    %66 = vector.shape_cast %65 : vector<1x1x16xf32> to vector<1x16xf32>
    %67 = vector.broadcast %66 : vector<1x16xf32> to vector<32x16xf32>
    %68 = arith.addf %64, %67 : vector<32x16xf32>
    %69 = arith.truncf %68 : vector<32x16xf32> to vector<32x16xbf16>
    %70 = vector.extract_strided_slice %32 {offsets = [16, 0], sizes = [16, 32], strides = [1, 1]} : vector<256x32xbf16> to vector<16x32xbf16>
    %71 = vector.extract_strided_slice %32 {offsets = [144, 0], sizes = [16, 32], strides = [1, 1]} : vector<256x32xbf16> to vector<16x32xbf16>
    %cst_37 = arith.constant dense<0.000000e+00> : vector<32x32xf32>
    %72 = tpu.matmul %69, %70, %cst_37 {dimension_numbers = #tpu.dot_dimension_numbers<[1], [0], [0], [1], [0, 0, 1, 1], [], []>} : vector<32x16xbf16>, vector<16x32xbf16>, vector<32x32xf32> -> vector<32x32xf32>
    %cst_38 = arith.constant dense<0xFF800000> : vector<32xf32>
    %73 = vector.multi_reduction <maximumf>, %72, %cst_38 [1] : vector<32x32xf32> to vector<32xf32>
    %74 = vector.shape_cast %73 : vector<32xf32> to vector<32x1xf32>
    %75 = vector.broadcast %74 : vector<32x1xf32> to vector<32x32xf32>
    %76 = arith.subf %72, %75 : vector<32x32xf32>
    %77 = math.exp %76 : vector<32x32xf32>
    %cst_39 = arith.constant dense<0.000000e+00> : vector<32xf32>
    %78 = vector.multi_reduction <add>, %77, %cst_39 [1] : vector<32x32xf32> to vector<32xf32>
    %79 = vector.shape_cast %78 : vector<32xf32> to vector<32x1xf32>
    %80 = arith.truncf %77 : vector<32x32xf32> to vector<32x32xbf16>
    %cst_40 = arith.constant dense<0.000000e+00> : vector<32x16xf32>
    %81 = tpu.matmul %80, %71, %cst_40 {dimension_numbers = #tpu.dot_dimension_numbers<[1], [1], [0], [0], [0, 0, 1, 0], [], []>} : vector<32x32xbf16>, vector<16x32xbf16>, vector<32x16xf32> -> vector<32x16xf32>
    %82 = tpu.reciprocal %79 {approx = true} : vector<32x1xf32> -> vector<32x1xf32>
    %83 = vector.broadcast %82 : vector<32x1xf32> to vector<32x16xf32>
    %84 = arith.mulf %81, %83 : vector<32x16xf32>
    %85 = arith.truncf %84 : vector<32x16xf32> to vector<32x16xbf16>
    %c1_41 = arith.constant 1 : index
    %c0_42 = arith.constant 0 : index
    %c0_43 = arith.constant 0 : index
    %86 = vector.load %arg8[%c1_41, %c0_42, %c0_43] : memref<8x16x128xbf16, #tpu.memory_space<vmem>>, vector<1x16x128xbf16>
    %87 = vector.shape_cast %86 : vector<1x16x128xbf16> to vector<16x128xbf16>
    %cst_44 = arith.constant dense<0.000000e+00> : vector<32x128xf32>
    %88 = tpu.matmul %85, %87, %cst_44 {dimension_numbers = #tpu.dot_dimension_numbers<[1], [0], [0], [1], [0, 0, 1, 1], [], []>} : vector<32x16xbf16>, vector<16x128xbf16>, vector<32x128xf32> -> vector<32x128xf32>
    %89 = arith.addf %61, %88 : vector<32x128xf32>
    %c2 = arith.constant 2 : index
    %c0_45 = arith.constant 0 : index
    %c0_46 = arith.constant 0 : index
    %90 = vector.load %arg4[%c2, %c0_45, %c0_46] : memref<8x128x16xbf16, #tpu.memory_space<vmem>>, vector<1x128x16xbf16>
    %91 = vector.shape_cast %90 : vector<1x128x16xbf16> to vector<128x16xbf16>
    %cst_47 = arith.constant dense<0.000000e+00> : vector<32x16xf32>
    %92 = tpu.matmul %26, %91, %cst_47 {dimension_numbers = #tpu.dot_dimension_numbers<[1], [0], [0], [1], [0, 0, 1, 1], [], []>} : vector<32x128xbf16>, vector<128x16xbf16>, vector<32x16xf32> -> vector<32x16xf32>
    %c2_48 = arith.constant 2 : index
    %c0_49 = arith.constant 0 : index
    %c0_50 = arith.constant 0 : index
    %93 = vector.load %arg5[%c2_48, %c0_49, %c0_50] : memref<8x1x16xf32, #tpu.memory_space<vmem>>, vector<1x1x16xf32>
    %94 = vector.shape_cast %93 : vector<1x1x16xf32> to vector<1x16xf32>
    %95 = vector.broadcast %94 : vector<1x16xf32> to vector<32x16xf32>
    %96 = arith.addf %92, %95 : vector<32x16xf32>
    %97 = arith.truncf %96 : vector<32x16xf32> to vector<32x16xbf16>
    %98 = vector.extract_strided_slice %32 {offsets = [32, 0], sizes = [16, 32], strides = [1, 1]} : vector<256x32xbf16> to vector<16x32xbf16>
    %99 = vector.extract_strided_slice %32 {offsets = [160, 0], sizes = [16, 32], strides = [1, 1]} : vector<256x32xbf16> to vector<16x32xbf16>
    %cst_51 = arith.constant dense<0.000000e+00> : vector<32x32xf32>
    %100 = tpu.matmul %97, %98, %cst_51 {dimension_numbers = #tpu.dot_dimension_numbers<[1], [0], [0], [1], [0, 0, 1, 1], [], []>} : vector<32x16xbf16>, vector<16x32xbf16>, vector<32x32xf32> -> vector<32x32xf32>
    %cst_52 = arith.constant dense<0xFF800000> : vector<32xf32>
    %101 = vector.multi_reduction <maximumf>, %100, %cst_52 [1] : vector<32x32xf32> to vector<32xf32>
    %102 = vector.shape_cast %101 : vector<32xf32> to vector<32x1xf32>
    %103 = vector.broadcast %102 : vector<32x1xf32> to vector<32x32xf32>
    %104 = arith.subf %100, %103 : vector<32x32xf32>
    %105 = math.exp %104 : vector<32x32xf32>
    %cst_53 = arith.constant dense<0.000000e+00> : vector<32xf32>
    %106 = vector.multi_reduction <add>, %105, %cst_53 [1] : vector<32x32xf32> to vector<32xf32>
    %107 = vector.shape_cast %106 : vector<32xf32> to vector<32x1xf32>
    %108 = arith.truncf %105 : vector<32x32xf32> to vector<32x32xbf16>
    %cst_54 = arith.constant dense<0.000000e+00> : vector<32x16xf32>
    %109 = tpu.matmul %108, %99, %cst_54 {dimension_numbers = #tpu.dot_dimension_numbers<[1], [1], [0], [0], [0, 0, 1, 0], [], []>} : vector<32x32xbf16>, vector<16x32xbf16>, vector<32x16xf32> -> vector<32x16xf32>
    %110 = tpu.reciprocal %107 {approx = true} : vector<32x1xf32> -> vector<32x1xf32>
    %111 = vector.broadcast %110 : vector<32x1xf32> to vector<32x16xf32>
    %112 = arith.mulf %109, %111 : vector<32x16xf32>
    %113 = arith.truncf %112 : vector<32x16xf32> to vector<32x16xbf16>
    %c2_55 = arith.constant 2 : index
    %c0_56 = arith.constant 0 : index
    %c0_57 = arith.constant 0 : index
    %114 = vector.load %arg8[%c2_55, %c0_56, %c0_57] : memref<8x16x128xbf16, #tpu.memory_space<vmem>>, vector<1x16x128xbf16>
    %115 = vector.shape_cast %114 : vector<1x16x128xbf16> to vector<16x128xbf16>
    %cst_58 = arith.constant dense<0.000000e+00> : vector<32x128xf32>
    %116 = tpu.matmul %113, %115, %cst_58 {dimension_numbers = #tpu.dot_dimension_numbers<[1], [0], [0], [1], [0, 0, 1, 1], [], []>} : vector<32x16xbf16>, vector<16x128xbf16>, vector<32x128xf32> -> vector<32x128xf32>
    %117 = arith.addf %89, %116 : vector<32x128xf32>
    %c3 = arith.constant 3 : index
    %c0_59 = arith.constant 0 : index
    %c0_60 = arith.constant 0 : index
    %118 = vector.load %arg4[%c3, %c0_59, %c0_60] : memref<8x128x16xbf16, #tpu.memory_space<vmem>>, vector<1x128x16xbf16>
    %119 = vector.shape_cast %118 : vector<1x128x16xbf16> to vector<128x16xbf16>
    %cst_61 = arith.constant dense<0.000000e+00> : vector<32x16xf32>
    %120 = tpu.matmul %26, %119, %cst_61 {dimension_numbers = #tpu.dot_dimension_numbers<[1], [0], [0], [1], [0, 0, 1, 1], [], []>} : vector<32x128xbf16>, vector<128x16xbf16>, vector<32x16xf32> -> vector<32x16xf32>
    %c3_62 = arith.constant 3 : index
    %c0_63 = arith.constant 0 : index
    %c0_64 = arith.constant 0 : index
    %121 = vector.load %arg5[%c3_62, %c0_63, %c0_64] : memref<8x1x16xf32, #tpu.memory_space<vmem>>, vector<1x1x16xf32>
    %122 = vector.shape_cast %121 : vector<1x1x16xf32> to vector<1x16xf32>
    %123 = vector.broadcast %122 : vector<1x16xf32> to vector<32x16xf32>
    %124 = arith.addf %120, %123 : vector<32x16xf32>
    %125 = arith.truncf %124 : vector<32x16xf32> to vector<32x16xbf16>
    %126 = vector.extract_strided_slice %32 {offsets = [48, 0], sizes = [16, 32], strides = [1, 1]} : vector<256x32xbf16> to vector<16x32xbf16>
    %127 = vector.extract_strided_slice %32 {offsets = [176, 0], sizes = [16, 32], strides = [1, 1]} : vector<256x32xbf16> to vector<16x32xbf16>
    %cst_65 = arith.constant dense<0.000000e+00> : vector<32x32xf32>
    %128 = tpu.matmul %125, %126, %cst_65 {dimension_numbers = #tpu.dot_dimension_numbers<[1], [0], [0], [1], [0, 0, 1, 1], [], []>} : vector<32x16xbf16>, vector<16x32xbf16>, vector<32x32xf32> -> vector<32x32xf32>
    %cst_66 = arith.constant dense<0xFF800000> : vector<32xf32>
    %129 = vector.multi_reduction <maximumf>, %128, %cst_66 [1] : vector<32x32xf32> to vector<32xf32>
    %130 = vector.shape_cast %129 : vector<32xf32> to vector<32x1xf32>
    %131 = vector.broadcast %130 : vector<32x1xf32> to vector<32x32xf32>
    %132 = arith.subf %128, %131 : vector<32x32xf32>
    %133 = math.exp %132 : vector<32x32xf32>
    %cst_67 = arith.constant dense<0.000000e+00> : vector<32xf32>
    %134 = vector.multi_reduction <add>, %133, %cst_67 [1] : vector<32x32xf32> to vector<32xf32>
    %135 = vector.shape_cast %134 : vector<32xf32> to vector<32x1xf32>
    %136 = arith.truncf %133 : vector<32x32xf32> to vector<32x32xbf16>
    %cst_68 = arith.constant dense<0.000000e+00> : vector<32x16xf32>
    %137 = tpu.matmul %136, %127, %cst_68 {dimension_numbers = #tpu.dot_dimension_numbers<[1], [1], [0], [0], [0, 0, 1, 0], [], []>} : vector<32x32xbf16>, vector<16x32xbf16>, vector<32x16xf32> -> vector<32x16xf32>
    %138 = tpu.reciprocal %135 {approx = true} : vector<32x1xf32> -> vector<32x1xf32>
    %139 = vector.broadcast %138 : vector<32x1xf32> to vector<32x16xf32>
    %140 = arith.mulf %137, %139 : vector<32x16xf32>
    %141 = arith.truncf %140 : vector<32x16xf32> to vector<32x16xbf16>
    %c3_69 = arith.constant 3 : index
    %c0_70 = arith.constant 0 : index
    %c0_71 = arith.constant 0 : index
    %142 = vector.load %arg8[%c3_69, %c0_70, %c0_71] : memref<8x16x128xbf16, #tpu.memory_space<vmem>>, vector<1x16x128xbf16>
    %143 = vector.shape_cast %142 : vector<1x16x128xbf16> to vector<16x128xbf16>
    %cst_72 = arith.constant dense<0.000000e+00> : vector<32x128xf32>
    %144 = tpu.matmul %141, %143, %cst_72 {dimension_numbers = #tpu.dot_dimension_numbers<[1], [0], [0], [1], [0, 0, 1, 1], [], []>} : vector<32x16xbf16>, vector<16x128xbf16>, vector<32x128xf32> -> vector<32x128xf32>
    %145 = arith.addf %117, %144 : vector<32x128xf32>
    %c4 = arith.constant 4 : index
    %c0_73 = arith.constant 0 : index
    %c0_74 = arith.constant 0 : index
    %146 = vector.load %arg4[%c4, %c0_73, %c0_74] : memref<8x128x16xbf16, #tpu.memory_space<vmem>>, vector<1x128x16xbf16>
    %147 = vector.shape_cast %146 : vector<1x128x16xbf16> to vector<128x16xbf16>
    %cst_75 = arith.constant dense<0.000000e+00> : vector<32x16xf32>
    %148 = tpu.matmul %26, %147, %cst_75 {dimension_numbers = #tpu.dot_dimension_numbers<[1], [0], [0], [1], [0, 0, 1, 1], [], []>} : vector<32x128xbf16>, vector<128x16xbf16>, vector<32x16xf32> -> vector<32x16xf32>
    %c4_76 = arith.constant 4 : index
    %c0_77 = arith.constant 0 : index
    %c0_78 = arith.constant 0 : index
    %149 = vector.load %arg5[%c4_76, %c0_77, %c0_78] : memref<8x1x16xf32, #tpu.memory_space<vmem>>, vector<1x1x16xf32>
    %150 = vector.shape_cast %149 : vector<1x1x16xf32> to vector<1x16xf32>
    %151 = vector.broadcast %150 : vector<1x16xf32> to vector<32x16xf32>
    %152 = arith.addf %148, %151 : vector<32x16xf32>
    %153 = arith.truncf %152 : vector<32x16xf32> to vector<32x16xbf16>
    %154 = vector.extract_strided_slice %32 {offsets = [64, 0], sizes = [16, 32], strides = [1, 1]} : vector<256x32xbf16> to vector<16x32xbf16>
    %155 = vector.extract_strided_slice %32 {offsets = [192, 0], sizes = [16, 32], strides = [1, 1]} : vector<256x32xbf16> to vector<16x32xbf16>
    %cst_79 = arith.constant dense<0.000000e+00> : vector<32x32xf32>
    %156 = tpu.matmul %153, %154, %cst_79 {dimension_numbers = #tpu.dot_dimension_numbers<[1], [0], [0], [1], [0, 0, 1, 1], [], []>} : vector<32x16xbf16>, vector<16x32xbf16>, vector<32x32xf32> -> vector<32x32xf32>
    %cst_80 = arith.constant dense<0xFF800000> : vector<32xf32>
    %157 = vector.multi_reduction <maximumf>, %156, %cst_80 [1] : vector<32x32xf32> to vector<32xf32>
    %158 = vector.shape_cast %157 : vector<32xf32> to vector<32x1xf32>
    %159 = vector.broadcast %158 : vector<32x1xf32> to vector<32x32xf32>
    %160 = arith.subf %156, %159 : vector<32x32xf32>
    %161 = math.exp %160 : vector<32x32xf32>
    %cst_81 = arith.constant dense<0.000000e+00> : vector<32xf32>
    %162 = vector.multi_reduction <add>, %161, %cst_81 [1] : vector<32x32xf32> to vector<32xf32>
    %163 = vector.shape_cast %162 : vector<32xf32> to vector<32x1xf32>
    %164 = arith.truncf %161 : vector<32x32xf32> to vector<32x32xbf16>
    %cst_82 = arith.constant dense<0.000000e+00> : vector<32x16xf32>
    %165 = tpu.matmul %164, %155, %cst_82 {dimension_numbers = #tpu.dot_dimension_numbers<[1], [1], [0], [0], [0, 0, 1, 0], [], []>} : vector<32x32xbf16>, vector<16x32xbf16>, vector<32x16xf32> -> vector<32x16xf32>
    %166 = tpu.reciprocal %163 {approx = true} : vector<32x1xf32> -> vector<32x1xf32>
    %167 = vector.broadcast %166 : vector<32x1xf32> to vector<32x16xf32>
    %168 = arith.mulf %165, %167 : vector<32x16xf32>
    %169 = arith.truncf %168 : vector<32x16xf32> to vector<32x16xbf16>
    %c4_83 = arith.constant 4 : index
    %c0_84 = arith.constant 0 : index
    %c0_85 = arith.constant 0 : index
    %170 = vector.load %arg8[%c4_83, %c0_84, %c0_85] : memref<8x16x128xbf16, #tpu.memory_space<vmem>>, vector<1x16x128xbf16>
    %171 = vector.shape_cast %170 : vector<1x16x128xbf16> to vector<16x128xbf16>
    %cst_86 = arith.constant dense<0.000000e+00> : vector<32x128xf32>
    %172 = tpu.matmul %169, %171, %cst_86 {dimension_numbers = #tpu.dot_dimension_numbers<[1], [0], [0], [1], [0, 0, 1, 1], [], []>} : vector<32x16xbf16>, vector<16x128xbf16>, vector<32x128xf32> -> vector<32x128xf32>
    %173 = arith.addf %145, %172 : vector<32x128xf32>
    %c5 = arith.constant 5 : index
    %c0_87 = arith.constant 0 : index
    %c0_88 = arith.constant 0 : index
    %174 = vector.load %arg4[%c5, %c0_87, %c0_88] : memref<8x128x16xbf16, #tpu.memory_space<vmem>>, vector<1x128x16xbf16>
    %175 = vector.shape_cast %174 : vector<1x128x16xbf16> to vector<128x16xbf16>
    %cst_89 = arith.constant dense<0.000000e+00> : vector<32x16xf32>
    %176 = tpu.matmul %26, %175, %cst_89 {dimension_numbers = #tpu.dot_dimension_numbers<[1], [0], [0], [1], [0, 0, 1, 1], [], []>} : vector<32x128xbf16>, vector<128x16xbf16>, vector<32x16xf32> -> vector<32x16xf32>
    %c5_90 = arith.constant 5 : index
    %c0_91 = arith.constant 0 : index
    %c0_92 = arith.constant 0 : index
    %177 = vector.load %arg5[%c5_90, %c0_91, %c0_92] : memref<8x1x16xf32, #tpu.memory_space<vmem>>, vector<1x1x16xf32>
    %178 = vector.shape_cast %177 : vector<1x1x16xf32> to vector<1x16xf32>
    %179 = vector.broadcast %178 : vector<1x16xf32> to vector<32x16xf32>
    %180 = arith.addf %176, %179 : vector<32x16xf32>
    %181 = arith.truncf %180 : vector<32x16xf32> to vector<32x16xbf16>
    %182 = vector.extract_strided_slice %32 {offsets = [80, 0], sizes = [16, 32], strides = [1, 1]} : vector<256x32xbf16> to vector<16x32xbf16>
    %183 = vector.extract_strided_slice %32 {offsets = [208, 0], sizes = [16, 32], strides = [1, 1]} : vector<256x32xbf16> to vector<16x32xbf16>
    %cst_93 = arith.constant dense<0.000000e+00> : vector<32x32xf32>
    %184 = tpu.matmul %181, %182, %cst_93 {dimension_numbers = #tpu.dot_dimension_numbers<[1], [0], [0], [1], [0, 0, 1, 1], [], []>} : vector<32x16xbf16>, vector<16x32xbf16>, vector<32x32xf32> -> vector<32x32xf32>
    %cst_94 = arith.constant dense<0xFF800000> : vector<32xf32>
    %185 = vector.multi_reduction <maximumf>, %184, %cst_94 [1] : vector<32x32xf32> to vector<32xf32>
    %186 = vector.shape_cast %185 : vector<32xf32> to vector<32x1xf32>
    %187 = vector.broadcast %186 : vector<32x1xf32> to vector<32x32xf32>
    %188 = arith.subf %184, %187 : vector<32x32xf32>
    %189 = math.exp %188 : vector<32x32xf32>
    %cst_95 = arith.constant dense<0.000000e+00> : vector<32xf32>
    %190 = vector.multi_reduction <add>, %189, %cst_95 [1] : vector<32x32xf32> to vector<32xf32>
    %191 = vector.shape_cast %190 : vector<32xf32> to vector<32x1xf32>
    %192 = arith.truncf %189 : vector<32x32xf32> to vector<32x32xbf16>
    %cst_96 = arith.constant dense<0.000000e+00> : vector<32x16xf32>
    %193 = tpu.matmul %192, %183, %cst_96 {dimension_numbers = #tpu.dot_dimension_numbers<[1], [1], [0], [0], [0, 0, 1, 0], [], []>} : vector<32x32xbf16>, vector<16x32xbf16>, vector<32x16xf32> -> vector<32x16xf32>
    %194 = tpu.reciprocal %191 {approx = true} : vector<32x1xf32> -> vector<32x1xf32>
    %195 = vector.broadcast %194 : vector<32x1xf32> to vector<32x16xf32>
    %196 = arith.mulf %193, %195 : vector<32x16xf32>
    %197 = arith.truncf %196 : vector<32x16xf32> to vector<32x16xbf16>
    %c5_97 = arith.constant 5 : index
    %c0_98 = arith.constant 0 : index
    %c0_99 = arith.constant 0 : index
    %198 = vector.load %arg8[%c5_97, %c0_98, %c0_99] : memref<8x16x128xbf16, #tpu.memory_space<vmem>>, vector<1x16x128xbf16>
    %199 = vector.shape_cast %198 : vector<1x16x128xbf16> to vector<16x128xbf16>
    %cst_100 = arith.constant dense<0.000000e+00> : vector<32x128xf32>
    %200 = tpu.matmul %197, %199, %cst_100 {dimension_numbers = #tpu.dot_dimension_numbers<[1], [0], [0], [1], [0, 0, 1, 1], [], []>} : vector<32x16xbf16>, vector<16x128xbf16>, vector<32x128xf32> -> vector<32x128xf32>
    %201 = arith.addf %173, %200 : vector<32x128xf32>
    %c6 = arith.constant 6 : index
    %c0_101 = arith.constant 0 : index
    %c0_102 = arith.constant 0 : index
    %202 = vector.load %arg4[%c6, %c0_101, %c0_102] : memref<8x128x16xbf16, #tpu.memory_space<vmem>>, vector<1x128x16xbf16>
    %203 = vector.shape_cast %202 : vector<1x128x16xbf16> to vector<128x16xbf16>
    %cst_103 = arith.constant dense<0.000000e+00> : vector<32x16xf32>
    %204 = tpu.matmul %26, %203, %cst_103 {dimension_numbers = #tpu.dot_dimension_numbers<[1], [0], [0], [1], [0, 0, 1, 1], [], []>} : vector<32x128xbf16>, vector<128x16xbf16>, vector<32x16xf32> -> vector<32x16xf32>
    %c6_104 = arith.constant 6 : index
    %c0_105 = arith.constant 0 : index
    %c0_106 = arith.constant 0 : index
    %205 = vector.load %arg5[%c6_104, %c0_105, %c0_106] : memref<8x1x16xf32, #tpu.memory_space<vmem>>, vector<1x1x16xf32>
    %206 = vector.shape_cast %205 : vector<1x1x16xf32> to vector<1x16xf32>
    %207 = vector.broadcast %206 : vector<1x16xf32> to vector<32x16xf32>
    %208 = arith.addf %204, %207 : vector<32x16xf32>
    %209 = arith.truncf %208 : vector<32x16xf32> to vector<32x16xbf16>
    %210 = vector.extract_strided_slice %32 {offsets = [96, 0], sizes = [16, 32], strides = [1, 1]} : vector<256x32xbf16> to vector<16x32xbf16>
    %211 = vector.extract_strided_slice %32 {offsets = [224, 0], sizes = [16, 32], strides = [1, 1]} : vector<256x32xbf16> to vector<16x32xbf16>
    %cst_107 = arith.constant dense<0.000000e+00> : vector<32x32xf32>
    %212 = tpu.matmul %209, %210, %cst_107 {dimension_numbers = #tpu.dot_dimension_numbers<[1], [0], [0], [1], [0, 0, 1, 1], [], []>} : vector<32x16xbf16>, vector<16x32xbf16>, vector<32x32xf32> -> vector<32x32xf32>
    %cst_108 = arith.constant dense<0xFF800000> : vector<32xf32>
    %213 = vector.multi_reduction <maximumf>, %212, %cst_108 [1] : vector<32x32xf32> to vector<32xf32>
    %214 = vector.shape_cast %213 : vector<32xf32> to vector<32x1xf32>
    %215 = vector.broadcast %214 : vector<32x1xf32> to vector<32x32xf32>
    %216 = arith.subf %212, %215 : vector<32x32xf32>
    %217 = math.exp %216 : vector<32x32xf32>
    %cst_109 = arith.constant dense<0.000000e+00> : vector<32xf32>
    %218 = vector.multi_reduction <add>, %217, %cst_109 [1] : vector<32x32xf32> to vector<32xf32>
    %219 = vector.shape_cast %218 : vector<32xf32> to vector<32x1xf32>
    %220 = arith.truncf %217 : vector<32x32xf32> to vector<32x32xbf16>
    %cst_110 = arith.constant dense<0.000000e+00> : vector<32x16xf32>
    %221 = tpu.matmul %220, %211, %cst_110 {dimension_numbers = #tpu.dot_dimension_numbers<[1], [1], [0], [0], [0, 0, 1, 0], [], []>} : vector<32x32xbf16>, vector<16x32xbf16>, vector<32x16xf32> -> vector<32x16xf32>
    %222 = tpu.reciprocal %219 {approx = true} : vector<32x1xf32> -> vector<32x1xf32>
    %223 = vector.broadcast %222 : vector<32x1xf32> to vector<32x16xf32>
    %224 = arith.mulf %221, %223 : vector<32x16xf32>
    %225 = arith.truncf %224 : vector<32x16xf32> to vector<32x16xbf16>
    %c6_111 = arith.constant 6 : index
    %c0_112 = arith.constant 0 : index
    %c0_113 = arith.constant 0 : index
    %226 = vector.load %arg8[%c6_111, %c0_112, %c0_113] : memref<8x16x128xbf16, #tpu.memory_space<vmem>>, vector<1x16x128xbf16>
    %227 = vector.shape_cast %226 : vector<1x16x128xbf16> to vector<16x128xbf16>
    %cst_114 = arith.constant dense<0.000000e+00> : vector<32x128xf32>
    %228 = tpu.matmul %225, %227, %cst_114 {dimension_numbers = #tpu.dot_dimension_numbers<[1], [0], [0], [1], [0, 0, 1, 1], [], []>} : vector<32x16xbf16>, vector<16x128xbf16>, vector<32x128xf32> -> vector<32x128xf32>
    %229 = arith.addf %201, %228 : vector<32x128xf32>
    %c7 = arith.constant 7 : index
    %c0_115 = arith.constant 0 : index
    %c0_116 = arith.constant 0 : index
    %230 = vector.load %arg4[%c7, %c0_115, %c0_116] : memref<8x128x16xbf16, #tpu.memory_space<vmem>>, vector<1x128x16xbf16>
    %231 = vector.shape_cast %230 : vector<1x128x16xbf16> to vector<128x16xbf16>
    %cst_117 = arith.constant dense<0.000000e+00> : vector<32x16xf32>
    %232 = tpu.matmul %26, %231, %cst_117 {dimension_numbers = #tpu.dot_dimension_numbers<[1], [0], [0], [1], [0, 0, 1, 1], [], []>} : vector<32x128xbf16>, vector<128x16xbf16>, vector<32x16xf32> -> vector<32x16xf32>
    %c7_118 = arith.constant 7 : index
    %c0_119 = arith.constant 0 : index
    %c0_120 = arith.constant 0 : index
    %233 = vector.load %arg5[%c7_118, %c0_119, %c0_120] : memref<8x1x16xf32, #tpu.memory_space<vmem>>, vector<1x1x16xf32>
    %234 = vector.shape_cast %233 : vector<1x1x16xf32> to vector<1x16xf32>
    %235 = vector.broadcast %234 : vector<1x16xf32> to vector<32x16xf32>
    %236 = arith.addf %232, %235 : vector<32x16xf32>
    %237 = arith.truncf %236 : vector<32x16xf32> to vector<32x16xbf16>
    %238 = vector.extract_strided_slice %32 {offsets = [112, 0], sizes = [16, 32], strides = [1, 1]} : vector<256x32xbf16> to vector<16x32xbf16>
    %239 = vector.extract_strided_slice %32 {offsets = [240, 0], sizes = [16, 32], strides = [1, 1]} : vector<256x32xbf16> to vector<16x32xbf16>
    %cst_121 = arith.constant dense<0.000000e+00> : vector<32x32xf32>
    %240 = tpu.matmul %237, %238, %cst_121 {dimension_numbers = #tpu.dot_dimension_numbers<[1], [0], [0], [1], [0, 0, 1, 1], [], []>} : vector<32x16xbf16>, vector<16x32xbf16>, vector<32x32xf32> -> vector<32x32xf32>
    %cst_122 = arith.constant dense<0xFF800000> : vector<32xf32>
    %241 = vector.multi_reduction <maximumf>, %240, %cst_122 [1] : vector<32x32xf32> to vector<32xf32>
    %242 = vector.shape_cast %241 : vector<32xf32> to vector<32x1xf32>
    %243 = vector.broadcast %242 : vector<32x1xf32> to vector<32x32xf32>
    %244 = arith.subf %240, %243 : vector<32x32xf32>
    %245 = math.exp %244 : vector<32x32xf32>
    %cst_123 = arith.constant dense<0.000000e+00> : vector<32xf32>
    %246 = vector.multi_reduction <add>, %245, %cst_123 [1] : vector<32x32xf32> to vector<32xf32>
    %247 = vector.shape_cast %246 : vector<32xf32> to vector<32x1xf32>
    %248 = arith.truncf %245 : vector<32x32xf32> to vector<32x32xbf16>
    %cst_124 = arith.constant dense<0.000000e+00> : vector<32x16xf32>
    %249 = tpu.matmul %248, %239, %cst_124 {dimension_numbers = #tpu.dot_dimension_numbers<[1], [1], [0], [0], [0, 0, 1, 0], [], []>} : vector<32x32xbf16>, vector<16x32xbf16>, vector<32x16xf32> -> vector<32x16xf32>
    %250 = tpu.reciprocal %247 {approx = true} : vector<32x1xf32> -> vector<32x1xf32>
    %251 = vector.broadcast %250 : vector<32x1xf32> to vector<32x16xf32>
    %252 = arith.mulf %249, %251 : vector<32x16xf32>
    %253 = arith.truncf %252 : vector<32x16xf32> to vector<32x16xbf16>
    %c7_125 = arith.constant 7 : index
    %c0_126 = arith.constant 0 : index
    %c0_127 = arith.constant 0 : index
    %254 = vector.load %arg8[%c7_125, %c0_126, %c0_127] : memref<8x16x128xbf16, #tpu.memory_space<vmem>>, vector<1x16x128xbf16>
    %255 = vector.shape_cast %254 : vector<1x16x128xbf16> to vector<16x128xbf16>
    %cst_128 = arith.constant dense<0.000000e+00> : vector<32x128xf32>
    %256 = tpu.matmul %253, %255, %cst_128 {dimension_numbers = #tpu.dot_dimension_numbers<[1], [0], [0], [1], [0, 0, 1, 1], [], []>} : vector<32x16xbf16>, vector<16x128xbf16>, vector<32x128xf32> -> vector<32x128xf32>
    %257 = arith.addf %229, %256 : vector<32x128xf32>
    %258 = arith.addf %1, %257 : vector<32x128xf32>
    %c0_129 = arith.constant 0 : index
    %c0_130 = arith.constant 0 : index
    %259 = vector.load %arg9[%c0_129, %c0_130] : memref<1x128xf32, #tpu.memory_space<vmem>>, vector<1x128xf32>
    %260 = vector.broadcast %259 : vector<1x128xf32> to vector<32x128xf32>
    %261 = arith.addf %258, %260 : vector<32x128xf32>
    %c0_131 = arith.constant 0 : index
    %c0_132 = arith.constant 0 : index
    %262 = vector.load %arg10[%c0_131, %c0_132] : memref<1x128xf32, #tpu.memory_space<vmem>>, vector<1x128xf32>
    %c0_133 = arith.constant 0 : index
    %c0_134 = arith.constant 0 : index
    %263 = vector.load %arg11[%c0_133, %c0_134] : memref<1x128xf32, #tpu.memory_space<vmem>>, vector<1x128xf32>
    %cst_135 = arith.constant dense<0.000000e+00> : vector<32xf32>
    %264 = vector.multi_reduction <add>, %261, %cst_135 [1] : vector<32x128xf32> to vector<32xf32>
    %265 = vector.shape_cast %264 : vector<32xf32> to vector<32x1xf32>
    %cst_136 = arith.constant 1.280000e+02 : f32
    %266 = vector.broadcast %cst_136 : f32 to vector<32x1xf32>
    %267 = arith.divf %265, %266 : vector<32x1xf32>
    %268 = vector.broadcast %267 : vector<32x1xf32> to vector<32x128xf32>
    %269 = arith.subf %261, %268 : vector<32x128xf32>
    %270 = arith.mulf %269, %269 : vector<32x128xf32>
    %cst_137 = arith.constant dense<0.000000e+00> : vector<32xf32>
    %271 = vector.multi_reduction <add>, %270, %cst_137 [1] : vector<32x128xf32> to vector<32xf32>
    %272 = vector.shape_cast %271 : vector<32xf32> to vector<32x1xf32>
    %cst_138 = arith.constant 1.280000e+02 : f32
    %273 = vector.broadcast %cst_138 : f32 to vector<32x1xf32>
    %274 = arith.divf %272, %273 : vector<32x1xf32>
    %275 = vector.broadcast %267 : vector<32x1xf32> to vector<32x128xf32>
    %276 = arith.subf %261, %275 : vector<32x128xf32>
    %cst_139 = arith.constant 9.99999974E-6 : f32
    %277 = vector.broadcast %cst_139 : f32 to vector<32x1xf32>
    %278 = arith.addf %274, %277 : vector<32x1xf32>
    %279 = math.rsqrt %278 : vector<32x1xf32>
    %280 = vector.broadcast %279 : vector<32x1xf32> to vector<32x128xf32>
    %281 = arith.mulf %276, %280 : vector<32x128xf32>
    %282 = vector.broadcast %262 : vector<1x128xf32> to vector<32x128xf32>
    %283 = arith.mulf %281, %282 : vector<32x128xf32>
    %284 = vector.broadcast %263 : vector<1x128xf32> to vector<32x128xf32>
    %285 = arith.addf %283, %284 : vector<32x128xf32>
    %286 = arith.truncf %285 : vector<32x128xf32> to vector<32x128xbf16>
    %c0_140 = arith.constant 0 : index
    %c0_141 = arith.constant 0 : index
    %287 = vector.load %arg12[%c0_140, %c0_141] : memref<128x512xbf16, #tpu.memory_space<vmem>>, vector<128x512xbf16>
    %cst_142 = arith.constant dense<0.000000e+00> : vector<32x512xf32>
    %288 = tpu.matmul %286, %287, %cst_142 {dimension_numbers = #tpu.dot_dimension_numbers<[1], [0], [0], [1], [0, 0, 1, 1], [], []>} : vector<32x128xbf16>, vector<128x512xbf16>, vector<32x512xf32> -> vector<32x512xf32>
    %c0_143 = arith.constant 0 : index
    %c0_144 = arith.constant 0 : index
    %289 = vector.load %arg13[%c0_143, %c0_144] : memref<1x512xf32, #tpu.memory_space<vmem>>, vector<1x512xf32>
    %290 = vector.broadcast %289 : vector<1x512xf32> to vector<32x512xf32>
    %291 = arith.addf %288, %290 : vector<32x512xf32>
    %cst_145 = arith.constant 5.000000e-01 : f32
    %292 = vector.broadcast %cst_145 : f32 to vector<32x512xf32>
    %293 = arith.mulf %292, %291 : vector<32x512xf32>
    %cst_146 = arith.constant 4.471500e-02 : f32
    %294 = vector.broadcast %cst_146 : f32 to vector<32x512xf32>
    %295 = arith.mulf %294, %291 : vector<32x512xf32>
    %296 = arith.mulf %295, %291 : vector<32x512xf32>
    %297 = arith.mulf %296, %291 : vector<32x512xf32>
    %298 = arith.addf %291, %297 : vector<32x512xf32>
    %cst_147 = arith.constant 0.797884583 : f32
    %299 = vector.broadcast %cst_147 : f32 to vector<32x512xf32>
    %300 = arith.mulf %299, %298 : vector<32x512xf32>
    %301 = math.tanh %300 : vector<32x512xf32>
    %cst_148 = arith.constant 1.000000e+00 : f32
    %302 = vector.broadcast %cst_148 : f32 to vector<32x512xf32>
    %303 = arith.addf %302, %301 : vector<32x512xf32>
    %304 = arith.mulf %293, %303 : vector<32x512xf32>
    %305 = arith.truncf %304 : vector<32x512xf32> to vector<32x512xbf16>
    %c0_149 = arith.constant 0 : index
    %c0_150 = arith.constant 0 : index
    %306 = vector.load %arg14[%c0_149, %c0_150] : memref<512x128xbf16, #tpu.memory_space<vmem>>, vector<512x128xbf16>
    %cst_151 = arith.constant dense<0.000000e+00> : vector<32x128xf32>
    %307 = tpu.matmul %305, %306, %cst_151 {dimension_numbers = #tpu.dot_dimension_numbers<[1], [0], [0], [1], [0, 0, 1, 1], [], []>} : vector<32x512xbf16>, vector<512x128xbf16>, vector<32x128xf32> -> vector<32x128xf32>
    %c0_152 = arith.constant 0 : index
    %c0_153 = arith.constant 0 : index
    %308 = vector.load %arg15[%c0_152, %c0_153] : memref<1x128xf32, #tpu.memory_space<vmem>>, vector<1x128xf32>
    %309 = vector.broadcast %308 : vector<1x128xf32> to vector<32x128xf32>
    %310 = arith.addf %307, %309 : vector<32x128xf32>
    %311 = arith.addf %261, %310 : vector<32x128xf32>
    %c0_154 = arith.constant 0 : index
    %c0_155 = arith.constant 0 : index
    %c0_156 = arith.constant 0 : index
    %312 = vector.load %arg16[%c0_154, %c0_155, %c0_156] : memref<1x32x128xf32, #tpu.memory_space<vmem>>, vector<1x32x128xf32>
    %313 = vector.shape_cast %312 : vector<1x32x128xf32> to vector<32x128xf32>
    %314 = vector.shape_cast %311 : vector<32x128xf32> to vector<1x32x128xf32>
    tpu.vector_store %arg16[%c0_154, %c0_155, %c0_156], %314 {strides = array<i32>} : memref<1x32x128xf32, #tpu.memory_space<vmem>>, vector<1x32x128xf32>,
    return
  }
  func.func @transform_0(%arg0: i32) -> (i32, i32, i32) {
    %c0_i32 = arith.constant 0 : i32
    %c0_i32_0 = arith.constant 0 : i32
    %c0_i32_1 = arith.constant 0 : i32
    return %arg0, %c0_i32, %c0_i32_0 : i32, i32, i32
  }
  func.func @transform_1(%arg0: i32) -> (i32, i32) {
    %c0_i32 = arith.constant 0 : i32
    %c0_i32_0 = arith.constant 0 : i32
    %c0_i32_1 = arith.constant 0 : i32
    return %c0_i32, %c0_i32_0 : i32, i32
  }
  func.func @transform_2(%arg0: i32) -> (i32, i32) {
    %c0_i32 = arith.constant 0 : i32
    %c0_i32_0 = arith.constant 0 : i32
    %c0_i32_1 = arith.constant 0 : i32
    return %c0_i32, %c0_i32_0 : i32, i32
  }
  func.func @transform_3(%arg0: i32) -> (i32, i32, i32) {
    %c0_i32 = arith.constant 0 : i32
    %c0_i32_0 = arith.constant 0 : i32
    %c0_i32_1 = arith.constant 0 : i32
    %c0_i32_2 = arith.constant 0 : i32
    return %c0_i32, %c0_i32_0, %c0_i32_1 : i32, i32, i32
  }
  func.func @transform_4(%arg0: i32) -> (i32, i32, i32) {
    %c0_i32 = arith.constant 0 : i32
    %c0_i32_0 = arith.constant 0 : i32
    %c0_i32_1 = arith.constant 0 : i32
    %c0_i32_2 = arith.constant 0 : i32
    return %c0_i32, %c0_i32_0, %c0_i32_1 : i32, i32, i32
  }
  func.func @transform_5(%arg0: i32) -> (i32, i32) {
    %c0_i32 = arith.constant 0 : i32
    %c0_i32_0 = arith.constant 0 : i32
    %c0_i32_1 = arith.constant 0 : i32
    return %c0_i32, %c0_i32_0 : i32, i32
  }
  func.func @transform_6(%arg0: i32) -> (i32, i32) {
    %c0_i32 = arith.constant 0 : i32
    %c0_i32_0 = arith.constant 0 : i32
    %c0_i32_1 = arith.constant 0 : i32
    return %c0_i32, %c0_i32_0 : i32, i32
  }
  func.func @transform_7(%arg0: i32) -> (i32, i32, i32) {
    %c0_i32 = arith.constant 0 : i32
    %c0_i32_0 = arith.constant 0 : i32
    %c0_i32_1 = arith.constant 0 : i32
    %c0_i32_2 = arith.constant 0 : i32
    return %c0_i32, %c0_i32_0, %c0_i32_1 : i32, i32, i32
  }
  func.func @transform_8(%arg0: i32) -> (i32, i32) {
    %c0_i32 = arith.constant 0 : i32
    %c0_i32_0 = arith.constant 0 : i32
    %c0_i32_1 = arith.constant 0 : i32
    return %c0_i32, %c0_i32_0 : i32, i32
  }
  func.func @transform_9(%arg0: i32) -> (i32, i32) {
    %c0_i32 = arith.constant 0 : i32
    %c0_i32_0 = arith.constant 0 : i32
    %c0_i32_1 = arith.constant 0 : i32
    return %c0_i32, %c0_i32_0 : i32, i32
  }
  func.func @transform_10(%arg0: i32) -> (i32, i32) {
    %c0_i32 = arith.constant 0 : i32
    %c0_i32_0 = arith.constant 0 : i32
    %c0_i32_1 = arith.constant 0 : i32
    return %c0_i32, %c0_i32_0 : i32, i32
  }
  func.func @transform_11(%arg0: i32) -> (i32, i32) {
    %c0_i32 = arith.constant 0 : i32
    %c0_i32_0 = arith.constant 0 : i32
    %c0_i32_1 = arith.constant 0 : i32
    return %c0_i32, %c0_i32_0 : i32, i32
  }
  func.func @transform_12(%arg0: i32) -> (i32, i32) {
    %c0_i32 = arith.constant 0 : i32
    %c0_i32_0 = arith.constant 0 : i32
    %c0_i32_1 = arith.constant 0 : i32
    return %c0_i32, %c0_i32_0 : i32, i32
  }
  func.func @transform_13(%arg0: i32) -> (i32, i32) {
    %c0_i32 = arith.constant 0 : i32
    %c0_i32_0 = arith.constant 0 : i32
    %c0_i32_1 = arith.constant 0 : i32
    return %c0_i32, %c0_i32_0 : i32, i32
  }
  func.func @transform_14(%arg0: i32) -> (i32, i32) {
    %c0_i32 = arith.constant 0 : i32
    %c0_i32_0 = arith.constant 0 : i32
    %c0_i32_1 = arith.constant 0 : i32
    return %c0_i32, %c0_i32_0 : i32, i32
  }
  func.func @transform_15(%arg0: i32) -> (i32, i32, i32) {
    %c0_i32 = arith.constant 0 : i32
    %c0_i32_0 = arith.constant 0 : i32
    %c0_i32_1 = arith.constant 0 : i32
    return %arg0, %c0_i32, %c0_i32_0 : i32, i32, i32
  }
}

</mosaic_0001>

<bundles_post_ra>
// kernel: block_forward.1
= control target key start
LH: loop header
LB: loop body
LE: loop exit
PB: predicated region body
PF: predicated region fallthrough
CT: control target
= control target key end

     0   :  { %s7912_s0 = inlined_call_operand.vmem [shape: f32[2,32,128], index: 0, kind: input, shape index: {}]   ;;  %s7913_s1 = inlined_call_operand.vmem [shape: f32[1,128], index: 1, kind: input, shape index: {}]   ;;  %s7914_s2 = inlined_call_operand.vmem [shape: f32[1,128], index: 2, kind: input, shape index: {}]   ;;  %s7915_s3 = inlined_call_operand.vmem [shape: bf16[8,128,16], index: 3, kind: input, shape index: {}]   ;;  %s7916_s4 = inlined_call_operand.vmem [shape: f32[8,1,16], index: 4, kind: input, shape index: {}]   ;;  %s7917_s5 = inlined_call_operand.vmem [shape: bf16[256,128], index: 5, kind: input, shape index: {}]   ;;  %s7918_s6 = inlined_call_operand.vmem [shape: f32[256,1], index: 6, kind: input, shape index: {}]   ;;  %s7919_s7 = inlined_call_operand.vmem [shape: bf16[8,16,128], index: 7, kind: input, shape index: {}]   ;;  %s7920_s8 = inlined_call_operand.vmem [shape: f32[1,128], index: 8, kind: input, shape index: {}]   ;;  %s7921_s9 = inlined_call_operand.hbm [shape: f32[1,128], index: 9, kind: input, shape index: {}]   ;;  %s7922_s10 = inlined_call_operand.hbm [shape: f32[1,128], index: 10, kind: input, shape index: {}]   ;;  %s7923_s11 = inlined_call_operand.vmem [shape: bf16[128,512], index: 11, kind: input, shape index: {}]   ;;  %s7924_s12 = inlined_call_operand.hbm [shape: f32[1,512], index: 12, kind: input, shape index: {}]   ;;  %s7925_s13 = inlined_call_operand.vmem [shape: bf16[512,128], index: 13, kind: input, shape index: {}]   ;;  %s7926_s14 = inlined_call_operand.hbm [shape: f32[1,128], index: 14, kind: input, shape index: {}]   ;;  %s7927_s15 = inlined_call_operand.hbm [shape: f32[2,32,128], index: 15, kind: output, shape index: {}]  }
   0x1   :  { %7935 = sst [smem:[#allocation20_spill]] %s7912_s0 }
   0x2   :  { %20 = vsyncpa [#allocation3], 0 }
   0x3   :  { %21 = vsyncpa [#allocation6], 0 }
   0x4   :  { %22 = vsyncpa [#allocation9], 0 }
   0x5   :  { %23 = vsyncpa [#allocation4], 0 }
   0x6   :  { %25 = vsyncpa [#allocation4 + $0x1], 0  ;;  %s6613_s18 = smov 0   ;;  %s6615_s19 = smov 0  }
   0x7   :  { %s6617_s20 = smov 0   ;;  %s6619_s21 = smov 0  }
   0x8 LB: > { %7936 = sst [smem:[#allocation15_spill]] %s6511_s18  ;;  %s6634_s22 = sadd.s32 4294967295, %s6523_s21   ;;  %s6523_s21 = sphi %s6619_s21, %s7956_s21   ;;  %s6519_s20 = sphi %s6617_s20, %s7958_s20   ;;  %s6515_s19 = sphi %s6615_s19, %s7960_s19   ;;  %s6511_s18 = sphi %s6613_s18, %s7959_s18  }
   0x9   : > { %7937 = sst [smem:[#allocation16_spill]] %s6519_s20  ;;  %s4971_s23 = sadd.s32 4294967294, %s6523_s21  }
   0xa   : > { %s6638_s24 = sadd.s32 1, %s6523_s21   ;;  %s358_s25 = sadd.s32 1, %s6519_s20 }
   0xb   : > { %7938 = sst [smem:[#allocation17_spill]] %s6638_s24  ;;  %s355_s26 = ssub.s32 %s6523_s21, %s6638_s24 }
   0xc   : > { %p368_p0 = scmp.ne.s32.totalorder %s6519_s20, %s6515_s19  ;;  %p356_p1 = scmp.eq.s32.totalorder %s355_s26, 0 }
   0xd   : > { %p369_p2 = scmp.eq.s32.totalorder %s6634_s22, 1  ;;  %p374_p3 = scmp.ne.s32.totalorder %s6515_s19, %s6511_s18 }
   0xe   : > { %p375_p4 = scmp.eq.s32.totalorder %s4971_s23, 1  ;;  %p4972_p7 = scmp.ge.s32.totalorder %s6523_s21, 1 }
   0xf   : > { %s6649_s27 = scalar_select %p356_p1, %s6519_s20, %s358_s25  }
  0x10   : > { %p6651_p5 = por %p369_p2, %p368_p0  ;;  %p6655_p6 = por %p375_p4, %p374_p3 }
  0x11   : > { %7939 = sst [smem:[#allocation18_spill]] %s6649_s27  ;;  %p382_p8 = scmp.lt.s32.totalorder %s6523_s21, 3 }
  0x12   : > { %s7940_s28 = scalar_select %p6651_p5, 1, 0 }
  0x13   : > { %s7941_s29 = scalar_select %p6655_p6, 1, 0 }
  0x14   : > { %p7932_p9 = scmp.eq.s32.totalorder %s6634_s22, 0  ;;  %p6662_p10 = pnand %p4972_p7, %p382_p8 }
  0x15   : > { %7942 = sst [smem:[#allocation19_spill]] %s7941_s29  ;;  %s6525_s16 = smov [#allocation5]  }
  0x16   : > { %s430_s17 = sshll.u32 %s6525_s16, 4  ;;  %p5932_p11 = pneg %p6662_p10  ;;  %s431_s17 = int_to_ptr.vmem [resolvable:$true] %s430_s17 }
  0x17   : > { %s6526_s23 = smov [#allocation2]   ;;  %s6527_s27 = smov [#allocation7]  }
  0x18   : > { %s419_s25 = sshll.u32 %s6526_s23, 4  ;;  %p6670_p12 = pnand %p7932_p9, %p5932_p11  ;;  %s420_s25 = int_to_ptr.vmem [resolvable:$true] %s419_s25 }
  0x19   : > { %s444_s20 = sshll.u32 %s6527_s27, 4  ;;  %s6358_s16 = scalar_lea.vmem %s431_s17, 16  ;;  %s6674_s20 = int_to_ptr.vmem [resolvable:$true] %s444_s20 }
  0x1a   : > { %p6349_p13 = pneg %p6670_p12  ;;  %p6359_p0 = scmp.ne.s32.totalorder %s431_s17, %s6358_s16 }
  0x1b   : > { %s6365_s23 = scalar_lea.vmem %s431_s17, 32  ;;  %p6366_p3 = scmp.lt.s32.totalorder %s431_s17, %s431_s17 }
  0x1c   : > { %p6361_p1 = pnand %p6359_p0, %p6349_p13  ;;  %p6367_p4 = scmp.lt.s32.totalorder %s6365_s23, %s6358_s16 }
  0x1e   : > { %p6362_p2 = pneg %p6361_p1  ;;  %p6368_p7 = por %p6367_p4, %p6366_p3 }
  0x20   : > { %p6369_p8 = pnand %p6368_p7, %p6362_p2 }
  0x22   : > { %6372 = shalt.err (!%p6369_p8)
}
  0x23   : > { %5938 = dma.hbm_to_vmem [thread:$0]  (!%p6670_p12), %s7922_s10, 16, %s431_s17, [#allocation6]  }
  0x24   : > { %s6384_s29 = scalar_lea.vmem %s420_s25, 16  ;;  %s6391_s18 = scalar_lea.vmem %s420_s25, 32 }
  0x25   : > { %p6385_p11 = scmp.ne.s32.totalorder %s420_s25, %s6384_s29  ;;  %p6392_p1 = scmp.lt.s32.totalorder %s420_s25, %s420_s25 }
  0x26   : > { %p6393_p6 = scmp.lt.s32.totalorder %s6391_s18, %s6384_s29 }
  0x27   : > { %p6387_p9 = pnand %p6385_p11, %p6349_p13 }
  0x28   : > { %p6394_p5 = por %p6393_p6, %p6392_p1 }
  0x29   : > { %p6388_p0 = pneg %p6387_p9 }
  0x2b   : > { %p6395_p3 = pnand %p6394_p5, %p6388_p0 }
  0x2d   : > { %6398 = shalt.err (!%p6395_p3)
}
  0x2e   : > { %5935 = dma.hbm_to_vmem [thread:$0]  (!%p6670_p12), %s7921_s9, 16, %s420_s25, [#allocation3]  }
  0x2f   : > { %s6410_s24 = scalar_lea.vmem %s6674_s20, 64  ;;  %p6418_p6 = scmp.lt.s32.totalorder %s6674_s20, %s6674_s20 }
  0x30   : > { %p6411_p2 = scmp.ne.s32.totalorder %s6674_s20, %s6410_s24  ;;  %p6419_p5 = scmp.lt.s32.totalorder %s6410_s24, %s6410_s24 }
  0x32   : > { %p6413_p9 = pnand %p6411_p2, %p6349_p13  ;;  %p6420_p7 = por %p6419_p5, %p6418_p6 }
  0x34   : > { %p6414_p4 = pneg %p6413_p9 }
  0x36   : > { %p6421_p8 = pnand %p6420_p7, %p6414_p4 }
  0x38   : > { %6424 = shalt.err (!%p6421_p8)
}
  0x39   : > { %5941 = dma.hbm_to_vmem [thread:$0]  (!%p6670_p12), %s7924_s12, 64, %s6674_s20, [#allocation6]  }
  0x3a   : > { %s6528_s17 = smov [#allocation8]  }
  0x3b   : > { %s458_s25 = sshll.u32 %s6528_s17, 4  ;;  %s459_s25 = int_to_ptr.vmem [resolvable:$true] %s458_s25 }
  0x3c   : > { %s6436_s27 = scalar_lea.vmem %s459_s25, 16  ;;  %s6443_s16 = scalar_lea.vmem %s459_s25, 32 }
  0x3d   : > { %p6437_p11 = scmp.ne.s32.totalorder %s459_s25, %s6436_s27  ;;  %p6444_p3 = scmp.lt.s32.totalorder %s459_s25, %s459_s25 }
  0x3e   : > { %p6445_p2 = scmp.lt.s32.totalorder %s6443_s16, %s6436_s27 }
  0x3f   : > { %p6439_p0 = pnand %p6437_p11, %p6349_p13 }
  0x40   : > { %p6446_p9 = por %p6445_p2, %p6444_p3 }
  0x41   : > { %p6440_p1 = pneg %p6439_p0 }
  0x43   : > { %p6447_p4 = pnand %p6446_p9, %p6440_p1 }
  0x45   : > { %6450 = shalt.err (!%p6447_p4)
}
  0x46   : > { %5944 = dma.hbm_to_vmem [thread:$0]  (!%p6670_p12), %s7926_s14, 16, %s459_s25, [#allocation9]  }
  0x47   : > { %479 = sbr.rel (%p6662_p10) target bundleno = 7118 (0x1bce), region = 80  ;;  %p7945_p6 = scmp.eq.s32.totalorder (!%p6662_p10), %s6634_s22, 0 }
  0x4c   : > { %6494 = dma.done.wait (%p7945_p6), [#allocation3], 16   ;;  %p7946_p13 = pmov %p7945_p6 }
  0x4d   : > { %p7947_p5 = pmov %p7945_p6 }
  0x4e   : > { %6496 = vsyncadd (%p7946_p13), [#allocation3], 4294967280 }
  0x4f   : > { %6498 = dma.done.wait (%p7947_p5), [#allocation6], 80   ;;  %p7948_p7 = pmov %p7947_p5 }
  0x50   : > { %p7949_p8 = pmov %p7947_p5 }
  0x51   : > { %6500 = vsyncadd (%p7948_p7), [#allocation6], 4294967216 }
  0x52   : > { %6502 = dma.done.wait (%p7949_p8), [#allocation9], 16   ;;  %p7950_p12 = pmov %p7947_p5 }
  0x53   : > { %p539_p10 = scmp.lt.s32.totalorder %s6634_s22, 1  ;;  %s7951_s0 = sld [smem:[#allocation20_spill]]  ;;  %v5999_v20 = vld [vmem:[%s7915_s3 + $0x38] sm:$0xff]   ;;  %v6000_v21 = vld [vmem:[%s7915_s3 + $0x30] sm:$0xff]   ;;  %v6001_v22 = vld [vmem:[%s7915_s3 + $0x28] sm:$0xff]   ;;  %v6529_v31 = vmov 0  }
  0x54   : > { %6504 = vsyncadd (%p7950_p12), [#allocation9], 4294967280  ;;  %5602 = vmatprep.subr.bf16.mxu1 %v5999_v20  ;;  %v6002_v23 = vld [vmem:[%s7915_s3 + $0x20] sm:$0xff]   ;;  %v6003_v24 = vld [vmem:[%s7915_s3 + $0x18] sm:$0xff]   ;;  %5998 = vset.pattern.permute.xlu1 %v6529_v31  ;;  %vm1237_vm0 = vcmask 130048   ;;  %vm1293_vm1 = vcmask 261120  }
  0x55   : > { %s540_s20 = scalar_select %p539_p10, %s6634_s22, 1  ;;  %5603 = vmatpush3.bf16.msra.mxu1 %v5999_v20  ;;  %v6004_v25 = vld [vmem:[%s7915_s3 + $0x10] sm:$0xff]   ;;  %v6005_v26 = vld [vmem:[%s7915_s3 + $0x8] sm:$0xff]   ;;  %v6006_v27 = vld [vmem:[%s7915_s3] sm:$0xff]   ;;  %5997 = vset.pattern.permute.xlu0 %v6529_v31 }
  0x56   : > { %5604 = vmatprep.subr.bf16.mxu1 %v6000_v21  ;;  %v6007_v28 = vld [vmem:[%s7917_s5] sm:$0xff]   ;;  %v651_v30 = vld [vmem:[%s7918_s6 + $0x8] sm:$0xff]  ;;  %v6021_v20 = vld [vmem:[%s7917_s5 + $0x58] sm:$0xff]   ;;  %s5339_s18 = sshll.u32 %s6634_s22, 9  ;;  %p7952_p0 = scmp.ne.s32.totalorder %s7940_s28, 0 }
  0x57   : > { %s5338_s30 = sshll.u32 %s540_s20, 5  ;;  %5570 = vmatprep.mubr.bf16.mxu0 %v6007_v28  ;;  %v650_v29 = vld [vmem:[%s7918_s6] sm:$0xff]  ;;  %v6035_v28 = vld [vmem:[%s7915_s3 + $0x98] sm:$0xff]   ;;  %s7868_s27 = scalar_lea.hbm %s7927_s15, %s5339_s18 }
  0x58   : > { %v666_v32 = vld [vmem:[%s7918_s6 + $0x80] sm:$0xff]  ;;  %s6530_s22 = smov [#allocation10]  }
  0x59   : > { %s6734_s29 = scalar_lea.vmem %s7951_s0, %s5338_s30  ;;  %5605 = vmatpush3.bf16.msra.mxu1 %v6000_v21  ;;  %v4986_v47 = vld [vmem:[%s7913_s1] ss:$0 sm:$0xff]  ;;  %s6455_s0 = sshll.u32 %s6530_s22, 4  ;;  %s6456_s0 = int_to_ptr.vmem [resolvable:$false] %s6455_s0 }
  0x5a   : > { %v547_v0 = vld [vmem:[%s6734_s29 + $0x10] sm:$0xff]  ;;  %v548_v1 = vld [vmem:[%s6734_s29 + $0x18] sm:$0xff]  ;;  %v545_v2 = vld [vmem:[%s6734_s29] sm:$0xff]  ;;  %5606 = vmatprep.subr.bf16.mxu1 %v6001_v22  ;;  %s6457_s24 = scalar_lea.vmem %s6456_s0, 1024 }
  0x5b   : > { %555 = vadd.xlane.f32.xlu0 %v547_v0  ;;  %551 = vadd.xlane.f32.xlu1 %v545_v2  ;;  %v546_v3 = vld [vmem:[%s6734_s29 + $0x8] sm:$0xff]  ;;  %v4987_v53 = vld [vmem:[%s7914_s2] ss:$0 sm:$0xff] }
  0x5c   : > { %v6023_v21 = vld [vmem:[%s7917_s5 + $0x60] sm:$0xff]  }
  0x5d   : > { %5607 = vmatpush3.bf16.msra.mxu1 %v6001_v22  ;;  %v6025_v22 = vld [vmem:[%s7917_s5 + $0x68] sm:$0xff]  }
  0x5e   : > { %5608 = vmatprep.subr.bf16.mxu1 %v6002_v23 }
  0x5f   : > { %557 = vadd.xlane.f32.xlu0 %v548_v1  ;;  %553 = vadd.xlane.f32.xlu1 %v546_v3 }
  0x61   : > { %5609 = vmatpush3.bf16.msra.mxu1 %v6002_v23  ;;  %v6027_v23 = vld [vmem:[%s7917_s5 + $0x70] sm:$0xff]  }
  0x62   : > { %5610 = vmatprep.subr.bf16.mxu1 %v6003_v24 }
  0x65   : > { %5611 = vmatpush3.bf16.msra.mxu1 %v6003_v24  ;;  %v6029_v24 = vld [vmem:[%s7917_s5 + $0x78] sm:$0xff]  }
  0x66   : > { %5612 = vmatprep.subr.bf16.mxu1 %v6004_v25 }
  0x69   : > { %5613 = vmatpush3.bf16.msra.mxu1 %v6004_v25  ;;  %v6032_v25 = vld [vmem:[%s7915_s3 + $0xb0] sm:$0xff]  }
  0x6a   : > { %5614 = vmatprep.subr.bf16.mxu1 %v6005_v26 }
  0x6d   : > { %5615 = vmatpush3.bf16.msra.mxu1 %v6005_v26  ;;  %v6033_v26 = vld [vmem:[%s7915_s3 + $0xa8] sm:$0xff]  }
  0x6e   : > { %5616 = vmatprep.subr.bf16.mxu1 %v6006_v27 }
  0x71   : > { %5617 = vmatpush3.bf16.msra.mxu1 %v6006_v27  ;;  %v6034_v27 = vld [vmem:[%s7915_s3 + $0xa0] sm:$0xff]  }
  0xe4   : > { %v556_v4 = vpop.xlane.xlu0 %555  ;;  %v552_v5 = vpop.xlane.xlu1 %551 }
  0xe5   : > { %v562_v6 = vmul.f32 0.0078125, %v556_v4  ;;  %v560_v7 = vmul.f32 0.0078125, %v552_v5  ;;  %v6018_v4 = vld [vmem:[%s7915_s3 + $0x70] sm:$0xff]   ;;  %v6020_v5 = vld [vmem:[%s7915_s3 + $0x68] sm:$0xff]  }
  0xe7   : > { %v6740_v8 = vsub.f32 %v547_v0, %v562_v6  ;;  %v6742_v9 = vsub.f32 %v545_v2, %v560_v7  ;;  %v6008_v2 = vld [vmem:[%s7917_s5 + $0x8] sm:$0xff]   ;;  %v6010_v6 = vld [vmem:[%s7917_s5 + $0x18] sm:$0xff]   ;;  %v6011_v7 = vld [vmem:[%s7917_s5 + $0x20] sm:$0xff]  }
  0xe8   : > { %v558_v10 = vpop.xlane.xlu0 %557  ;;  %v554_v11 = vpop.xlane.xlu1 %553 }
  0xe9   : > { %v563_v12 = vmul.f32 0.0078125, %v558_v10  ;;  %v570_v13 = vmul.f32 %v6740_v8, %v6740_v8  ;;  %v561_v14 = vmul.f32 0.0078125, %v554_v11  ;;  %v568_v16 = vmul.f32 %v6742_v9, %v6742_v9  ;;  %v6012_v10 = vld [vmem:[%s7917_s5 + $0x28] sm:$0xff]   ;;  %v6013_v11 = vld [vmem:[%s7917_s5 + $0x30] sm:$0xff]  }
  0xeb   : > { %576 = vadd.xlane.f32.xlu0 %v570_v13  ;;  %v6746_v15 = vsub.f32 %v548_v1, %v563_v12  ;;  %v6750_v17 = vsub.f32 %v546_v3, %v561_v14  ;;  %v6016_v1 = vld [vmem:[%s7915_s3 + $0x78] sm:$0xff]   ;;  %v6009_v3 = vld [vmem:[%s7917_s5 + $0x10] sm:$0xff]   ;;  %v6028_v13 = vld [vmem:[%s7915_s3 + $0x48] sm:$0xff]  }
  0xec   : > { %v6026_v12 = vld [vmem:[%s7915_s3 + $0x50] sm:$0xff]   ;;  %v6014_v14 = vld [vmem:[%s7917_s5 + $0x38] sm:$0xff]  }
  0xed   : > { %v571_v18 = vmul.f32 %v6746_v15, %v6746_v15  ;;  %v569_v19 = vmul.f32 %v6750_v17, %v6750_v17 }
  0xef   : > { %578 = vadd.xlane.f32.xlu1 %v571_v18  ;;  %572 = vadd.xlane.f32.xlu0 %v568_v16  ;;  %v6030_v16 = vld [vmem:[%s7915_s3 + $0x40] sm:$0xff]   ;;  %v6017_v18 = vld [vmem:[%s7917_s5 + $0x48] sm:$0xff]  }
  0xf3   : > { %574 = vadd.xlane.f32.xlu1 %v569_v19  ;;  %v6019_v19 = vld [vmem:[%s7917_s5 + $0x50] sm:$0xff]  }
 0x104   : > { %689 = vperm.xlu1 %5998, %v651_v30   ;;  %v6037_v30 = vld [vmem:[%s7915_s3 + $0x88] sm:$0xff]  }
 0x105   : > { %684 = vperm.xlu0 %5997, %v650_v29   ;;  %v6036_v29 = vld [vmem:[%s7915_s3 + $0x90] sm:$0xff]  }
 0x108   : > { %764 = vperm.xlu1 %5998, %v666_v32   ;;  %v6038_v32 = vld [vmem:[%s7915_s3 + $0x80] sm:$0xff]  }
 0x174   : > { %v577_v33 = vpop.xlane.xlu0 %576 }
 0x175   : > { %v582_v34 = vmul.f32 0.0078125, %v577_v33 }
 0x177   : > { %v586_v35 = vadd.f32 1e-05, %v582_v34 }
 0x178   : > { %v573_v36 = vpop.xlane.xlu0 %572  ;;  %v579_v37 = vpop.xlane.xlu1 %578 }
 0x179   : > { %6167 = vrsqrt.f32 %v586_v35  ;;  %v580_v38 = vmul.f32 0.0078125, %v573_v36  ;;  %v583_v39 = vmul.f32 0.0078125, %v579_v37  ;;  %v5004_v36 = vld [vmem:[%s7916_s4] ss:$0 sm:$0xff] }
 0x17b   : > { %v584_v40 = vadd.f32 1e-05, %v580_v38  ;;  %v587_v41 = vadd.f32 1e-05, %v583_v39 }
 0x17c   : > { %v575_v42 = vpop.xlane.xlu1 %574 }
 0x17d   : > { %6169 = vrsqrt.f32 %v584_v40  ;;  %v581_v43 = vmul.f32 0.0078125, %v575_v42 }
 0x17e   : > { %6171 = vrsqrt.f32 %v587_v41 }
 0x17f   : > { %v585_v44 = vadd.f32 1e-05, %v581_v43 }
 0x180   : > { %v685_v43 = vpop.permute.xlu0 %684 }
 0x181   : > { %6173 = vrsqrt.f32 %v585_v44 }
 0x186   : > { %v6168_v45 = vpop.eup %6167 }
 0x187   : > { %v594_v46 = vmul.f32 %v6168_v45, %v6740_v8  ;;  %v6022_v8 = vld [vmem:[%s7915_s3 + $0x60] sm:$0xff]   ;;  %v690_v45 = vpop.permute.xlu1 %689 }
 0x189   : > { %v604_v51 = vmul.f32 %v4986_v47, %v594_v46 }
 0x18a   : > { %v6170_v48 = vpop.eup %6169 }
 0x18b   : > { %v6172_v49 = vpop.eup %6171  ;;  %v592_v50 = vmul.f32 %v6170_v48, %v6742_v9  ;;  %v614_v58 = vadd.f32 %v4987_v53, %v604_v51  ;;  %v6024_v9 = vld [vmem:[%s7915_s3 + $0x58] sm:$0xff]  }
 0x18c   : > { %v595_v52 = vmul.f32 %v6172_v49, %v6746_v15  ;;  %v6015_v15 = vld [vmem:[%s7917_s5 + $0x40] sm:$0xff]  }
 0x18d   : > { %v602_v56 = vmul.f32 %v4986_v47, %v592_v50 }
 0x18e   : > { %v6174_v54 = vpop.eup %6173  ;;  %v605_v55 = vmul.f32 %v4986_v47, %v595_v52 }
 0x18f   : > { %v593_v57 = vmul.f32 %v6174_v54, %v6750_v17  ;;  %v612_v62 = vadd.f32 %v4987_v53, %v602_v56  ;;  %v6031_v17 = vld [vmem:[%s7915_s3 + $0xb8] sm:$0xff]  }
 0x190   : > { %v615_v59 = vadd.f32 %v4987_v53, %v605_v55 }
 0x191   : > { %v603_v60 = vmul.f32 %v4986_v47, %v593_v57 }
 0x192   : > { %v6804_v61 = vpack.c.bf16 %v615_v59, %v614_v58 }
 0x193   : > { %v613_v63 = vadd.f32 %v4987_v53, %v603_v60 }
 0x194   : > { %5566 = vmatprep.subr.bf16.mxu0 %v6804_v61 }
 0x195   : > { %v6807_v0 = vpack.c.bf16 %v613_v63, %v612_v62  ;;  %5567 = vmatpush3.bf16.xpose.msra.mxu0 %v6804_v61  ;;  %v652_v62 = vld [vmem:[%s7918_s6 + $0x10] sm:$0xff]  ;;  %v667_v63 = vld [vmem:[%s7918_s6 + $0x88] sm:$0xff] }
 0x197   : > { %5568 = vmatprep.subr.bf16.mxu0 %v6807_v0  ;;  %5618 = vmatprep.mubr.bf16.mxu1 %v6807_v0 }
 0x198   : > { %5619 = vmatmul.mubr.bf16.vlgmr.msra.gmra.mxu1 %v6804_v61 }
 0x19d   : > { %5569 = vmatpush3.bf16.xpose.msra.mxu0 %v6807_v0 }
 0x19e   : > { %5634 = vmatprep.subr.bf16.mxu0 %v6016_v1 }
 0x1a4   : > { %5571 = vmatmul.mubr.bf16.vlgmr.msra.gmra.mxu0 %v6008_v2 }
 0x1a5   : > { %5574 = vmatprep.mubr.bf16.mxu0 %v6009_v3  ;;  %5635 = vmatpush3.bf16.msra.mxu0 %v6016_v1  ;;  %v653_v1 = vld [vmem:[%s7918_s6 + $0x18] sm:$0xff] }
 0x1a6   : > { %5636 = vmatprep.subr.bf16.mxu0 %v6018_v4 }
 0x1a9   : > { %5637 = vmatpush3.bf16.msra.mxu0 %v6018_v4 }
 0x1aa   : > { %5638 = vmatprep.subr.bf16.mxu0 %v6020_v5 }
 0x1ac   : > { %5575 = vmatmul.mubr.bf16.gmra.mxu0 %v6010_v6 }
 0x1ad   : > { %5578 = vmatprep.mubr.bf16.mxu0 %v6011_v7  ;;  %5639 = vmatpush3.bf16.msra.mxu0 %v6020_v5 }
 0x1ae   : > { %5640 = vmatprep.subr.bf16.mxu0 %v6022_v8 }
 0x1b1   : > { %5641 = vmatpush3.bf16.msra.mxu0 %v6022_v8 }
 0x1b2   : > { %5642 = vmatprep.subr.bf16.mxu0 %v6024_v9 }
 0x1b4   : > { %5579 = vmatmul.mubr.bf16.gmra.mxu0 %v6012_v10 }
 0x1b5   : > { %5582 = vmatprep.mubr.bf16.mxu0 %v6013_v11  ;;  %5643 = vmatpush3.bf16.msra.mxu0 %v6024_v9 }
 0x1b6   : > { %5644 = vmatprep.subr.bf16.mxu0 %v6026_v12 }
 0x1b9   : > { %5645 = vmatpush3.bf16.msra.mxu0 %v6026_v12 }
 0x1ba   : > { %5646 = vmatprep.subr.bf16.mxu0 %v6028_v13 }
 0x1bc   : > { %5583 = vmatmul.mubr.bf16.gmra.mxu0 %v6014_v14 }
 0x1bd   : > { %5586 = vmatprep.mubr.bf16.mxu0 %v6015_v15  ;;  %5647 = vmatpush3.bf16.msra.mxu0 %v6028_v13 }
 0x1be   : > { %5648 = vmatprep.subr.bf16.mxu0 %v6030_v16 }
 0x1c1   : > { %5649 = vmatpush3.bf16.msra.mxu0 %v6030_v16 }
 0x1c2   : > { %5678 = vmatprep.subr.bf16.mxu0 %v6031_v17 }
 0x1c4   : > { %5587 = vmatmul.mubr.bf16.gmra.mxu0 %v6017_v18 }
 0x1c5   : > { %5590 = vmatprep.mubr.bf16.mxu0 %v6019_v19 }
 0x1cc   : > { %5591 = vmatmul.mubr.bf16.gmra.mxu0 %v6021_v20 }
 0x1cd   : > { %5594 = vmatprep.mubr.bf16.mxu0 %v6023_v21 }
 0x1d4   : > { %5595 = vmatmul.mubr.bf16.gmra.mxu0 %v6025_v22 }
 0x1d5   : > { %5598 = vmatprep.mubr.bf16.mxu0 %v6027_v23 }
 0x1dc   : > { %5599 = vmatmul.mubr.bf16.gmra.mxu0 %v6029_v24 }
 0x1dd   : > { %5650 = vmatprep.mubr.bf16.mxu0 %v6807_v0 }
 0x1e4   : > { %5651 = vmatmul.mubr.bf16.vlgmr.msra.gmra.mxu0 %v6804_v61 }
 0x1e5   : > { %5679 = vmatpush3.bf16.msra.mxu0 %v6031_v17  ;;  %5694 = vmatprep.mubr.bf16.mxu0 %v6807_v0 }
 0x1e6   : > { %5680 = vmatprep.subr.bf16.mxu0 %v6032_v25 }
 0x1e9   : > { %5681 = vmatpush3.bf16.msra.mxu0 %v6032_v25 }
 0x1ea   : > { %5682 = vmatprep.subr.bf16.mxu0 %v6033_v26 }
 0x1ed   : > { %5683 = vmatpush3.bf16.msra.mxu0 %v6033_v26 }
 0x1ee   : > { %5684 = vmatprep.subr.bf16.mxu0 %v6034_v27 }
 0x1f1   : > { %5685 = vmatpush3.bf16.msra.mxu0 %v6034_v27  ;;  %v765_v27 = vpop.permute.xlu1 %764 }
 0x1f2   : > { %5686 = vmatprep.subr.bf16.mxu0 %v6035_v28 }
 0x1f5   : > { %5687 = vmatpush3.bf16.msra.mxu0 %v6035_v28 }
 0x1f6   : > { %5688 = vmatprep.subr.bf16.mxu0 %v6036_v29 }
 0x1f9   : > { %5689 = vmatpush3.bf16.msra.mxu0 %v6036_v29 }
 0x1fa   : > { %5690 = vmatprep.subr.bf16.mxu0 %v6037_v30 }
 0x1fd   : > { %5691 = vmatpush3.bf16.msra.mxu0 %v6037_v30 }
 0x1fe   : > { %5692 = vmatprep.subr.bf16.mxu0 %v6038_v32 }
 0x201   : > { %5693 = vmatpush3.bf16.msra.mxu0 %v6038_v32 }
 0x204   : > { %5695 = vmatmul.mubr.bf16.vlgmr.msra.gmra.mxu0 %v6804_v61 }
 0x258   : > { %v5620_v33 = vpop.f32.mrf.mxu1 }
 0x259   : > { %v1229_v51 = vadd.f32 %v5620_v33, %v5004_v36 }
 0x25a   : > { %v1220_v34 = vpop.f32.mrf.mxu1 }
 0x25b   : > { %v1221_v38 = vadd.f32 %v5004_v36, %v1220_v34 }
 0x25c   : > { %v5621_v35 = vpop.f32.mrf.mxu1 }
 0x25d   : > { %v1232_v49 = vadd.f32 %v5621_v35, %v5004_v36 }
 0x25e   : > { %v1223_v37 = vpop.f32.mrf.mxu1 }
 0x25f   : > { %v1224_v39 = vadd.f32 %v5004_v36, %v1223_v37  ;;  %v1236_v52 = vpack.c.bf16 %v1232_v49, %v1229_v51 }
 0x261   : > { %v1235_v40 = vpack.c.bf16 %v1224_v39, %v1221_v38 }
 0x263   : > { %5624 = vmatprep.mubr.msk.bf16.mxu1 %vm1237_vm0, %v1235_v40 }
 0x264   : > { %v6915_v41 = vpop.f32.mrf.mxu0 }
 0x266   : > { %v972_v42 = vpop.f32.mrf.mxu0 }
 0x267   : > { %v973_v47 = vadd.f32 %v972_v42, %v685_v43 }
 0x268   : > { %v6917_v44 = vpop.f32.mrf.mxu0 }
 0x26a   : > { %v975_v46 = vpop.f32.mrf.mxu0 }
 0x26b   : > { %v976_v48 = vadd.f32 %v975_v46, %v690_v45 }
 0x26c   : > { %v6933_v2 = vpop.f32.mrf.mxu0 }
 0x26d   : > { %v1099_v50 = vpack.c.bf16 %v976_v48, %v973_v47 }
 0x26e   : > { %v6935_v3 = vpop.f32.mrf.mxu0 }
 0x26f   : > { %5622 = vmatprep.subr.bf16.mxu1 %v1099_v50 }
 0x270   : > { %5623 = vmatpush3.bf16.msra.mxu1 %v1099_v50  ;;  %v6937_v4 = vpop.f32.mrf.mxu0 }
 0x272   : > { %v6939_v5 = vpop.f32.mrf.mxu0 }
 0x273   : > { %5625 = vmatmul.mubr.msk.bf16.vlgmr.msra.gmra.mxu1 %vm1237_vm0, %v1236_v52 }
 0x274   : > { %v6941_v6 = vpop.f32.mrf.mxu0 }
 0x276   : > { %v6943_v7 = vpop.f32.mrf.mxu0 }
 0x278   : > { %v6945_v8 = vpop.f32.mrf.mxu0 }
 0x27a   : > { %v6947_v9 = vpop.f32.mrf.mxu0 }
 0x27c   : > { %v6949_v10 = vpop.f32.mrf.mxu0 }
 0x27e   : > { %v6951_v11 = vpop.f32.mrf.mxu0 }
 0x280   : > { %v6953_v12 = vpop.f32.mrf.mxu0 }
 0x282   : > { %v6955_v13 = vpop.f32.mrf.mxu0 }
 0x284   : > { %v6957_v14 = vpop.f32.mrf.mxu0 }
 0x286   : > { %v1036_v15 = vpop.f32.mrf.mxu0 }
 0x287   : > { %v1037_v50 = vadd.f32 %v1036_v15, %v765_v27 }
 0x288   : > { %v6959_v16 = vpop.f32.mrf.mxu0 }
 0x28a   : > { %v1039_v17 = vpop.f32.mrf.mxu0 }
 0x28c   : > { %v6961_v18 = vpop.f32.mrf.mxu0 }
 0x28e   : > { %v6963_v19 = vpop.f32.mrf.mxu0 }
 0x290   : > { %v6965_v20 = vpop.f32.mrf.mxu0 }
 0x292   : > { %v6967_v21 = vpop.f32.mrf.mxu0 }
 0x294   : > { %v6969_v22 = vpop.f32.mrf.mxu0 }
 0x296   : > { %v6971_v23 = vpop.f32.mrf.mxu0 }
 0x298   : > { %v6973_v24 = vpop.f32.mrf.mxu0 }
 0x29a   : > { %v6975_v25 = vpop.f32.mrf.mxu0 }
 0x29c   : > { %v6977_v26 = vpop.f32.mrf.mxu0 }
 0x29e   : > { %v6979_v28 = vpop.f32.mrf.mxu0 }
 0x2a0   : > { %v6981_v30 = vpop.f32.mrf.mxu0 }
 0x2a2   : > { %v6983_v34 = vpop.f32.mrf.mxu0 }
 0x2a4   : > { %v5652_v42 = vpop.f32.mrf.mxu0 }
 0x2a6   : > { %v1509_v48 = vpop.f32.mrf.mxu0 }
 0x333   : > { %v5626_v53 = vpop.f32.mrf.mxu1 }
 0x334   : > { %v1300_v54 = vsel %vm1293_vm1, %v5626_v53, -inf }
 0x335   : > { %1301 = vmax.xlane.f32.xlu1 %v1300_v54  ;;  %v1278_v55 = vpop.f32.mrf.mxu1 }
 0x336   : > { %v1294_v57 = vsel %vm1293_vm1, %v1278_v55, -inf }
 0x337   : > { %v5627_v56 = vpop.f32.mrf.mxu1 }
 0x338   : > { %v1303_v60 = vsel %vm1293_vm1, %v5627_v56, -inf }
 0x339   : > { %1295 = vmax.xlane.f32.xlu1 %v1294_v57  ;;  %v1281_v58 = vpop.f32.mrf.mxu1 }
 0x33a   : > { %v1297_v59 = vsel %vm1293_vm1, %v1281_v58, -inf }
 0x33b   : > { %1298 = vmax.xlane.f32.xlu0 %v1297_v59 }
 0x33d   : > { %1304 = vmax.xlane.f32.xlu1 %v1303_v60 }
 0x34e   : > { %694 = vperm.xlu1 %5998, %v652_v62   ;;  %v5034_v62 = vld [vmem:[%s7916_s4 + $0x1] ss:$0 sm:$0xff] }
 0x351   : > { %769 = vperm.xlu0 %5997, %v667_v63  }
 0x352   : > { %699 = vperm.xlu1 %5998, %v653_v1  }
 0x3be   : > { %v1302_v29 = vpop.xlane.xlu1 %1301 }
 0x3bf   : > { %v1308_v32 = vsub.f32 %v5626_v53, %v1302_v29  ;;  %v5653_v53 = vpop.f32.mrf.mxu0 }
 0x3c1   : > { %v1314_v39 = vmul.f32 1.442695, %v1308_v32  ;;  %v1512_v59 = vpop.f32.mrf.mxu0  ;;  %v1521_v32 = vadd.f32 %v5653_v53, %v5034_v62 }
 0x3c2   : > { %v1296_v33 = vpop.xlane.xlu1 %1295  ;;  %v1513_v1 = vadd.f32 %v5034_v62, %v1512_v59 }
 0x3c3   : > { %v1306_v35 = vsub.f32 %v1278_v55, %v1296_v33  ;;  %v1518_v33 = vadd.f32 %v5652_v42, %v5034_v62 }
 0x3c4   : > { %v1299_v36 = vpop.xlane.xlu0 %1298 }
 0x3c5   : > { %v1310_v37 = vmul.f32 1.442695, %v1306_v35  ;;  %v1307_v38 = vsub.f32 %v1281_v58, %v1299_v36  ;;  %v1525_v35 = vpack.c.bf16 %v1521_v32, %v1518_v33 }
 0x3c6   : > { %v1305_v40 = vpop.xlane.xlu1 %1304 }
 0x3c7   : > { %v1312_v43 = vmul.f32 1.442695, %v1307_v38  ;;  %v1309_v45 = vsub.f32 %v5627_v56, %v1305_v40  ;;  %6175 = vpow2.f32 %v1310_v37 }
 0x3c9   : > { %6177 = vpow2.f32 %v1312_v43  ;;  %v1316_v46 = vmul.f32 1.442695, %v1309_v45 }
 0x3ca   : > { %6179 = vpow2.f32 %v1314_v39  ;;  %v695_v47 = vpop.permute.xlu1 %694 }
 0x3cb   : > { %6181 = vpow2.f32 %v1316_v46  ;;  %v981_v54 = vadd.f32 %v6915_v41, %v695_v47 }
 0x3cc   : > { %v770_v49 = vpop.permute.xlu0 %769 }
 0x3cd   : > { %v1040_v51 = vadd.f32 %v1039_v17, %v770_v49 }
 0x3ce   : > { %v700_v52 = vpop.permute.xlu1 %699 }
 0x3cf   : > { %v1107_v55 = vpack.c.bf16 %v1040_v51, %v1037_v50  ;;  %v984_v57 = vadd.f32 %v6917_v44, %v700_v52  ;;  %v1510_v44 = vadd.f32 %v5034_v62, %v1509_v48  ;;  %v669_v50 = vld [vmem:[%s7918_s6 + $0x98] sm:$0xff]  ;;  %v668_v51 = vld [vmem:[%s7918_s6 + $0x90] sm:$0xff] }
 0x3d1   : > { %v1100_v58 = vpack.c.bf16 %v984_v57, %v981_v54  ;;  %5906 = vmatprep.subr.msk.bf16.mxu1 %vm1293_vm1, %v1107_v55  ;;  %v1339_v56 = vsel %vm1293_vm1, %v1107_v55, 0  ;;  %v1524_v29 = vpack.c.bf16 %v1513_v1, %v1510_v44 }
 0x3d2   : > { %5629 = vmatpush3.bf16.xpose.msra.mxu1 %v1339_v56 }
 0x3d3   : > { %5654 = vmatprep.subr.bf16.mxu1 %v1100_v58 }
 0x3d4   : > { %v6176_v60 = vpop.eup %6175 }
 0x3d5   : > { %v1318_v52 = vsel %vm1293_vm1, %v6176_v60, 0.0 }
 0x3d6   : > { %v6178_v63 = vpop.eup %6177 }
 0x3d7   : > { %v6992_v15 = vpop.eup %6179  ;;  %v1330_v41 = vpack.c.bf16 %v6178_v63, %v6176_v60  ;;  %v1321_v53 = vsel %vm1293_vm1, %v6178_v63, 0.0 }
 0x3d8   : > { %v6994_v17 = vpop.eup %6181 }
 0x3d9   : > { %5630 = vmatprep.mubr.msk.bf16.mxu1 %vm1293_vm1, %v1330_v41  ;;  %v1331_v27 = vpack.c.bf16 %v6994_v17, %v6992_v15 }
 0x3db   : > { %5631 = vmatmul.mubr.msk.bf16.vlgmr.msra.gmra.mxu1 %vm1293_vm1, %v1331_v27 }
 0x3dc   : > { %5655 = vmatpush3.bf16.msra.mxu1 %v1100_v58  ;;  %5656 = vmatprep.mubr.msk.bf16.mxu1 %vm1237_vm0, %v1524_v29 }
 0x3e3   : > { %5657 = vmatmul.mubr.msk.bf16.vlgmr.msra.gmra.mxu1 %vm1237_vm0, %v1525_v35 }
 0x49b   : > { %v7002_v36 = vpop.f32.mrf.mxu1 }
 0x49d   : > { %v7004_v37 = vpop.f32.mrf.mxu1 }
 0x49f   : > { %v7006_v38 = vpop.f32.mrf.mxu1 }
 0x4a1   : > { %v7008_v39 = vpop.f32.mrf.mxu1 }
 0x4a3   : > { %v5658_v40 = vpop.f32.mrf.mxu1 }
 0x4a4   : > { %v1587_v43 = vsel %vm1293_vm1, %v5658_v40, -inf }
 0x4a5   : > { %1588 = vmax.xlane.f32.xlu1 %v1587_v43  ;;  %v1566_v45 = vpop.f32.mrf.mxu1 }
 0x4a6   : > { %v1581_v47 = vsel %vm1293_vm1, %v1566_v45, -inf }
 0x4a7   : > { %v5659_v46 = vpop.f32.mrf.mxu1 }
 0x4a8   : > { %v1590_v49 = vsel %vm1293_vm1, %v5659_v46, -inf }
 0x4a9   : > { %1582 = vmax.xlane.f32.xlu1 %v1581_v47  ;;  %v1569_v42 = vpop.f32.mrf.mxu1 }
 0x4aa   : > { %v1584_v48 = vsel %vm1293_vm1, %v1569_v42, -inf }
 0x4ab   : > { %1585 = vmax.xlane.f32.xlu0 %v1584_v48 }
 0x4ad   : > { %1591 = vmax.xlane.f32.xlu1 %v1590_v49 }
 0x4be   : > { %779 = vperm.xlu1 %5998, %v669_v50  }
 0x4c1   : > { %774 = vperm.xlu0 %5997, %v668_v51   ;;  %v1324_v51 = vsel %vm1293_vm1, %v6992_v15, 0.0  ;;  %v6040_v15 = vld [vmem:[%s7919_s7] sm:$0xff]  }
 0x4e0   : > { %1319 = vadd.xlane.f32.xlu0 %v1318_v52  ;;  %v1327_v52 = vsel %vm1293_vm1, %v6994_v17, 0.0 }
 0x4e2   : > { %1322 = vadd.xlane.f32.xlu1 %v1321_v53  ;;  %v655_v53 = vld [vmem:[%s7918_s6 + $0x28] sm:$0xff] }
 0x52e   : > { %v1589_v54 = vpop.xlane.xlu1 %1588 }
 0x52f   : > { %v1595_v55 = vsub.f32 %v5658_v40, %v1589_v54  ;;  %v654_v54 = vld [vmem:[%s7918_s6 + $0x20] sm:$0xff] }
 0x531   : > { %v1601_v57 = vmul.f32 1.442695, %v1595_v55  ;;  %v6039_v55 = vld [vmem:[%s7919_s7 + $0x8] sm:$0xff]  }
 0x532   : > { %v1583_v58 = vpop.xlane.xlu1 %1582 }
 0x533   : > { %6183 = vpow2.f32 %v1601_v57  ;;  %v1593_v56 = vsub.f32 %v1566_v45, %v1583_v58 }
 0x534   : > { %v1586_v59 = vpop.xlane.xlu0 %1585 }
 0x535   : > { %v1597_v62 = vmul.f32 1.442695, %v1593_v56  ;;  %v1594_v1 = vsub.f32 %v1569_v42, %v1586_v59 }
 0x536   : > { %v1592_v41 = vpop.xlane.xlu1 %1591 }
 0x537   : > { %6185 = vpow2.f32 %v1597_v62  ;;  %v1599_v44 = vmul.f32 1.442695, %v1594_v1  ;;  %v1596_v27 = vsub.f32 %v5659_v46, %v1592_v41 }
 0x539   : > { %6187 = vpow2.f32 %v1599_v44  ;;  %v1603_v29 = vmul.f32 1.442695, %v1596_v27  ;;  %v5696_v44 = vpop.f32.mrf.mxu0 }
 0x53a   : > { %v780_v60 = vpop.permute.xlu1 %779 }
 0x53b   : > { %6189 = vpow2.f32 %v1603_v29  ;;  %v1048_v63 = vadd.f32 %v6959_v16, %v780_v60 }
 0x53c   : > { %v775_v32 = vpop.permute.xlu0 %774 }
 0x53d   : > { %v1045_v33 = vadd.f32 %v6957_v14, %v775_v32 }
 0x53f   : > { %v1108_v35 = vpack.c.bf16 %v1048_v63, %v1045_v33  ;;  %v1919_v33 = vpop.f32.mrf.mxu0 }
 0x540   : > { %v6184_v40 = vpop.eup %6183 }
 0x541   : > { %5907 = vmatprep.subr.msk.bf16.mxu1 %vm1293_vm1, %v1108_v35  ;;  %v1611_v43 = vsel %vm1293_vm1, %v6184_v40, 0.0  ;;  %v1626_v45 = vsel %vm1293_vm1, %v1108_v35, 0 }
 0x542   : > { %1612 = vadd.xlane.f32.xlu0 %v1611_v43  ;;  %5661 = vmatpush3.bf16.xpose.msra.mxu1 %v1626_v45 }
 0x543   : > { %5666 = vmatprep.subr.bf16.mxu1 %v6039_v55 }
 0x544   : > { %v6186_v46 = vpop.eup %6185 }
 0x545   : > { %v1605_v47 = vsel %vm1293_vm1, %v6186_v46, 0.0 }
 0x546   : > { %v6188_v42 = vpop.eup %6187  ;;  %1606 = vadd.xlane.f32.xlu1 %v1605_v47 }
 0x547   : > { %v1608_v48 = vsel %vm1293_vm1, %v6188_v42, 0.0  ;;  %v1617_v16 = vpack.c.bf16 %v6188_v42, %v6186_v46 }
 0x548   : > { %v6190_v49 = vpop.eup %6189  ;;  %1609 = vadd.xlane.f32.xlu0 %v1608_v48 }
 0x549   : > { %5662 = vmatprep.mubr.msk.bf16.mxu1 %vm1293_vm1, %v1617_v16  ;;  %v1614_v14 = vsel %vm1293_vm1, %v6190_v49, 0.0  ;;  %v1618_v50 = vpack.c.bf16 %v6190_v49, %v6184_v40 }
 0x54a   : > { %1615 = vadd.xlane.f32.xlu1 %v1614_v14 }
 0x54b   : > { %5663 = vmatmul.mubr.msk.bf16.vlgmr.msra.gmra.mxu1 %vm1293_vm1, %v1618_v50  ;;  %v5697_v50 = vpop.f32.mrf.mxu0 }
 0x54c   : > { %1325 = vadd.xlane.f32.xlu0 %v1324_v51  ;;  %5667 = vmatpush3.bf16.msra.mxu1 %v6039_v55 }
 0x54d   : > { %5672 = vmatprep.subr.bf16.mxu1 %v6040_v15 }
 0x54e   : > { %1328 = vadd.xlane.f32.xlu1 %v1327_v52 }
 0x55f   : > { %709 = vperm.xlu1 %5998, %v655_v53  }
 0x562   : > { %704 = vperm.xlu0 %5997, %v654_v54  }
 0x569   : > { %v1320_v57 = vpop.xlane.xlu0 %1319 }
 0x56a   : > { %6191 = vrcp.f32 %v1320_v57 }
 0x56b   : > { %v1323_v17 = vpop.xlane.xlu1 %1322 }
 0x56c   : > { %6193 = vrcp.f32 %v1323_v17 }
 0x577   : > { %v6192_v29 = vpop.eup %6191 }
 0x578   : > { %v1394_v54 = vmul.f32 %v6192_v29, %v7004_v37 }
 0x579   : > { %v6194_v32 = vpop.eup %6193 }
 0x57a   : > { %v1395_v14 = vmul.f32 %v6194_v32, %v7008_v39 }
 0x5cb   : > { %v1613_v56 = vpop.xlane.xlu0 %1612 }
 0x5cf   : > { %v1607_v58 = vpop.xlane.xlu1 %1606 }
 0x5d0   : > { %6195 = vrcp.f32 %v1607_v58  ;;  %v1398_v58 = vpack.c.bf16 %v1395_v14, %v1394_v54  ;;  %v670_v54 = vld [vmem:[%s7918_s6 + $0xa0] sm:$0xff] }
 0x5d1   : > { %v1610_v62 = vpop.xlane.xlu0 %1609 }
 0x5d3   : > { %v1616_v59 = vpop.xlane.xlu1 %1615 }
 0x5d4   : > { %6197 = vrcp.f32 %v1616_v59 }
 0x5d5   : > { %6199 = vrcp.f32 %v1610_v62  ;;  %v1326_v41 = vpop.xlane.xlu0 %1325 }
 0x5d6   : > { %6201 = vrcp.f32 %v1613_v56  ;;  %v1922_v56 = vpop.f32.mrf.mxu0 }
 0x5d7   : > { %v1329_v1 = vpop.xlane.xlu1 %1328 }
 0x5d8   : > { %6203 = vrcp.f32 %v1329_v1 }
 0x5d9   : > { %6205 = vrcp.f32 %v1326_v41 }
 0x5db   : > { %v710_v48 = vpop.permute.xlu1 %709 }
 0x5dc   : > { %v992_v55 = vadd.f32 %v6939_v5, %v710_v48 }
 0x5dd   : > { %v6196_v63 = vpop.eup %6195  ;;  %v705_v43 = vpop.permute.xlu0 %704 }
 0x5de   : > { %v989_v51 = vadd.f32 %v6935_v3, %v705_v43  ;;  %v5072_v3 = vld [vmem:[%s7916_s4 + $0x2] ss:$0 sm:$0xff] }
 0x5df   : > { %v1923_v37 = vadd.f32 %v5072_v3, %v1922_v56  ;;  %v1920_v1 = vadd.f32 %v5072_v3, %v1919_v33  ;;  %v1928_v29 = vadd.f32 %v5696_v44, %v5072_v3 }
 0x5e0   : > { %v1101_v59 = vpack.c.bf16 %v992_v55, %v989_v51 }
 0x5e1   : > { %v6198_v40 = vpop.eup %6197 }
 0x5e2   : > { %v6200_v45 = vpop.eup %6199 }
 0x5e3   : > { %v6202_v42 = vpop.eup %6201 }
 0x5e5   : > { %v6204_v57 = vpop.eup %6203 }
 0x5e6   : > { %v6206_v62 = vpop.eup %6205  ;;  %v1397_v5 = vmul.f32 %v6204_v57, %v7006_v38 }
 0x5e7   : > { %v1396_v39 = vmul.f32 %v6206_v62, %v7002_v36 }
 0x5e9   : > { %v1399_v41 = vpack.c.bf16 %v1397_v5, %v1396_v39 }
 0x60b   : > { %v5664_v27 = vpop.f32.mrf.mxu1 }
 0x60c   : > { %v1683_v52 = vmul.f32 %v6202_v42, %v5664_v27  ;;  %v1934_v27 = vpack.c.bf16 %v1923_v37, %v1920_v1 }
 0x60d   : > { %v1662_v60 = vpop.f32.mrf.mxu1 }
 0x60e   : > { %v1681_v16 = vmul.f32 %v6196_v63, %v1662_v60 }
 0x60f   : > { %v5665_v35 = vpop.f32.mrf.mxu1 }
 0x610   : > { %v1684_v46 = vmul.f32 %v6198_v40, %v5665_v35 }
 0x611   : > { %v1665_v47 = vpop.f32.mrf.mxu1 }
 0x612   : > { %v1682_v49 = vmul.f32 %v6200_v45, %v1665_v47  ;;  %v1686_v17 = vpack.c.bf16 %v1684_v46, %v1683_v52 }
 0x614   : > { %v1685_v53 = vpack.c.bf16 %v1682_v49, %v1681_v16 }
 0x616   : > { %5668 = vmatprep.mubr.msk.bf16.mxu1 %vm1237_vm0, %v1685_v53  ;;  %v671_v53 = vld [vmem:[%s7918_s6 + $0xa8] sm:$0xff] }
 0x617   : > { %5669 = vmatmul.mubr.msk.bf16.vlgmr.msra.gmra.mxu1 %vm1237_vm0, %v1686_v17 }
 0x618   : > { %5673 = vmatpush3.bf16.msra.mxu1 %v6040_v15  ;;  %5674 = vmatprep.mubr.msk.bf16.mxu1 %vm1237_vm0, %v1398_v58  ;;  %v1931_v15 = vadd.f32 %v5697_v50, %v5072_v3 }
 0x619   : > { %5698 = vmatprep.subr.bf16.mxu1 %v1101_v59 }
 0x61a   : > { %v1935_v60 = vpack.c.bf16 %v1931_v15, %v1928_v29 }
 0x61f   : > { %5675 = vmatmul.mubr.msk.bf16.vlgmr.msra.gmra.mxu1 %vm1237_vm0, %v1399_v41 }
 0x620   : > { %5699 = vmatpush3.bf16.msra.mxu1 %v1101_v59  ;;  %5700 = vmatprep.mubr.msk.bf16.mxu1 %vm1237_vm0, %v1934_v27 }
 0x627   : > { %5701 = vmatmul.mubr.msk.bf16.vlgmr.msra.gmra.mxu1 %vm1237_vm0, %v1935_v60 }
 0x6d7   : > { %v5670_v32 = vpop.f32.mrf.mxu1 }
 0x6d9   : > { %v1736_v63 = vpop.f32.mrf.mxu1 }
 0x6db   : > { %v5671_v35 = vpop.f32.mrf.mxu1 }
 0x6dd   : > { %v1739_v38 = vpop.f32.mrf.mxu1 }
 0x6df   : > { %v5676_v40 = vpop.f32.mrf.mxu1 }
 0x6e0   : > { %v7063_v43 = vadd.f32 %v5676_v40, %v5670_v32 }
 0x6e1   : > { %v1797_v36 = vpop.f32.mrf.mxu1 }
 0x6e2   : > { %v7065_v33 = vadd.f32 %v1797_v36, %v1736_v63 }
 0x6e3   : > { %v5677_v45 = vpop.f32.mrf.mxu1 }
 0x6e4   : > { %v7067_v46 = vadd.f32 %v5677_v45, %v5671_v35 }
 0x6e5   : > { %v1800_v47 = vpop.f32.mrf.mxu1 }
 0x6e6   : > { %v7069_v42 = vadd.f32 %v1800_v47, %v1739_v38 }
 0x6e7   : > { %v5702_v44 = vpop.f32.mrf.mxu1 }
 0x6e8   : > { %v1997_v48 = vsel %vm1293_vm1, %v5702_v44, -inf }
 0x6e9   : > { %1998 = vmax.xlane.f32.xlu0 %v1997_v48  ;;  %v1976_v16 = vpop.f32.mrf.mxu1  ;;  %v657_v48 = vld [vmem:[%s7918_s6 + $0x38] sm:$0xff] }
 0x6ea   : > { %v1991_v49 = vsel %vm1293_vm1, %v1976_v16, -inf }
 0x6eb   : > { %1992 = vmax.xlane.f32.xlu1 %v1991_v49  ;;  %v5703_v14 = vpop.f32.mrf.mxu1  ;;  %v6041_v49 = vld [vmem:[%s7919_s7 + $0x10] sm:$0xff]  }
 0x6ec   : > { %v2000_v51 = vsel %vm1293_vm1, %v5703_v14, -inf }
 0x6ed   : > { %v1979_v50 = vpop.f32.mrf.mxu1 }
 0x6ee   : > { %v1994_v52 = vsel %vm1293_vm1, %v1979_v50, -inf }
 0x6ef   : > { %2001 = vmax.xlane.f32.xlu1 %v2000_v51  ;;  %1995 = vmax.xlane.f32.xlu0 %v1994_v52 }
 0x700   : > { %789 = vperm.xlu1 %5998, %v671_v53  }
 0x705   : > { %784 = vperm.xlu0 %5997, %v670_v54  }
 0x772   : > { %v1999_v55 = vpop.xlane.xlu0 %1998 }
 0x773   : > { %v2005_v17 = vsub.f32 %v5702_v44, %v1999_v55 }
 0x774   : > { %v1993_v57 = vpop.xlane.xlu1 %1992 }
 0x775   : > { %v2003_v58 = vsub.f32 %v1976_v16, %v1993_v57  ;;  %v2011_v59 = vmul.f32 1.442695, %v2005_v17  ;;  %v656_v16 = vld [vmem:[%s7918_s6 + $0x30] sm:$0xff] }
 0x777   : > { %v2007_v56 = vmul.f32 1.442695, %v2003_v58 }
 0x778   : > { %v2002_v62 = vpop.xlane.xlu1 %2001  ;;  %v1996_v3 = vpop.xlane.xlu0 %1995 }
 0x779   : > { %6207 = vpow2.f32 %v2007_v56  ;;  %v2006_v5 = vsub.f32 %v5703_v14, %v2002_v62  ;;  %v2004_v37 = vsub.f32 %v1979_v50, %v1996_v3  ;;  %v6042_v14 = vld [vmem:[%s7915_s3 + $0xf8] sm:$0xff]  }
 0x77a   : > { %6209 = vpow2.f32 %v2011_v59 }
 0x77b   : > { %v2013_v39 = vmul.f32 1.442695, %v2006_v5  ;;  %v2009_v1 = vmul.f32 1.442695, %v2004_v37 }
 0x77c   : > { %v790_v41 = vpop.permute.xlu1 %789 }
 0x77d   : > { %6211 = vpow2.f32 %v2013_v39  ;;  %v1056_v15 = vadd.f32 %v6967_v21, %v790_v41 }
 0x77e   : > { %6213 = vpow2.f32 %v2009_v1 }
 0x780   : > { %v785_v27 = vpop.permute.xlu0 %784 }
 0x781   : > { %v1053_v29 = vadd.f32 %v6963_v19, %v785_v27 }
 0x783   : > { %v1109_v60 = vpack.c.bf16 %v1056_v15, %v1053_v29 }
 0x785   : > { %5908 = vmatprep.subr.msk.bf16.mxu1 %vm1293_vm1, %v1109_v60  ;;  %v2036_v32 = vsel %vm1293_vm1, %v1109_v60, 0  ;;  %v6043_v60 = vld [vmem:[%s7915_s3 + $0xf0] sm:$0xff]  }
 0x786   : > { %v6208_v63 = vpop.eup %6207  ;;  %5705 = vmatpush3.bf16.xpose.msra.mxu1 %v2036_v32  ;;  %v6044_v32 = vld [vmem:[%s7915_s3 + $0xe8] sm:$0xff]  }
 0x787   : > { %v2015_v35 = vsel %vm1293_vm1, %v6208_v63, 0.0  ;;  %v6210_v38 = vpop.eup %6209  ;;  %5710 = vmatprep.subr.bf16.mxu1 %v6041_v49 }
 0x788   : > { %2016 = vadd.xlane.f32.xlu1 %v2015_v35  ;;  %v2021_v44 = vsel %vm1293_vm1, %v6210_v38, 0.0  ;;  %v6046_v35 = vld [vmem:[%s7915_s3 + $0xd8] sm:$0xff]  }
 0x78a   : > { %v6212_v40 = vpop.eup %6211 }
 0x78b   : > { %v6214_v36 = vpop.eup %6213  ;;  %v2024_v45 = vsel %vm1293_vm1, %v6212_v40, 0.0  ;;  %v2028_v47 = vpack.c.bf16 %v6212_v40, %v6210_v38  ;;  %v6047_v38 = vld [vmem:[%s7915_s3 + $0xd0] sm:$0xff]   ;;  %v6048_v40 = vld [vmem:[%s7915_s3 + $0xc8] sm:$0xff]  }
 0x78c   : > { %2025 = vadd.xlane.f32.xlu1 %v2024_v45  ;;  %v2018_v21 = vsel %vm1293_vm1, %v6214_v36, 0.0  ;;  %v2027_v19 = vpack.c.bf16 %v6214_v36, %v6208_v63  ;;  %v6045_v63 = vld [vmem:[%s7915_s3 + $0xe0] sm:$0xff]  }
 0x78d   : > { %2019 = vadd.xlane.f32.xlu0 %v2018_v21  ;;  %v6049_v36 = vld [vmem:[%s7915_s3 + $0xc0] sm:$0xff]  }
 0x78e   : > { %5706 = vmatprep.mubr.msk.bf16.mxu1 %vm1293_vm1, %v2027_v19 }
 0x78f   : > { %5707 = vmatmul.mubr.msk.bf16.vlgmr.msra.gmra.mxu1 %vm1293_vm1, %v2028_v47 }
 0x790   : > { %5711 = vmatpush3.bf16.msra.mxu1 %v6041_v49 }
 0x791   : > { %2022 = vadd.xlane.f32.xlu0 %v2021_v44  ;;  %5716 = vmatprep.subr.bf16.mxu1 %v6042_v14 }
 0x79d   : > { %719 = vperm.xlu1 %5998, %v657_v48  }
 0x7a7   : > { %714 = vperm.xlu0 %5997, %v656_v16  }
 0x811   : > { %v2017_v50 = vpop.xlane.xlu1 %2016 }
 0x812   : > { %6215 = vrcp.f32 %v2017_v50 }
 0x815   : > { %v2026_v52 = vpop.xlane.xlu1 %2025 }
 0x816   : > { %v2020_v51 = vpop.xlane.xlu0 %2019  ;;  %6217 = vrcp.f32 %v2026_v52 }
 0x817   : > { %6219 = vrcp.f32 %v2020_v51 }
 0x819   : > { %v720_v54 = vpop.permute.xlu1 %719 }
 0x81a   : > { %v2023_v53 = vpop.xlane.xlu0 %2022  ;;  %v1000_v17 = vadd.f32 %v6937_v4, %v720_v54 }
 0x81b   : > { %6221 = vrcp.f32 %v2023_v53 }
 0x81f   : > { %v6216_v62 = vpop.eup %6215 }
 0x822   : > { %v715_v55 = vpop.permute.xlu0 %714 }
 0x823   : > { %v997_v57 = vadd.f32 %v6933_v2, %v715_v55  ;;  %v6218_v5 = vpop.eup %6217 }
 0x824   : > { %v6220_v37 = vpop.eup %6219 }
 0x825   : > { %v1102_v58 = vpack.c.bf16 %v1000_v17, %v997_v57 }
 0x827   : > { %5736 = vmatprep.subr.bf16.mxu0 %v1102_v58 }
 0x828   : > { %5737 = vmatpush3.bf16.msra.mxu0 %v1102_v58  ;;  %v6222_v41 = vpop.eup %6221 }
 0x84f   : > { %v5708_v56 = vpop.f32.mrf.mxu1 }
 0x850   : > { %v2093_v15 = vmul.f32 %v6222_v41, %v5708_v56 }
 0x851   : > { %v2072_v59 = vpop.f32.mrf.mxu1 }
 0x852   : > { %v2091_v27 = vmul.f32 %v6216_v62, %v2072_v59 }
 0x853   : > { %v5709_v3 = vpop.f32.mrf.mxu1 }
 0x854   : > { %v2094_v39 = vmul.f32 %v6218_v5, %v5709_v3 }
 0x855   : > { %v2075_v1 = vpop.f32.mrf.mxu1 }
 0x856   : > { %v2092_v4 = vmul.f32 %v6220_v37, %v2075_v1  ;;  %v2096_v29 = vpack.c.bf16 %v2094_v39, %v2093_v15  ;;  %v673_v37 = vld [vmem:[%s7918_s6 + $0xb8] sm:$0xff]  ;;  %v672_v39 = vld [vmem:[%s7918_s6 + $0xb0] sm:$0xff] }
 0x858   : > { %v2095_v2 = vpack.c.bf16 %v2092_v4, %v2091_v27 }
 0x85a   : > { %5712 = vmatprep.mubr.msk.bf16.mxu1 %vm1237_vm0, %v2095_v2 }
 0x85b   : > { %5713 = vmatmul.mubr.msk.bf16.vlgmr.msra.gmra.mxu1 %vm1237_vm0, %v2096_v29 }
 0x85c   : > { %5717 = vmatpush3.bf16.msra.mxu1 %v6042_v14  ;;  %5732 = vmatprep.mubr.bf16.mxu1 %v6807_v0 }
 0x85d   : > { %5718 = vmatprep.subr.bf16.mxu1 %v6043_v60 }
 0x860   : > { %5719 = vmatpush3.bf16.msra.mxu1 %v6043_v60 }
 0x861   : > { %5720 = vmatprep.subr.bf16.mxu1 %v6044_v32 }
 0x864   : > { %5721 = vmatpush3.bf16.msra.mxu1 %v6044_v32 }
 0x865   : > { %5722 = vmatprep.subr.bf16.mxu1 %v6045_v63 }
 0x868   : > { %5723 = vmatpush3.bf16.msra.mxu1 %v6045_v63 }
 0x869   : > { %5724 = vmatprep.subr.bf16.mxu1 %v6046_v35 }
 0x86c   : > { %5725 = vmatpush3.bf16.msra.mxu1 %v6046_v35 }
 0x86d   : > { %5726 = vmatprep.subr.bf16.mxu1 %v6047_v38 }
 0x870   : > { %5727 = vmatpush3.bf16.msra.mxu1 %v6047_v38 }
 0x871   : > { %5728 = vmatprep.subr.bf16.mxu1 %v6048_v40 }
 0x874   : > { %5729 = vmatpush3.bf16.msra.mxu1 %v6048_v40 }
 0x875   : > { %5730 = vmatprep.subr.bf16.mxu1 %v6049_v36 }
 0x878   : > { %5731 = vmatpush3.bf16.msra.mxu1 %v6049_v36 }
 0x87b   : > { %5733 = vmatmul.mubr.bf16.vlgmr.msra.gmra.mxu1 %v6804_v61 }
 0x91b   : > { %v5714_v45 = vpop.f32.mrf.mxu1 }
 0x91c   : > { %v7131_v47 = vadd.f32 %v5714_v45, %v7063_v43  ;;  %v5107_v43 = vld [vmem:[%s7916_s4 + $0x3] ss:$0 sm:$0xff] }
 0x91d   : > { %v2146_v21 = vpop.f32.mrf.mxu1 }
 0x91e   : > { %v7134_v19 = vadd.f32 %v2146_v21, %v7065_v33 }
 0x91f   : > { %v5715_v44 = vpop.f32.mrf.mxu1 }
 0x920   : > { %v7137_v48 = vadd.f32 %v5715_v44, %v7067_v46 }
 0x921   : > { %v2149_v16 = vpop.f32.mrf.mxu1 }
 0x922   : > { %v7140_v49 = vadd.f32 %v2149_v16, %v7069_v42 }
 0x93b   : > { %v5734_v14 = vpop.f32.mrf.mxu1 }
 0x93c   : > { %v2281_v55 = vadd.f32 %v5734_v14, %v5107_v43 }
 0x93d   : > { %v2272_v50 = vpop.f32.mrf.mxu1 }
 0x93e   : > { %v2273_v54 = vadd.f32 %v5107_v43, %v2272_v50 }
 0x93f   : > { %v5735_v51 = vpop.f32.mrf.mxu1 }
 0x940   : > { %v2284_v52 = vadd.f32 %v5735_v51, %v5107_v43 }
 0x941   : > { %v2275_v53 = vpop.f32.mrf.mxu1 }
 0x942   : > { %v2276_v33 = vadd.f32 %v5107_v43, %v2275_v53  ;;  %v2288_v57 = vpack.c.bf16 %v2284_v52, %v2281_v55  ;;  %v659_v55 = vld [vmem:[%s7918_s6 + $0x48] sm:$0xff] }
 0x944   : > { %v2287_v17 = vpack.c.bf16 %v2276_v33, %v2273_v54 }
 0x946   : > { %5738 = vmatprep.mubr.msk.bf16.mxu0 %vm1237_vm0, %v2287_v17  ;;  %v658_v17 = vld [vmem:[%s7918_s6 + $0x40] sm:$0xff] }
 0x947   : > { %5739 = vmatmul.mubr.msk.bf16.vlgmr.msra.gmra.mxu0 %vm1237_vm0, %v2288_v57  ;;  %v6050_v57 = vld [vmem:[%s7919_s7 + $0x18] sm:$0xff]  }
 0xa07   : > { %v5740_v46 = vpop.f32.mrf.mxu0 }
 0xa08   : > { %v2350_v42 = vsel %vm1293_vm1, %v5740_v46, -inf }
 0xa09   : > { %2351 = vmax.xlane.f32.xlu0 %v2350_v42  ;;  %v2329_v58 = vpop.f32.mrf.mxu0 }
 0xa0a   : > { %v2344_v56 = vsel %vm1293_vm1, %v2329_v58, -inf }
 0xa0b   : > { %2345 = vmax.xlane.f32.xlu1 %v2344_v56  ;;  %v5741_v59 = vpop.f32.mrf.mxu0 }
 0xa0c   : > { %v2353_v3 = vsel %vm1293_vm1, %v5741_v59, -inf }
 0xa0d   : > { %v2332_v62 = vpop.f32.mrf.mxu0 }
 0xa0e   : > { %v2347_v5 = vsel %vm1293_vm1, %v2332_v62, -inf }
 0xa0f   : > { %2354 = vmax.xlane.f32.xlu1 %v2353_v3  ;;  %2348 = vmax.xlane.f32.xlu0 %v2347_v5 }
 0xa20   : > { %799 = vperm.xlu1 %5998, %v673_v37  }
 0xa25   : > { %794 = vperm.xlu0 %5997, %v672_v39  }
 0xa92   : > { %v2352_v1 = vpop.xlane.xlu0 %2351 }
 0xa93   : > { %v2358_v41 = vsub.f32 %v5740_v46, %v2352_v1  ;;  %v6051_v46 = vld [vmem:[%s7915_s3 + $0x138] sm:$0xff]  }
 0xa94   : > { %v2346_v27 = vpop.xlane.xlu1 %2345 }
 0xa95   : > { %v2356_v4 = vsub.f32 %v2329_v58, %v2346_v27  ;;  %v2364_v2 = vmul.f32 1.442695, %v2358_v41 }
 0xa97   : > { %v2360_v15 = vmul.f32 1.442695, %v2356_v4 }
 0xa98   : > { %v2355_v29 = vpop.xlane.xlu1 %2354  ;;  %v2349_v60 = vpop.xlane.xlu0 %2348 }
 0xa99   : > { %6223 = vpow2.f32 %v2360_v15  ;;  %v2359_v32 = vsub.f32 %v5741_v59, %v2355_v29  ;;  %v2357_v63 = vsub.f32 %v2332_v62, %v2349_v60 }
 0xa9a   : > { %6225 = vpow2.f32 %v2364_v2 }
 0xa9b   : > { %v2366_v35 = vmul.f32 1.442695, %v2359_v32  ;;  %v2362_v38 = vmul.f32 1.442695, %v2357_v63 }
 0xa9c   : > { %v800_v40 = vpop.permute.xlu1 %799 }
 0xa9d   : > { %6227 = vpow2.f32 %v2366_v35  ;;  %v1064_v45 = vadd.f32 %v6965_v20, %v800_v40  ;;  %v6052_v40 = vld [vmem:[%s7915_s3 + $0x130] sm:$0xff]  }
 0xa9e   : > { %6229 = vpow2.f32 %v2362_v38 }
 0xaa0   : > { %v795_v36 = vpop.permute.xlu0 %794 }
 0xaa1   : > { %v1061_v21 = vadd.f32 %v6961_v18, %v795_v36  ;;  %v6053_v36 = vld [vmem:[%s7915_s3 + $0x128] sm:$0xff]  }
 0xaa3   : > { %v1110_v44 = vpack.c.bf16 %v1064_v45, %v1061_v21  ;;  %v6054_v45 = vld [vmem:[%s7915_s3 + $0x120] sm:$0xff]   ;;  %v6055_v21 = vld [vmem:[%s7915_s3 + $0x118] sm:$0xff]  }
 0xaa5   : > { %5909 = vmatprep.subr.msk.bf16.mxu0 %vm1293_vm1, %v1110_v44  ;;  %v2389_v16 = vsel %vm1293_vm1, %v1110_v44, 0  ;;  %v6056_v44 = vld [vmem:[%s7915_s3 + $0x110] sm:$0xff]  }
 0xaa6   : > { %v6224_v14 = vpop.eup %6223  ;;  %5743 = vmatpush3.bf16.xpose.msra.mxu0 %v2389_v16  ;;  %v6057_v16 = vld [vmem:[%s7915_s3 + $0x108] sm:$0xff]  }
 0xaa7   : > { %v2368_v50 = vsel %vm1293_vm1, %v6224_v14, 0.0  ;;  %v6226_v51 = vpop.eup %6225  ;;  %5748 = vmatprep.subr.bf16.mxu0 %v6050_v57 }
 0xaa8   : > { %2369 = vadd.xlane.f32.xlu1 %v2368_v50  ;;  %v2374_v33 = vsel %vm1293_vm1, %v6226_v51, 0.0 }
 0xaaa   : > { %v6228_v43 = vpop.eup %6227 }
 0xaab   : > { %v6230_v52 = vpop.eup %6229  ;;  %v2377_v53 = vsel %vm1293_vm1, %v6228_v43, 0.0  ;;  %v2381_v54 = vpack.c.bf16 %v6228_v43, %v6226_v51 }
 0xaac   : > { %2378 = vadd.xlane.f32.xlu1 %v2377_v53  ;;  %v2371_v20 = vsel %vm1293_vm1, %v6230_v52, 0.0  ;;  %v2380_v18 = vpack.c.bf16 %v6230_v52, %v6224_v14  ;;  %v6058_v14 = vld [vmem:[%s7915_s3 + $0x100] sm:$0xff]  }
 0xaad   : > { %2372 = vadd.xlane.f32.xlu0 %v2371_v20 }
 0xaae   : > { %5744 = vmatprep.mubr.msk.bf16.mxu0 %vm1293_vm1, %v2380_v18 }
 0xaaf   : > { %5745 = vmatmul.mubr.msk.bf16.vlgmr.msra.gmra.mxu0 %vm1293_vm1, %v2381_v54 }
 0xab0   : > { %5749 = vmatpush3.bf16.msra.mxu0 %v6050_v57 }
 0xab1   : > { %2375 = vadd.xlane.f32.xlu0 %v2374_v33  ;;  %5754 = vmatprep.subr.bf16.mxu0 %v6051_v46 }
 0xabd   : > { %729 = vperm.xlu1 %5998, %v659_v55  }
 0xac7   : > { %724 = vperm.xlu0 %5997, %v658_v17  }
 0xb31   : > { %v2370_v42 = vpop.xlane.xlu1 %2369 }
 0xb32   : > { %6231 = vrcp.f32 %v2370_v42 }
 0xb35   : > { %v2379_v56 = vpop.xlane.xlu1 %2378 }
 0xb36   : > { %v2373_v58 = vpop.xlane.xlu0 %2372  ;;  %6233 = vrcp.f32 %v2379_v56 }
 0xb37   : > { %6235 = vrcp.f32 %v2373_v58 }
 0xb39   : > { %v730_v62 = vpop.permute.xlu1 %729 }
 0xb3a   : > { %v2376_v59 = vpop.xlane.xlu0 %2375  ;;  %v1008_v5 = vadd.f32 %v6947_v9, %v730_v62 }
 0xb3b   : > { %6237 = vrcp.f32 %v2376_v59 }
 0xb3f   : > { %v6232_v27 = vpop.eup %6231 }
 0xb42   : > { %v725_v3 = vpop.permute.xlu0 %724 }
 0xb43   : > { %v1005_v37 = vadd.f32 %v6943_v7, %v725_v3  ;;  %v6234_v15 = vpop.eup %6233 }
 0xb44   : > { %v6236_v2 = vpop.eup %6235 }
 0xb45   : > { %v1103_v39 = vpack.c.bf16 %v1008_v5, %v1005_v37 }
 0xb47   : > { %5774 = vmatprep.subr.bf16.mxu1 %v1103_v39 }
 0xb48   : > { %5775 = vmatpush3.bf16.msra.mxu1 %v1103_v39  ;;  %v6238_v32 = vpop.eup %6237 }
 0xb6f   : > { %v5746_v1 = vpop.f32.mrf.mxu0 }
 0xb70   : > { %v2446_v35 = vmul.f32 %v6238_v32, %v5746_v1 }
 0xb71   : > { %v2425_v41 = vpop.f32.mrf.mxu0 }
 0xb72   : > { %v2444_v63 = vmul.f32 %v6232_v27, %v2425_v41  ;;  %v675_v41 = vld [vmem:[%s7918_s6 + $0xc8] sm:$0xff]  ;;  %v674_v27 = vld [vmem:[%s7918_s6 + $0xc0] sm:$0xff] }
 0xb73   : > { %v5747_v4 = vpop.f32.mrf.mxu0 }
 0xb74   : > { %v2447_v29 = vmul.f32 %v6234_v15, %v5747_v4 }
 0xb75   : > { %v2428_v60 = vpop.f32.mrf.mxu0 }
 0xb76   : > { %v2445_v9 = vmul.f32 %v6236_v2, %v2428_v60  ;;  %v2449_v38 = vpack.c.bf16 %v2447_v29, %v2446_v35 }
 0xb78   : > { %v2448_v7 = vpack.c.bf16 %v2445_v9, %v2444_v63 }
 0xb7a   : > { %5750 = vmatprep.mubr.msk.bf16.mxu0 %vm1237_vm0, %v2448_v7 }
 0xb7b   : > { %5751 = vmatmul.mubr.msk.bf16.vlgmr.msra.gmra.mxu0 %vm1237_vm0, %v2449_v38 }
 0xb7c   : > { %5755 = vmatpush3.bf16.msra.mxu0 %v6051_v46  ;;  %5770 = vmatprep.mubr.bf16.mxu0 %v6807_v0 }
 0xb7d   : > { %5756 = vmatprep.subr.bf16.mxu0 %v6052_v40 }
 0xb80   : > { %5757 = vmatpush3.bf16.msra.mxu0 %v6052_v40 }
 0xb81   : > { %5758 = vmatprep.subr.bf16.mxu0 %v6053_v36 }
 0xb84   : > { %5759 = vmatpush3.bf16.msra.mxu0 %v6053_v36 }
 0xb85   : > { %5760 = vmatprep.subr.bf16.mxu0 %v6054_v45 }
 0xb88   : > { %5761 = vmatpush3.bf16.msra.mxu0 %v6054_v45 }
 0xb89   : > { %5762 = vmatprep.subr.bf16.mxu0 %v6055_v21 }
 0xb8c   : > { %5763 = vmatpush3.bf16.msra.mxu0 %v6055_v21 }
 0xb8d   : > { %5764 = vmatprep.subr.bf16.mxu0 %v6056_v44 }
 0xb90   : > { %5765 = vmatpush3.bf16.msra.mxu0 %v6056_v44 }
 0xb91   : > { %5766 = vmatprep.subr.bf16.mxu0 %v6057_v16 }
 0xb94   : > { %5767 = vmatpush3.bf16.msra.mxu0 %v6057_v16 }
 0xb95   : > { %5768 = vmatprep.subr.bf16.mxu0 %v6058_v14 }
 0xb98   : > { %5769 = vmatpush3.bf16.msra.mxu0 %v6058_v14 }
 0xb9b   : > { %5771 = vmatmul.mubr.bf16.vlgmr.msra.gmra.mxu0 %v6804_v61 }
 0xc3b   : > { %v5752_v50 = vpop.f32.mrf.mxu0 }
 0xc3c   : > { %v7207_v51 = vadd.f32 %v5752_v50, %v7131_v47  ;;  %v5142_v47 = vld [vmem:[%s7916_s4 + $0x4] ss:$0 sm:$0xff] }
 0xc3d   : > { %v2499_v43 = vpop.f32.mrf.mxu0 }
 0xc3e   : > { %v7210_v52 = vadd.f32 %v2499_v43, %v7134_v19 }
 0xc3f   : > { %v5753_v53 = vpop.f32.mrf.mxu0 }
 0xc40   : > { %v7213_v54 = vadd.f32 %v5753_v53, %v7137_v48 }
 0xc41   : > { %v2502_v20 = vpop.f32.mrf.mxu0 }
 0xc42   : > { %v7216_v18 = vadd.f32 %v2502_v20, %v7140_v49 }
 0xc5b   : > { %v5772_v33 = vpop.f32.mrf.mxu0 }
 0xc5c   : > { %v2634_v58 = vadd.f32 %v5772_v33, %v5142_v47 }
 0xc5d   : > { %v2625_v55 = vpop.f32.mrf.mxu0 }
 0xc5e   : > { %v2626_v42 = vadd.f32 %v5142_v47, %v2625_v55 }
 0xc5f   : > { %v5773_v17 = vpop.f32.mrf.mxu0 }
 0xc60   : > { %v2637_v57 = vadd.f32 %v5773_v17, %v5142_v47 }
 0xc61   : > { %v2628_v46 = vpop.f32.mrf.mxu0 }
 0xc62   : > { %v2629_v19 = vadd.f32 %v5142_v47, %v2628_v46  ;;  %v2641_v59 = vpack.c.bf16 %v2637_v57, %v2634_v58  ;;  %v661_v57 = vld [vmem:[%s7918_s6 + $0x58] sm:$0xff]  ;;  %v660_v46 = vld [vmem:[%s7918_s6 + $0x50] sm:$0xff] }
 0xc64   : > { %v2640_v56 = vpack.c.bf16 %v2629_v19, %v2626_v42  ;;  %v6059_v42 = vld [vmem:[%s7919_s7 + $0x20] sm:$0xff]   ;;  %v6060_v19 = vld [vmem:[%s7915_s3 + $0x178] sm:$0xff]  }
 0xc66   : > { %5776 = vmatprep.mubr.msk.bf16.mxu1 %vm1237_vm0, %v2640_v56 }
 0xc67   : > { %5777 = vmatmul.mubr.msk.bf16.vlgmr.msra.gmra.mxu1 %vm1237_vm0, %v2641_v59 }
 0xd27   : > { %v5778_v48 = vpop.f32.mrf.mxu1 }
 0xd28   : > { %v2703_v49 = vsel %vm1293_vm1, %v5778_v48, -inf }
 0xd29   : > { %2704 = vmax.xlane.f32.xlu0 %v2703_v49  ;;  %v2682_v62 = vpop.f32.mrf.mxu1 }
 0xd2a   : > { %v2697_v3 = vsel %vm1293_vm1, %v2682_v62, -inf }
 0xd2b   : > { %2698 = vmax.xlane.f32.xlu1 %v2697_v3  ;;  %v5779_v5 = vpop.f32.mrf.mxu1 }
 0xd2c   : > { %v2706_v39 = vsel %vm1293_vm1, %v5779_v5, -inf }
 0xd2d   : > { %v2685_v37 = vpop.f32.mrf.mxu1 }
 0xd2e   : > { %v2700_v1 = vsel %vm1293_vm1, %v2685_v37, -inf }
 0xd2f   : > { %2707 = vmax.xlane.f32.xlu1 %v2706_v39  ;;  %2701 = vmax.xlane.f32.xlu0 %v2700_v1 }
 0xd40   : > { %809 = vperm.xlu1 %5998, %v675_v41  }
 0xd45   : > { %804 = vperm.xlu0 %5997, %v674_v27  }
 0xdb2   : > { %v2705_v4 = vpop.xlane.xlu0 %2704 }
 0xdb3   : > { %v2711_v15 = vsub.f32 %v5778_v48, %v2705_v4 }
 0xdb4   : > { %v2699_v2 = vpop.xlane.xlu1 %2698 }
 0xdb5   : > { %v2709_v29 = vsub.f32 %v2682_v62, %v2699_v2  ;;  %v2717_v32 = vmul.f32 1.442695, %v2711_v15 }
 0xdb7   : > { %v2713_v60 = vmul.f32 1.442695, %v2709_v29 }
 0xdb8   : > { %v2708_v63 = vpop.xlane.xlu1 %2707  ;;  %v2702_v9 = vpop.xlane.xlu0 %2701 }
 0xdb9   : > { %6239 = vpow2.f32 %v2713_v60  ;;  %v2712_v35 = vsub.f32 %v5779_v5, %v2708_v63  ;;  %v2710_v7 = vsub.f32 %v2685_v37, %v2702_v9 }
 0xdba   : > { %6241 = vpow2.f32 %v2717_v32 }
 0xdbb   : > { %v2719_v38 = vmul.f32 1.442695, %v2712_v35  ;;  %v2715_v40 = vmul.f32 1.442695, %v2710_v7  ;;  %v6061_v35 = vld [vmem:[%s7915_s3 + $0x170] sm:$0xff]   ;;  %v6062_v7 = vld [vmem:[%s7915_s3 + $0x168] sm:$0xff]  }
 0xdbc   : > { %v810_v36 = vpop.permute.xlu1 %809 }
 0xdbd   : > { %6243 = vpow2.f32 %v2719_v38  ;;  %v1072_v21 = vadd.f32 %v6975_v25, %v810_v36  ;;  %v6063_v38 = vld [vmem:[%s7915_s3 + $0x160] sm:$0xff]   ;;  %v6065_v36 = vld [vmem:[%s7915_s3 + $0x150] sm:$0xff]  }
 0xdbe   : > { %6245 = vpow2.f32 %v2715_v40  ;;  %v6064_v40 = vld [vmem:[%s7915_s3 + $0x158] sm:$0xff]  }
 0xdc0   : > { %v805_v45 = vpop.permute.xlu0 %804 }
 0xdc1   : > { %v1069_v44 = vadd.f32 %v6971_v23, %v805_v45  ;;  %v6066_v45 = vld [vmem:[%s7915_s3 + $0x148] sm:$0xff]  }
 0xdc3   : > { %v1111_v16 = vpack.c.bf16 %v1072_v21, %v1069_v44  ;;  %v6067_v21 = vld [vmem:[%s7915_s3 + $0x140] sm:$0xff]  }
 0xdc5   : > { %5910 = vmatprep.subr.msk.bf16.mxu1 %vm1293_vm1, %v1111_v16  ;;  %v2742_v14 = vsel %vm1293_vm1, %v1111_v16, 0 }
 0xdc6   : > { %v6240_v50 = vpop.eup %6239  ;;  %5781 = vmatpush3.bf16.xpose.msra.mxu1 %v2742_v14 }
 0xdc7   : > { %v2721_v43 = vsel %vm1293_vm1, %v6240_v50, 0.0  ;;  %v6242_v53 = vpop.eup %6241  ;;  %5786 = vmatprep.subr.bf16.mxu1 %v6059_v42 }
 0xdc8   : > { %2722 = vadd.xlane.f32.xlu1 %v2721_v43  ;;  %v2727_v47 = vsel %vm1293_vm1, %v6242_v53, 0.0 }
 0xdca   : > { %v6244_v20 = vpop.eup %6243 }
 0xdcb   : > { %v6246_v33 = vpop.eup %6245  ;;  %v2730_v55 = vsel %vm1293_vm1, %v6244_v20, 0.0  ;;  %v2734_v17 = vpack.c.bf16 %v6244_v20, %v6242_v53 }
 0xdcc   : > { %2731 = vadd.xlane.f32.xlu1 %v2730_v55  ;;  %v2724_v25 = vsel %vm1293_vm1, %v6246_v33, 0.0  ;;  %v2733_v23 = vpack.c.bf16 %v6246_v33, %v6240_v50 }
 0xdcd   : > { %2725 = vadd.xlane.f32.xlu0 %v2724_v25 }
 0xdce   : > { %5782 = vmatprep.mubr.msk.bf16.mxu1 %vm1293_vm1, %v2733_v23 }
 0xdcf   : > { %5783 = vmatmul.mubr.msk.bf16.vlgmr.msra.gmra.mxu1 %vm1293_vm1, %v2734_v17 }
 0xdd0   : > { %5787 = vmatpush3.bf16.msra.mxu1 %v6059_v42 }
 0xdd1   : > { %2728 = vadd.xlane.f32.xlu0 %v2727_v47  ;;  %5792 = vmatprep.subr.bf16.mxu1 %v6060_v19 }
 0xddd   : > { %739 = vperm.xlu1 %5998, %v661_v57  }
 0xde7   : > { %734 = vperm.xlu0 %5997, %v660_v46  }
 0xe51   : > { %v2723_v58 = vpop.xlane.xlu1 %2722 }
 0xe52   : > { %6247 = vrcp.f32 %v2723_v58 }
 0xe55   : > { %v2732_v59 = vpop.xlane.xlu1 %2731 }
 0xe56   : > { %v2726_v56 = vpop.xlane.xlu0 %2725  ;;  %6249 = vrcp.f32 %v2732_v59 }
 0xe57   : > { %6251 = vrcp.f32 %v2726_v56 }
 0xe59   : > { %v740_v49 = vpop.permute.xlu1 %739 }
 0xe5a   : > { %v2729_v48 = vpop.xlane.xlu0 %2728  ;;  %v1016_v3 = vadd.f32 %v6945_v8, %v740_v49 }
 0xe5b   : > { %6253 = vrcp.f32 %v2729_v48 }
 0xe5f   : > { %v6248_v41 = vpop.eup %6247 }
 0xe62   : > { %v735_v62 = vpop.permute.xlu0 %734 }
 0xe63   : > { %v1013_v5 = vadd.f32 %v6941_v6, %v735_v62  ;;  %v6250_v4 = vpop.eup %6249 }
 0xe64   : > { %v6252_v15 = vpop.eup %6251 }
 0xe65   : > { %v1104_v37 = vpack.c.bf16 %v1016_v3, %v1013_v5  ;;  %v677_v3 = vld [vmem:[%s7918_s6 + $0xd8] sm:$0xff]  ;;  %v676_v5 = vld [vmem:[%s7918_s6 + $0xd0] sm:$0xff] }
 0xe67   : > { %5812 = vmatprep.subr.bf16.mxu0 %v1104_v37 }
 0xe68   : > { %5813 = vmatpush3.bf16.msra.mxu0 %v1104_v37  ;;  %v6254_v60 = vpop.eup %6253 }
 0xe8f   : > { %v5784_v39 = vpop.f32.mrf.mxu1 }
 0xe90   : > { %v2799_v63 = vmul.f32 %v6254_v60, %v5784_v39 }
 0xe91   : > { %v2778_v1 = vpop.f32.mrf.mxu1 }
 0xe92   : > { %v2797_v32 = vmul.f32 %v6248_v41, %v2778_v1 }
 0xe93   : > { %v5785_v27 = vpop.f32.mrf.mxu1 }
 0xe94   : > { %v2800_v2 = vmul.f32 %v6250_v4, %v5785_v27 }
 0xe95   : > { %v2781_v29 = vpop.f32.mrf.mxu1 }
 0xe96   : > { %v2798_v8 = vmul.f32 %v6252_v15, %v2781_v29  ;;  %v2802_v9 = vpack.c.bf16 %v2800_v2, %v2799_v63 }
 0xe98   : > { %v2801_v6 = vpack.c.bf16 %v2798_v8, %v2797_v32 }
 0xe9a   : > { %5788 = vmatprep.mubr.msk.bf16.mxu1 %vm1237_vm0, %v2801_v6 }
 0xe9b   : > { %5789 = vmatmul.mubr.msk.bf16.vlgmr.msra.gmra.mxu1 %vm1237_vm0, %v2802_v9 }
 0xe9c   : > { %5793 = vmatpush3.bf16.msra.mxu1 %v6060_v19  ;;  %5808 = vmatprep.mubr.bf16.mxu1 %v6807_v0 }
 0xe9d   : > { %5794 = vmatprep.subr.bf16.mxu1 %v6061_v35 }
 0xea0   : > { %5795 = vmatpush3.bf16.msra.mxu1 %v6061_v35 }
 0xea1   : > { %5796 = vmatprep.subr.bf16.mxu1 %v6062_v7 }
 0xea4   : > { %5797 = vmatpush3.bf16.msra.mxu1 %v6062_v7 }
 0xea5   : > { %5798 = vmatprep.subr.bf16.mxu1 %v6063_v38 }
 0xea8   : > { %5799 = vmatpush3.bf16.msra.mxu1 %v6063_v38 }
 0xea9   : > { %5800 = vmatprep.subr.bf16.mxu1 %v6064_v40 }
 0xeac   : > { %5801 = vmatpush3.bf16.msra.mxu1 %v6064_v40 }
 0xead   : > { %5802 = vmatprep.subr.bf16.mxu1 %v6065_v36 }
 0xeb0   : > { %5803 = vmatpush3.bf16.msra.mxu1 %v6065_v36 }
 0xeb1   : > { %5804 = vmatprep.subr.bf16.mxu1 %v6066_v45 }
 0xeb4   : > { %5805 = vmatpush3.bf16.msra.mxu1 %v6066_v45 }
 0xeb5   : > { %5806 = vmatprep.subr.bf16.mxu1 %v6067_v21 }
 0xeb8   : > { %5807 = vmatpush3.bf16.msra.mxu1 %v6067_v21 }
 0xebb   : > { %5809 = vmatmul.mubr.bf16.vlgmr.msra.gmra.mxu1 %v6804_v61 }
 0xf5b   : > { %v5790_v44 = vpop.f32.mrf.mxu1 }
 0xf5c   : > { %v7283_v16 = vadd.f32 %v5790_v44, %v7207_v51  ;;  %v5177_v51 = vld [vmem:[%s7916_s4 + $0x5] ss:$0 sm:$0xff] }
 0xf5d   : > { %v2852_v14 = vpop.f32.mrf.mxu1 }
 0xf5e   : > { %v7286_v50 = vadd.f32 %v2852_v14, %v7210_v52 }
 0xf5f   : > { %v5791_v43 = vpop.f32.mrf.mxu1 }
 0xf60   : > { %v7289_v53 = vadd.f32 %v5791_v43, %v7213_v54 }
 0xf61   : > { %v2855_v20 = vpop.f32.mrf.mxu1 }
 0xf62   : > { %v7292_v33 = vadd.f32 %v2855_v20, %v7216_v18 }
 0xf7b   : > { %v5810_v55 = vpop.f32.mrf.mxu1 }
 0xf7c   : > { %v2987_v46 = vadd.f32 %v5810_v55, %v5177_v51  ;;  %v663_v55 = vld [vmem:[%s7918_s6 + $0x68] sm:$0xff] }
 0xf7d   : > { %v2978_v17 = vpop.f32.mrf.mxu1 }
 0xf7e   : > { %v2979_v57 = vadd.f32 %v5177_v51, %v2978_v17  ;;  %v662_v17 = vld [vmem:[%s7918_s6 + $0x60] sm:$0xff] }
 0xf7f   : > { %v5811_v25 = vpop.f32.mrf.mxu1 }
 0xf80   : > { %v2990_v23 = vadd.f32 %v5811_v25, %v5177_v51  ;;  %v6068_v25 = vld [vmem:[%s7919_s7 + $0x28] sm:$0xff]  }
 0xf81   : > { %v2981_v47 = vpop.f32.mrf.mxu1 }
 0xf82   : > { %v2982_v52 = vadd.f32 %v5177_v51, %v2981_v47  ;;  %v2994_v19 = vpack.c.bf16 %v2990_v23, %v2987_v46  ;;  %v6069_v51 = vld [vmem:[%s7915_s3 + $0x1b8] sm:$0xff]  }
 0xf84   : > { %v2993_v42 = vpack.c.bf16 %v2982_v52, %v2979_v57 }
 0xf86   : > { %5814 = vmatprep.mubr.msk.bf16.mxu0 %vm1237_vm0, %v2993_v42 }
 0xf87   : > { %5815 = vmatmul.mubr.msk.bf16.vlgmr.msra.gmra.mxu0 %vm1237_vm0, %v2994_v19 }
0x1047   : > { %v5816_v54 = vpop.f32.mrf.mxu0 }
0x1048   : > { %v3056_v18 = vsel %vm1293_vm1, %v5816_v54, -inf }
0x1049   : > { %3057 = vmax.xlane.f32.xlu0 %v3056_v18  ;;  %v3035_v58 = vpop.f32.mrf.mxu0 }
0x104a   : > { %v3050_v56 = vsel %vm1293_vm1, %v3035_v58, -inf }
0x104b   : > { %3051 = vmax.xlane.f32.xlu1 %v3050_v56  ;;  %v5817_v59 = vpop.f32.mrf.mxu0 }
0x104c   : > { %v3059_v49 = vsel %vm1293_vm1, %v5817_v59, -inf }
0x104d   : > { %v3038_v48 = vpop.f32.mrf.mxu0 }
0x104e   : > { %v3053_v62 = vsel %vm1293_vm1, %v3038_v48, -inf }
0x104f   : > { %3060 = vmax.xlane.f32.xlu1 %v3059_v49  ;;  %3054 = vmax.xlane.f32.xlu0 %v3053_v62 }
0x1060   : > { %819 = vperm.xlu1 %5998, %v677_v3  }
0x1065   : > { %814 = vperm.xlu0 %5997, %v676_v5  }
0x10d2   : > { %v3058_v37 = vpop.xlane.xlu0 %3057 }
0x10d3   : > { %v3064_v39 = vsub.f32 %v5816_v54, %v3058_v37 }
0x10d4   : > { %v3052_v1 = vpop.xlane.xlu1 %3051 }
0x10d5   : > { %v3062_v41 = vsub.f32 %v3035_v58, %v3052_v1  ;;  %v3070_v4 = vmul.f32 1.442695, %v3064_v39 }
0x10d7   : > { %v3066_v27 = vmul.f32 1.442695, %v3062_v41 }
0x10d8   : > { %v3061_v15 = vpop.xlane.xlu1 %3060  ;;  %v3055_v2 = vpop.xlane.xlu0 %3054 }
0x10d9   : > { %6255 = vpow2.f32 %v3066_v27  ;;  %v3065_v29 = vsub.f32 %v5817_v59, %v3061_v15  ;;  %v3063_v60 = vsub.f32 %v3038_v48, %v3055_v2  ;;  %v6070_v27 = vld [vmem:[%s7915_s3 + $0x1b0] sm:$0xff]   ;;  %v6072_v15 = vld [vmem:[%s7915_s3 + $0x1a0] sm:$0xff]   ;;  %v6073_v2 = vld [vmem:[%s7915_s3 + $0x198] sm:$0xff]  }
0x10da   : > { %6257 = vpow2.f32 %v3070_v4  ;;  %v6071_v4 = vld [vmem:[%s7915_s3 + $0x1a8] sm:$0xff]  }
0x10db   : > { %v3072_v32 = vmul.f32 1.442695, %v3065_v29  ;;  %v3068_v8 = vmul.f32 1.442695, %v3063_v60  ;;  %v6074_v29 = vld [vmem:[%s7915_s3 + $0x190] sm:$0xff]   ;;  %v6075_v60 = vld [vmem:[%s7915_s3 + $0x188] sm:$0xff]  }
0x10dc   : > { %v820_v63 = vpop.permute.xlu1 %819 }
0x10dd   : > { %6259 = vpow2.f32 %v3072_v32  ;;  %v1080_v9 = vadd.f32 %v6973_v24, %v820_v63  ;;  %v6076_v32 = vld [vmem:[%s7915_s3 + $0x180] sm:$0xff]  }
0x10de   : > { %6261 = vpow2.f32 %v3068_v8 }
0x10e0   : > { %v815_v6 = vpop.permute.xlu0 %814 }
0x10e1   : > { %v1077_v35 = vadd.f32 %v6969_v22, %v815_v6 }
0x10e3   : > { %v1112_v7 = vpack.c.bf16 %v1080_v9, %v1077_v35 }
0x10e5   : > { %5911 = vmatprep.subr.msk.bf16.mxu0 %vm1293_vm1, %v1112_v7  ;;  %v3095_v38 = vsel %vm1293_vm1, %v1112_v7, 0 }
0x10e6   : > { %v6256_v40 = vpop.eup %6255  ;;  %5819 = vmatpush3.bf16.xpose.msra.mxu0 %v3095_v38 }
0x10e7   : > { %v3074_v36 = vsel %vm1293_vm1, %v6256_v40, 0.0  ;;  %v6258_v45 = vpop.eup %6257  ;;  %5824 = vmatprep.subr.bf16.mxu0 %v6068_v25 }
0x10e8   : > { %3075 = vadd.xlane.f32.xlu1 %v3074_v36  ;;  %v3080_v20 = vsel %vm1293_vm1, %v6258_v45, 0.0 }
0x10ea   : > { %v6260_v21 = vpop.eup %6259 }
0x10eb   : > { %v6262_v44 = vpop.eup %6261  ;;  %v3083_v14 = vsel %vm1293_vm1, %v6260_v21, 0.0  ;;  %v3087_v43 = vpack.c.bf16 %v6260_v21, %v6258_v45 }
0x10ec   : > { %3084 = vadd.xlane.f32.xlu1 %v3083_v14  ;;  %v3077_v24 = vsel %vm1293_vm1, %v6262_v44, 0.0  ;;  %v3086_v22 = vpack.c.bf16 %v6262_v44, %v6256_v40 }
0x10ed   : > { %3078 = vadd.xlane.f32.xlu0 %v3077_v24 }
0x10ee   : > { %5820 = vmatprep.mubr.msk.bf16.mxu0 %vm1293_vm1, %v3086_v22 }
0x10ef   : > { %5821 = vmatmul.mubr.msk.bf16.vlgmr.msra.gmra.mxu0 %vm1293_vm1, %v3087_v43 }
0x10f0   : > { %5825 = vmatpush3.bf16.msra.mxu0 %v6068_v25 }
0x10f1   : > { %3081 = vadd.xlane.f32.xlu0 %v3080_v20  ;;  %5830 = vmatprep.subr.bf16.mxu0 %v6069_v51 }
0x10fd   : > { %749 = vperm.xlu1 %5998, %v663_v55  }
0x1107   : > { %744 = vperm.xlu0 %5997, %v662_v17  }
0x1171   : > { %v3076_v23 = vpop.xlane.xlu1 %3075 }
0x1172   : > { %6263 = vrcp.f32 %v3076_v23 }
0x1175   : > { %v3085_v57 = vpop.xlane.xlu1 %3084 }
0x1176   : > { %v3079_v47 = vpop.xlane.xlu0 %3078  ;;  %6265 = vrcp.f32 %v3085_v57  ;;  %v679_v57 = vld [vmem:[%s7918_s6 + $0xe8] sm:$0xff] }
0x1177   : > { %6267 = vrcp.f32 %v3079_v47 }
0x1179   : > { %v750_v46 = vpop.permute.xlu1 %749 }
0x117a   : > { %v3082_v52 = vpop.xlane.xlu0 %3081  ;;  %v1024_v19 = vadd.f32 %v6955_v13, %v750_v46 }
0x117b   : > { %6269 = vrcp.f32 %v3082_v52  ;;  %v678_v52 = vld [vmem:[%s7918_s6 + $0xe0] sm:$0xff] }
0x117f   : > { %v6264_v59 = vpop.eup %6263 }
0x1182   : > { %v745_v42 = vpop.permute.xlu0 %744 }
0x1183   : > { %v1021_v54 = vadd.f32 %v6951_v11, %v745_v42  ;;  %v6266_v49 = vpop.eup %6265 }
0x1184   : > { %v6268_v62 = vpop.eup %6267 }
0x1185   : > { %v1105_v18 = vpack.c.bf16 %v1024_v19, %v1021_v54 }
0x1187   : > { %5850 = vmatprep.subr.bf16.mxu1 %v1105_v18 }
0x1188   : > { %5851 = vmatpush3.bf16.msra.mxu1 %v1105_v18  ;;  %v6270_v37 = vpop.eup %6269 }
0x11af   : > { %v5822_v58 = vpop.f32.mrf.mxu0 }
0x11b0   : > { %v3152_v1 = vmul.f32 %v6270_v37, %v5822_v58 }
0x11b1   : > { %v3131_v56 = vpop.f32.mrf.mxu0 }
0x11b2   : > { %v3150_v39 = vmul.f32 %v6264_v59, %v3131_v56 }
0x11b3   : > { %v5823_v48 = vpop.f32.mrf.mxu0 }
0x11b4   : > { %v3153_v3 = vmul.f32 %v6266_v49, %v5823_v48 }
0x11b5   : > { %v3134_v5 = vpop.f32.mrf.mxu0 }
0x11b6   : > { %v3151_v13 = vmul.f32 %v6268_v62, %v3134_v5  ;;  %v3155_v41 = vpack.c.bf16 %v3153_v3, %v3152_v1 }
0x11b8   : > { %v3154_v11 = vpack.c.bf16 %v3151_v13, %v3150_v39 }
0x11ba   : > { %5826 = vmatprep.mubr.msk.bf16.mxu0 %vm1237_vm0, %v3154_v11 }
0x11bb   : > { %5827 = vmatmul.mubr.msk.bf16.vlgmr.msra.gmra.mxu0 %vm1237_vm0, %v3155_v41 }
0x11bc   : > { %5831 = vmatpush3.bf16.msra.mxu0 %v6069_v51  ;;  %5846 = vmatprep.mubr.bf16.mxu0 %v6807_v0 }
0x11bd   : > { %5832 = vmatprep.subr.bf16.mxu0 %v6070_v27 }
0x11c0   : > { %5833 = vmatpush3.bf16.msra.mxu0 %v6070_v27 }
0x11c1   : > { %5834 = vmatprep.subr.bf16.mxu0 %v6071_v4 }
0x11c4   : > { %5835 = vmatpush3.bf16.msra.mxu0 %v6071_v4 }
0x11c5   : > { %5836 = vmatprep.subr.bf16.mxu0 %v6072_v15 }
0x11c8   : > { %5837 = vmatpush3.bf16.msra.mxu0 %v6072_v15 }
0x11c9   : > { %5838 = vmatprep.subr.bf16.mxu0 %v6073_v2 }
0x11cc   : > { %5839 = vmatpush3.bf16.msra.mxu0 %v6073_v2 }
0x11cd   : > { %5840 = vmatprep.subr.bf16.mxu0 %v6074_v29 }
0x11d0   : > { %5841 = vmatpush3.bf16.msra.mxu0 %v6074_v29 }
0x11d1   : > { %5842 = vmatprep.subr.bf16.mxu0 %v6075_v60 }
0x11d4   : > { %5843 = vmatpush3.bf16.msra.mxu0 %v6075_v60 }
0x11d5   : > { %5844 = vmatprep.subr.bf16.mxu0 %v6076_v32 }
0x11d8   : > { %5845 = vmatpush3.bf16.msra.mxu0 %v6076_v32 }
0x11db   : > { %5847 = vmatmul.mubr.bf16.vlgmr.msra.gmra.mxu0 %v6804_v61 }
0x127b   : > { %v5828_v8 = vpop.f32.mrf.mxu0 }
0x127c   : > { %v7359_v63 = vadd.f32 %v5828_v8, %v7283_v16  ;;  %v5212_v16 = vld [vmem:[%s7916_s4 + $0x6] ss:$0 sm:$0xff]  ;;  %v665_v8 = vld [vmem:[%s7918_s6 + $0x78] sm:$0xff] }
0x127d   : > { %v3205_v6 = vpop.f32.mrf.mxu0 }
0x127e   : > { %v7362_v9 = vadd.f32 %v3205_v6, %v7286_v50  ;;  %v664_v6 = vld [vmem:[%s7918_s6 + $0x70] sm:$0xff] }
0x127f   : > { %v5829_v35 = vpop.f32.mrf.mxu0 }
0x1280   : > { %v7365_v7 = vadd.f32 %v5829_v35, %v7289_v53  ;;  %v6077_v35 = vld [vmem:[%s7919_s7 + $0x30] sm:$0xff]  }
0x1281   : > { %v3208_v38 = vpop.f32.mrf.mxu0 }
0x1282   : > { %v7368_v40 = vadd.f32 %v3208_v38, %v7292_v33  ;;  %v6078_v38 = vld [vmem:[%s7915_s3 + $0x1f8] sm:$0xff]  }
0x129b   : > { %v5848_v36 = vpop.f32.mrf.mxu0 }
0x129c   : > { %v3340_v24 = vadd.f32 %v5848_v36, %v5212_v16 }
0x129d   : > { %v3331_v45 = vpop.f32.mrf.mxu0 }
0x129e   : > { %v3332_v43 = vadd.f32 %v5212_v16, %v3331_v45 }
0x129f   : > { %v5849_v21 = vpop.f32.mrf.mxu0 }
0x12a0   : > { %v3343_v44 = vadd.f32 %v5849_v21, %v5212_v16 }
0x12a1   : > { %v3334_v14 = vpop.f32.mrf.mxu0 }
0x12a2   : > { %v3335_v50 = vadd.f32 %v5212_v16, %v3334_v14  ;;  %v3347_v20 = vpack.c.bf16 %v3343_v44, %v3340_v24 }
0x12a4   : > { %v3346_v22 = vpack.c.bf16 %v3335_v50, %v3332_v43 }
0x12a6   : > { %5852 = vmatprep.mubr.msk.bf16.mxu1 %vm1237_vm0, %v3346_v22 }
0x12a7   : > { %5853 = vmatmul.mubr.msk.bf16.vlgmr.msra.gmra.mxu1 %vm1237_vm0, %v3347_v20 }
0x1367   : > { %v5854_v53 = vpop.f32.mrf.mxu1 }
0x1368   : > { %v3409_v33 = vsel %vm1293_vm1, %v5854_v53, -inf }
0x1369   : > { %3410 = vmax.xlane.f32.xlu0 %v3409_v33  ;;  %v3388_v55 = vpop.f32.mrf.mxu1 }
0x136a   : > { %v3403_v17 = vsel %vm1293_vm1, %v3388_v55, -inf }
0x136b   : > { %3404 = vmax.xlane.f32.xlu1 %v3403_v17  ;;  %v5855_v25 = vpop.f32.mrf.mxu1 }
0x136c   : > { %v3412_v23 = vsel %vm1293_vm1, %v5855_v25, -inf }
0x136d   : > { %v3391_v51 = vpop.f32.mrf.mxu1 }
0x136e   : > { %v3406_v47 = vsel %vm1293_vm1, %v3391_v51, -inf }
0x136f   : > { %3413 = vmax.xlane.f32.xlu1 %v3412_v23  ;;  %3407 = vmax.xlane.f32.xlu0 %v3406_v47 }
0x1380   : > { %829 = vperm.xlu1 %5998, %v679_v57  }
0x1385   : > { %824 = vperm.xlu0 %5997, %v678_v52  }
0x13f2   : > { %v3411_v46 = vpop.xlane.xlu0 %3410 }
0x13f3   : > { %v3417_v42 = vsub.f32 %v5854_v53, %v3411_v46  ;;  %v6079_v46 = vld [vmem:[%s7915_s3 + $0x1f0] sm:$0xff]  }
0x13f4   : > { %v3405_v19 = vpop.xlane.xlu1 %3404 }
0x13f5   : > { %v3415_v54 = vsub.f32 %v3388_v55, %v3405_v19  ;;  %v3423_v58 = vmul.f32 1.442695, %v3417_v42  ;;  %v6080_v42 = vld [vmem:[%s7915_s3 + $0x1e8] sm:$0xff]   ;;  %v6081_v19 = vld [vmem:[%s7915_s3 + $0x1e0] sm:$0xff]  }
0x13f7   : > { %v3419_v18 = vmul.f32 1.442695, %v3415_v54  ;;  %v6082_v54 = vld [vmem:[%s7915_s3 + $0x1d8] sm:$0xff]  }
0x13f8   : > { %v3414_v56 = vpop.xlane.xlu1 %3413  ;;  %v3408_v59 = vpop.xlane.xlu0 %3407 }
0x13f9   : > { %6271 = vpow2.f32 %v3419_v18  ;;  %v3418_v48 = vsub.f32 %v5855_v25, %v3414_v56  ;;  %v3416_v49 = vsub.f32 %v3391_v51, %v3408_v59  ;;  %v6084_v18 = vld [vmem:[%s7915_s3 + $0x1c8] sm:$0xff]  }
0x13fa   : > { %6273 = vpow2.f32 %v3423_v58  ;;  %v6085_v58 = vld [vmem:[%s7915_s3 + $0x1c0] sm:$0xff]  }
0x13fb   : > { %v3425_v62 = vmul.f32 1.442695, %v3418_v48  ;;  %v3421_v3 = vmul.f32 1.442695, %v3416_v49 }
0x13fc   : > { %v830_v5 = vpop.permute.xlu1 %829 }
0x13fd   : > { %6275 = vpow2.f32 %v3425_v62  ;;  %v1088_v39 = vadd.f32 %v6983_v34, %v830_v5 }
0x13fe   : > { %6277 = vpow2.f32 %v3421_v3 }
0x1400   : > { %v825_v37 = vpop.permute.xlu0 %824 }
0x1401   : > { %v1085_v13 = vadd.f32 %v6979_v28, %v825_v37 }
0x1403   : > { %v1113_v1 = vpack.c.bf16 %v1088_v39, %v1085_v13 }
0x1405   : > { %5912 = vmatprep.subr.msk.bf16.mxu1 %vm1293_vm1, %v1113_v1  ;;  %v3448_v11 = vsel %vm1293_vm1, %v1113_v1, 0 }
0x1406   : > { %v6272_v41 = vpop.eup %6271  ;;  %5857 = vmatpush3.bf16.xpose.msra.mxu1 %v3448_v11 }
0x1407   : > { %v3427_v27 = vsel %vm1293_vm1, %v6272_v41, 0.0  ;;  %v6274_v4 = vpop.eup %6273  ;;  %5862 = vmatprep.subr.bf16.mxu1 %v6077_v35 }
0x1408   : > { %3428 = vadd.xlane.f32.xlu1 %v3427_v27  ;;  %v3433_v32 = vsel %vm1293_vm1, %v6274_v4, 0.0 }
0x140a   : > { %v6276_v15 = vpop.eup %6275 }
0x140b   : > { %v6278_v2 = vpop.eup %6277  ;;  %v3436_v29 = vsel %vm1293_vm1, %v6276_v15, 0.0  ;;  %v3440_v60 = vpack.c.bf16 %v6276_v15, %v6274_v4 }
0x140c   : > { %3437 = vadd.xlane.f32.xlu1 %v3436_v29  ;;  %v3430_v34 = vsel %vm1293_vm1, %v6278_v2, 0.0  ;;  %v3439_v28 = vpack.c.bf16 %v6278_v2, %v6272_v41 }
0x140d   : > { %3431 = vadd.xlane.f32.xlu0 %v3430_v34 }
0x140e   : > { %5858 = vmatprep.mubr.msk.bf16.mxu1 %vm1293_vm1, %v3439_v28 }
0x140f   : > { %5859 = vmatmul.mubr.msk.bf16.vlgmr.msra.gmra.mxu1 %vm1293_vm1, %v3440_v60 }
0x1410   : > { %5863 = vmatpush3.bf16.msra.mxu1 %v6077_v35 }
0x1411   : > { %3434 = vadd.xlane.f32.xlu0 %v3433_v32  ;;  %5868 = vmatprep.subr.bf16.mxu1 %v6078_v38 }
0x141d   : > { %759 = vperm.xlu1 %5998, %v665_v8   ;;  %v681_v8 = vld [vmem:[%s7918_s6 + $0xf8] sm:$0xff] }
0x1427   : > { %754 = vperm.xlu0 %5997, %v664_v6   ;;  %v680_v6 = vld [vmem:[%s7918_s6 + $0xf0] sm:$0xff] }
0x1491   : > { %v3429_v36 = vpop.xlane.xlu1 %3428 }
0x1492   : > { %6279 = vrcp.f32 %v3429_v36 }
0x1495   : > { %v3438_v21 = vpop.xlane.xlu1 %3437 }
0x1496   : > { %v3432_v45 = vpop.xlane.xlu0 %3431  ;;  %6281 = vrcp.f32 %v3438_v21 }
0x1497   : > { %6283 = vrcp.f32 %v3432_v45 }
0x1499   : > { %v760_v44 = vpop.permute.xlu1 %759 }
0x149a   : > { %v3435_v16 = vpop.xlane.xlu0 %3434  ;;  %v1032_v43 = vadd.f32 %v6953_v12, %v760_v44 }
0x149b   : > { %6285 = vrcp.f32 %v3435_v16 }
0x149f   : > { %v6280_v53 = vpop.eup %6279 }
0x14a2   : > { %v755_v14 = vpop.permute.xlu0 %754 }
0x14a3   : > { %v1029_v50 = vadd.f32 %v6949_v10, %v755_v14  ;;  %v6282_v55 = vpop.eup %6281 }
0x14a4   : > { %v6284_v17 = vpop.eup %6283 }
0x14a5   : > { %v1106_v24 = vpack.c.bf16 %v1032_v43, %v1029_v50 }
0x14a7   : > { %5888 = vmatprep.subr.bf16.mxu0 %v1106_v24 }
0x14a8   : > { %5889 = vmatpush3.bf16.msra.mxu0 %v1106_v24  ;;  %v6286_v23 = vpop.eup %6285 }
0x14cf   : > { %v5860_v22 = vpop.f32.mrf.mxu1 }
0x14d0   : > { %v3505_v57 = vmul.f32 %v6286_v23, %v5860_v22 }
0x14d1   : > { %v3484_v20 = vpop.f32.mrf.mxu1 }
0x14d2   : > { %v3503_v47 = vmul.f32 %v6280_v53, %v3484_v20 }
0x14d3   : > { %v5861_v33 = vpop.f32.mrf.mxu1 }
0x14d4   : > { %v3506_v25 = vmul.f32 %v6282_v55, %v5861_v33 }
0x14d5   : > { %v3487_v51 = vpop.f32.mrf.mxu1 }
0x14d6   : > { %v3504_v12 = vmul.f32 %v6284_v17, %v3487_v51  ;;  %v3508_v52 = vpack.c.bf16 %v3506_v25, %v3505_v57 }
0x14d8   : > { %v3507_v10 = vpack.c.bf16 %v3504_v12, %v3503_v47 }
0x14da   : > { %5864 = vmatprep.mubr.msk.bf16.mxu1 %vm1237_vm0, %v3507_v10 }
0x14db   : > { %5865 = vmatmul.mubr.msk.bf16.vlgmr.msra.gmra.mxu1 %vm1237_vm0, %v3508_v52 }
0x14dc   : > { %5869 = vmatpush3.bf16.msra.mxu1 %v6078_v38  ;;  %5884 = vmatprep.mubr.bf16.mxu1 %v6807_v0  ;;  %v6083_v0 = vld [vmem:[%s7915_s3 + $0x1d0] sm:$0xff]  }
0x14dd   : > { %5870 = vmatprep.subr.bf16.mxu1 %v6079_v46 }
0x14e0   : > { %5871 = vmatpush3.bf16.msra.mxu1 %v6079_v46 }
0x14e1   : > { %5872 = vmatprep.subr.bf16.mxu1 %v6080_v42 }
0x14e4   : > { %5873 = vmatpush3.bf16.msra.mxu1 %v6080_v42  ;;  %v6086_v42 = vld [vmem:[%s7919_s7 + $0x38] sm:$0xff]  }
0x14e5   : > { %5874 = vmatprep.subr.bf16.mxu1 %v6081_v19 }
0x14e8   : > { %5875 = vmatpush3.bf16.msra.mxu1 %v6081_v19 }
0x14e9   : > { %5876 = vmatprep.subr.bf16.mxu1 %v6082_v54 }
0x14ec   : > { %5877 = vmatpush3.bf16.msra.mxu1 %v6082_v54 }
0x14ed   : > { %5878 = vmatprep.subr.bf16.mxu1 %v6083_v0 }
0x14f0   : > { %5879 = vmatpush3.bf16.msra.mxu1 %v6083_v0 }
0x14f1   : > { %5880 = vmatprep.subr.bf16.mxu1 %v6084_v18 }
0x14f4   : > { %5881 = vmatpush3.bf16.msra.mxu1 %v6084_v18 }
0x14f5   : > { %5882 = vmatprep.subr.bf16.mxu1 %v6085_v58 }
0x14f8   : > { %5883 = vmatpush3.bf16.msra.mxu1 %v6085_v58 }
0x14fb   : > { %5885 = vmatmul.mubr.bf16.vlgmr.msra.gmra.mxu1 %v6804_v61 }
0x14fc   : > { %4312 = vmatprep.mubr.bf16.mxu1 %v6529_v31 }
0x159b   : > { %v5866_v56 = vpop.f32.mrf.mxu1 }
0x159c   : > { %v7436_v59 = vadd.f32 %v5866_v56, %v7359_v63  ;;  %v5247_v63 = vld [vmem:[%s7916_s4 + $0x7] ss:$0 sm:$0xff] }
0x159d   : > { %v3558_v48 = vpop.f32.mrf.mxu1 }
0x159e   : > { %v7439_v49 = vadd.f32 %v3558_v48, %v7362_v9 }
0x159f   : > { %v5867_v62 = vpop.f32.mrf.mxu1 }
0x15a0   : > { %v7442_v3 = vadd.f32 %v5867_v62, %v7365_v7 }
0x15a1   : > { %v3561_v5 = vpop.f32.mrf.mxu1 }
0x15a2   : > { %v7445_v37 = vadd.f32 %v3561_v5, %v7368_v40 }
0x15bb   : > { %v5886_v39 = vpop.f32.mrf.mxu1 }
0x15bc   : > { %v3693_v27 = vadd.f32 %v5886_v39, %v5247_v63 }
0x15bd   : > { %v3684_v61 = vpop.f32.mrf.mxu1 }
0x15be   : > { %v3685_v41 = vadd.f32 %v5247_v63, %v3684_v61 }
0x15bf   : > { %v5887_v13 = vpop.f32.mrf.mxu1 }
0x15c0   : > { %v3696_v1 = vadd.f32 %v5887_v13, %v5247_v63 }
0x15c1   : > { %v3687_v11 = vpop.f32.mrf.mxu1 }
0x15c2   : > { %v3688_v9 = vadd.f32 %v5247_v63, %v3687_v11  ;;  %v3700_v15 = vpack.c.bf16 %v3696_v1, %v3693_v27 }
0x15c4   : > { %v3699_v4 = vpack.c.bf16 %v3688_v9, %v3685_v41 }
0x15c6   : > { %5890 = vmatprep.mubr.msk.bf16.mxu0 %vm1237_vm0, %v3699_v4 }
0x15c7   : > { %5891 = vmatmul.mubr.msk.bf16.vlgmr.msra.gmra.mxu0 %vm1237_vm0, %v3700_v15 }
0x1687   : > { %v5892_v7 = vpop.f32.mrf.mxu0 }
0x1688   : > { %v3762_v40 = vsel %vm1293_vm1, %v5892_v7, -inf }
0x1689   : > { %3763 = vmax.xlane.f32.xlu0 %v3762_v40  ;;  %v3741_v2 = vpop.f32.mrf.mxu0 }
0x168a   : > { %v3756_v29 = vsel %vm1293_vm1, %v3741_v2, -inf }
0x168b   : > { %3757 = vmax.xlane.f32.xlu1 %v3756_v29  ;;  %v5893_v60 = vpop.f32.mrf.mxu0  ;;  %v6343_v29 = vld [vmem:[%s6734_s29] sm:$0xff] }
0x168c   : > { %v3765_v28 = vsel %vm1293_vm1, %v5893_v60, -inf }
0x168d   : > { %v3744_v34 = vpop.f32.mrf.mxu0 }
0x168e   : > { %v3759_v32 = vsel %vm1293_vm1, %v3744_v34, -inf }
0x168f   : > { %3766 = vmax.xlane.f32.xlu1 %v3765_v28  ;;  %3760 = vmax.xlane.f32.xlu0 %v3759_v32  ;;  %v5265_v28 = vld [vmem:[%s7920_s8] ss:$0 sm:$0xff]  ;;  %v6344_v32 = vld [vmem:[%s6734_s29 + $0x10] sm:$0xff] }
0x16a0   : > { %839 = vperm.xlu1 %5998, %v681_v8  }
0x16a5   : > { %834 = vperm.xlu0 %5997, %v680_v6  }
0x1712   : > { %v3764_v35 = vpop.xlane.xlu0 %3763 }
0x1713   : > { %v3770_v38 = vsub.f32 %v5892_v7, %v3764_v35 }
0x1714   : > { %v3758_v36 = vpop.xlane.xlu1 %3757 }
0x1715   : > { %v3768_v45 = vsub.f32 %v3741_v2, %v3758_v36  ;;  %v3776_v16 = vmul.f32 1.442695, %v3770_v38  ;;  %v6345_v36 = vld [vmem:[%s6734_s29 + $0x8] sm:$0xff] }
0x1717   : > { %v3772_v21 = vmul.f32 1.442695, %v3768_v45 }
0x1718   : > { %v3767_v44 = vpop.xlane.xlu1 %3766  ;;  %v3761_v14 = vpop.xlane.xlu0 %3760 }
0x1719   : > { %6287 = vpow2.f32 %v3772_v21  ;;  %v3771_v43 = vsub.f32 %v5893_v60, %v3767_v44  ;;  %v3769_v50 = vsub.f32 %v3744_v34, %v3761_v14  ;;  %v6090_v14 = vld [vmem:[%s7923_s11 + $0xe8] ss:$16 sps:$4 sm:$0xff]  }
0x171a   : > { %6289 = vpow2.f32 %v3776_v16 }
0x171b   : > { %v3778_v24 = vmul.f32 1.442695, %v3771_v43  ;;  %v3774_v22 = vmul.f32 1.442695, %v3769_v50  ;;  %v6092_v43 = vld [vmem:[%s7923_s11 + $0xec] ss:$16 sps:$4 sm:$0xff]  }
0x171c   : > { %v840_v20 = vpop.permute.xlu1 %839  ;;  %4280 = vmatprep.subr.bf16.mxu1 %v6092_v43  ;;  %v5266_v43 = vld [vmem:[#allocation2] ss:$0 sm:$0xff] }
0x171d   : > { %6291 = vpow2.f32 %v3778_v24  ;;  %v1096_v33 = vadd.f32 %v6981_v30, %v840_v20  ;;  %4281 = vmatpush1.bf16.msra.mxu1 %v6090_v14 }
0x171e   : > { %6293 = vpow2.f32 %v3774_v22 }
0x1720   : > { %v835_v53 = vpop.permute.xlu0 %834 }
0x1721   : > { %v1093_v55 = vadd.f32 %v6977_v26, %v835_v53 }
0x1723   : > { %v1114_v17 = vpack.c.bf16 %v1096_v33, %v1093_v55 }
0x1725   : > { %5913 = vmatprep.subr.msk.bf16.mxu0 %vm1293_vm1, %v1114_v17  ;;  %v3801_v25 = vsel %vm1293_vm1, %v1114_v17, 0 }
0x1726   : > { %v6288_v51 = vpop.eup %6287  ;;  %5895 = vmatpush3.bf16.xpose.msra.mxu0 %v3801_v25 }
0x1727   : > { %v3780_v23 = vsel %vm1293_vm1, %v6288_v51, 0.0  ;;  %v6290_v47 = vpop.eup %6289  ;;  %5900 = vmatprep.subr.bf16.mxu0 %v6086_v42 }
0x1728   : > { %3781 = vadd.xlane.f32.xlu1 %v3780_v23  ;;  %v3786_v46 = vsel %vm1293_vm1, %v6290_v47, 0.0 }
0x172a   : > { %v6292_v12 = vpop.eup %6291 }
0x172b   : > { %v6294_v57 = vpop.eup %6293  ;;  %v3789_v10 = vsel %vm1293_vm1, %v6292_v12, 0.0  ;;  %v3793_v52 = vpack.c.bf16 %v6292_v12, %v6290_v47 }
0x172c   : > { %3790 = vadd.xlane.f32.xlu1 %v3789_v10  ;;  %v3783_v30 = vsel %vm1293_vm1, %v6294_v57, 0.0  ;;  %v3792_v26 = vpack.c.bf16 %v6294_v57, %v6288_v51 }
0x172d   : > { %3784 = vadd.xlane.f32.xlu0 %v3783_v30  ;;  %v6095_v30 = vld [vmem:[%s7923_s11 + $0xc4] ss:$16 sps:$4 sm:$0xff]  }
0x172e   : > { %5896 = vmatprep.mubr.msk.bf16.mxu0 %vm1293_vm1, %v3792_v26  ;;  %v6098_v26 = vld [vmem:[%s7923_s11 + $0xcc] ss:$16 sps:$4 sm:$0xff]  }
0x172f   : > { %5897 = vmatmul.mubr.msk.bf16.vlgmr.msra.gmra.mxu0 %vm1293_vm1, %v3793_v52  ;;  %4282 = vmatprep.subr.bf16.mxu1 %v6098_v26 }
0x1730   : > { %5901 = vmatpush3.bf16.msra.mxu0 %v6086_v42  ;;  %v6096_v42 = vld [vmem:[%s7923_s11 + $0xc8] ss:$16 sps:$4 sm:$0xff]  }
0x1731   : > { %3787 = vadd.xlane.f32.xlu0 %v3786_v46  ;;  %v6093_v46 = vld [vmem:[%s7923_s11 + $0xc0] ss:$16 sps:$4 sm:$0xff]   ;;  %4283 = vmatpush1.bf16.msra.mxu1 %v6096_v42  ;;  %v6137_v42 = vld [vmem:[%s7925_s13 + $0x38] sm:$0xff]  }
0x17b1   : > { %v3782_v19 = vpop.xlane.xlu1 %3781 }
0x17b2   : > { %6295 = vrcp.f32 %v3782_v19  ;;  %v6101_v19 = vld [vmem:[%s7923_s11 + $0xa4] ss:$16 sps:$4 sm:$0xff]  }
0x17b5   : > { %v3791_v0 = vpop.xlane.xlu1 %3790 }
0x17b6   : > { %v3785_v54 = vpop.xlane.xlu0 %3784  ;;  %6297 = vrcp.f32 %v3791_v0  ;;  %v6099_v0 = vld [vmem:[%s7923_s11 + $0xa0] ss:$16 sps:$4 sm:$0xff]  }
0x17b7   : > { %6299 = vrcp.f32 %v3785_v54  ;;  %v6104_v54 = vld [vmem:[%s7923_s11 + $0xac] ss:$16 sps:$4 sm:$0xff]  }
0x17b8   : > { %4284 = vmatprep.subr.bf16.mxu1 %v6104_v54  ;;  %v6140_v54 = vld [vmem:[%s7925_s13 + $0xf0] sm:$0xff]  }
0x17ba   : > { %v3788_v18 = vpop.xlane.xlu0 %3787 }
0x17bb   : > { %6301 = vrcp.f32 %v3788_v18  ;;  %v6102_v18 = vld [vmem:[%s7923_s11 + $0xa8] ss:$16 sps:$4 sm:$0xff]  }
0x17bc   : > { %4285 = vmatpush1.bf16.msra.mxu1 %v6102_v18  ;;  %v6142_v18 = vld [vmem:[%s7925_s13 + $0xb0] sm:$0xff]  }
0x17bf   : > { %v6296_v48 = vpop.eup %6295 }
0x17c3   : > { %v6298_v5 = vpop.eup %6297 }
0x17c4   : > { %v6300_v39 = vpop.eup %6299 }
0x17c8   : > { %v6302_v63 = vpop.eup %6301 }
0x17ef   : > { %v5898_v58 = vpop.f32.mrf.mxu0 }
0x17f0   : > { %v3858_v41 = vmul.f32 %v6302_v63, %v5898_v58  ;;  %v6107_v58 = vld [vmem:[%s7923_s11 + $0x84] ss:$16 sps:$4 sm:$0xff]  }
0x17f1   : > { %v3837_v56 = vpop.f32.mrf.mxu0  ;;  %v6119_v63 = vld [vmem:[%s7923_s11 + $0x44] ss:$16 sps:$4 sm:$0xff]  }
0x17f2   : > { %v3856_v1 = vmul.f32 %v6296_v48, %v3837_v56  ;;  %v6110_v56 = vld [vmem:[%s7923_s11 + $0x8c] ss:$16 sps:$4 sm:$0xff]   ;;  %v6105_v48 = vld [vmem:[%s7923_s11 + $0x80] ss:$16 sps:$4 sm:$0xff]  }
0x17f3   : > { %v5899_v62 = vpop.f32.mrf.mxu0  ;;  %4286 = vmatprep.subr.bf16.mxu1 %v6110_v56  ;;  %v6144_v56 = vld [vmem:[%s7925_s13 + $0xe8] sm:$0xff]  }
0x17f4   : > { %v3859_v61 = vmul.f32 %v6298_v5, %v5899_v62  ;;  %v6108_v62 = vld [vmem:[%s7923_s11 + $0x88] ss:$16 sps:$4 sm:$0xff]   ;;  %v6111_v5 = vld [vmem:[%s7923_s11 + $0x60] ss:$16 sps:$4 sm:$0xff]  }
0x17f5   : > { %v3840_v13 = vpop.f32.mrf.mxu0  ;;  %4287 = vmatpush1.bf16.msra.mxu1 %v6108_v62  ;;  %v6146_v62 = vld [vmem:[%s7925_s13 + $0xa8] sm:$0xff]  }
0x17f6   : > { %v3857_v11 = vmul.f32 %v6300_v39, %v3840_v13  ;;  %v3861_v27 = vpack.c.bf16 %v3859_v61, %v3858_v41  ;;  %v6113_v39 = vld [vmem:[%s7923_s11 + $0x64] ss:$16 sps:$4 sm:$0xff]   ;;  %v6114_v61 = vld [vmem:[%s7923_s11 + $0x68] ss:$16 sps:$4 sm:$0xff]   ;;  %v6116_v13 = vld [vmem:[%s7923_s11 + $0x6c] ss:$16 sps:$4 sm:$0xff]  }
0x17f7   : > { %4288 = vmatprep.subr.bf16.mxu1 %v6116_v13  ;;  %v6120_v41 = vld [vmem:[%s7923_s11 + $0x48] ss:$16 sps:$4 sm:$0xff]   ;;  %v6150_v13 = vld [vmem:[%s7925_s13 + $0xa0] sm:$0xff]  }
0x17f8   : > { %v3860_v9 = vpack.c.bf16 %v3857_v11, %v3856_v1  ;;  %v6122_v1 = vld [vmem:[%s7923_s11 + $0x4c] ss:$16 sps:$4 sm:$0xff]   ;;  %v6117_v11 = vld [vmem:[%s7923_s11 + $0x40] ss:$16 sps:$4 sm:$0xff]  }
0x17f9   : > { %4289 = vmatpush1.bf16.msra.mxu1 %v6114_v61  ;;  %v6149_v61 = vld [vmem:[%s7925_s13 + $0x20] sm:$0xff]  }
0x17fa   : > { %5902 = vmatprep.mubr.msk.bf16.mxu0 %vm1237_vm0, %v3860_v9  ;;  %4290 = vmatprep.subr.bf16.mxu1 %v6122_v1  ;;  %v6125_v9 = vld [vmem:[%s7923_s11 + $0x24] ss:$16 sps:$4 sm:$0xff]   ;;  %v6152_v1 = vld [vmem:[%s7925_s13 + $0xd8] sm:$0xff]  }
0x17fb   : > { %5903 = vmatmul.mubr.msk.bf16.vlgmr.msra.gmra.mxu0 %vm1237_vm0, %v3861_v27  ;;  %v6128_v27 = vld [vmem:[%s7923_s11 + $0x2c] ss:$16 sps:$4 sm:$0xff]  }
0x17fc   : > { %4259 = vmatprep.mubr.bf16.mxu0 %v6529_v31 }
0x17fd   : > { %4291 = vmatpush1.bf16.msra.mxu1 %v6120_v41  ;;  %v6154_v41 = vld [vmem:[%s7925_s13 + $0x98] sm:$0xff]  }
0x17fe   : > { %4292 = vmatprep.subr.bf16.mxu1 %v6128_v27  ;;  %v6156_v27 = vld [vmem:[%s7925_s13 + $0xd0] sm:$0xff]  }
0x18bb   : > { %v5904_v4 = vpop.f32.mrf.mxu0 }
0x18bc   : > { %v3928_v7 = vadd.f32 %v5904_v4, %v7436_v59  ;;  %v6123_v4 = vld [vmem:[%s7923_s11 + $0x20] ss:$16 sps:$4 sm:$0xff]  }
0x18bd   : > { %v3911_v15 = vpop.f32.mrf.mxu0 }
0x18be   : > { %v3926_v40 = vadd.f32 %v3911_v15, %v7439_v49  ;;  %v3932_v8 = vadd.f32 %v6344_v32, %v3928_v7  ;;  %v6346_v49 = vld [vmem:[%s6734_s29 + $0x18] sm:$0xff]  ;;  %v6131_v7 = vld [vmem:[%s7923_s11 + $0x4] ss:$16 sps:$4 sm:$0xff]   ;;  %s536_s29 = sand.u32 1, %s6515_s19  }
0x18bf   : > { %v5905_v2 = vpop.f32.mrf.mxu0  ;;  %v6126_v15 = vld [vmem:[%s7923_s11 + $0x28] ss:$16 sps:$4 sm:$0xff]   ;;  %s4983_s20 = sshll.u32 %s536_s29, 5  ;;  %s7872_s16 = scalar_lea.sflag [#allocation4], %s536_s29 }
0x18c0   : > { %v3930_v60 = vadd.f32 %v6343_v29, %v3926_v40  ;;  %v3929_v6 = vadd.f32 %v5905_v2, %v7442_v3  ;;  %v7492_v21 = vadd.f32 %v5265_v28, %v3932_v8  ;;  %v6087_v3 = vld [vmem:[%s7923_s11 + $0xe0] ss:$16 sps:$4 sm:$0xff]   ;;  %v6134_v40 = vld [vmem:[%s7923_s11 + $0xc] ss:$16 sps:$4 sm:$0xff]   ;;  %4293 = vmatpush1.bf16.msra.mxu1 %v6126_v15  ;;  %v6132_v29 = vld [vmem:[%s7923_s11 + $0x8] ss:$16 sps:$4 sm:$0xff]  }
0x18c1   : > { %v3914_v34 = vpop.f32.mrf.mxu0  ;;  %v6129_v2 = vld [vmem:[%s7923_s11] ss:$16 sps:$4 sm:$0xff]   ;;  %4294 = vmatprep.subr.bf16.mxu1 %v6134_v40  ;;  %v6160_v40 = vld [vmem:[%s7925_s13 + $0xc8] sm:$0xff]   ;;  %s538_s30 = scalar_lea.vmem [#allocation10], %s4983_s20 }
0x18c2   : > { %v3927_v35 = vadd.f32 %v3914_v34, %v7445_v37  ;;  %v7487_v38 = vadd.f32 %v5265_v28, %v3930_v60  ;;  %v3933_v45 = vadd.f32 %v6346_v49, %v3929_v6  ;;  %v6089_v37 = vld [vmem:[%s7923_s11 + $0xe4] ss:$16 sps:$4 sm:$0xff]   ;;  %s4868_s26 = sshll.u32 %s538_s30, 4  ;;  %s7862_s26 = int_to_ptr.vmem [resolvable:$true] %s4868_s26 }
0x18c3   : > { %4227 = vmatprep.subr.bf16.mxu0 %v6089_v37  ;;  %v6158_v15 = vld [vmem:[%s7925_s13 + $0x90] sm:$0xff]   ;;  %s6451_s23 = scalar_lea.vmem %s7862_s26, 512  ;;  %p6458_p2 = scmp.lt.s32.totalorder %s7862_s26, %s6456_s0 }
0x18c4   : > { %v3931_v59 = vadd.f32 %v6345_v36, %v3927_v35  ;;  %3947 = vadd.xlane.f32.xlu0 %v7487_v38  ;;  %v7498_v44 = vadd.f32 %v5265_v28, %v3933_v45  ;;  %4228 = vmatpush1.bf16.msra.mxu0 %v6087_v3  ;;  %p6452_p11 = scmp.ne.s32.totalorder %s7862_s26, %s6451_s23  ;;  %p6459_p9 = scmp.lt.s32.totalorder %s6457_s24, %s6451_s23 }
0x18c5   : > { %4229 = vmatprep.subr.bf16.mxu0 %v6095_v30  ;;  %4295 = vmatpush1.bf16.msra.mxu1 %v6132_v29  ;;  %v6162_v29 = vld [vmem:[%s7925_s13 + $0x88] sm:$0xff]  }
0x18c6   : > { %v7494_v16 = vadd.f32 %v5265_v28, %v3931_v59  ;;  %p6453_p1 = pnand %p6452_p11, %p7952_p0  ;;  %p6460_p4 = por %p6459_p9, %p6458_p2 }
0x18c8   : > { %3951 = vadd.xlane.f32.xlu0 %v7492_v21  ;;  %3949 = vadd.xlane.f32.xlu1 %v7494_v16  ;;  %p6454_p3 = pneg %p6453_p1 }
0x18c9   : > { %4230 = vmatpush1.bf16.msra.mxu0 %v6093_v46 }
0x18ca   : > { %4231 = vmatprep.subr.bf16.mxu0 %v6101_v19  ;;  %v6139_v19 = vld [vmem:[%s7925_s13 + $0x70] sm:$0xff]   ;;  %p6461_p6 = pnand %p6460_p4, %p6454_p3 }
0x18cc   : > { %3953 = vadd.xlane.f32.xlu1 %v7498_v44 }
0x18cd   : > { %4232 = vmatpush1.bf16.msra.mxu0 %v6099_v0  ;;  %v6141_v0 = vld [vmem:[%s7925_s13 + $0x30] sm:$0xff]  }
0x18ce   : > { %4233 = vmatprep.subr.bf16.mxu0 %v6107_v58  ;;  %v6143_v58 = vld [vmem:[%s7925_s13 + $0x68] sm:$0xff]  }
0x18d1   : > { %4234 = vmatpush1.bf16.msra.mxu0 %v6105_v48  ;;  %v6145_v48 = vld [vmem:[%s7925_s13 + $0x28] sm:$0xff]  }
0x18d2   : > { %4235 = vmatprep.subr.bf16.mxu0 %v6113_v39  ;;  %v6148_v39 = vld [vmem:[%s7925_s13 + $0xe0] sm:$0xff]  }
0x18d5   : > { %4236 = vmatpush1.bf16.msra.mxu0 %v6111_v5  ;;  %v6147_v5 = vld [vmem:[%s7925_s13 + $0x60] sm:$0xff]  }
0x18d6   : > { %4237 = vmatprep.subr.bf16.mxu0 %v6119_v63  ;;  %v6151_v63 = vld [vmem:[%s7925_s13 + $0x58] sm:$0xff]  }
0x18d9   : > { %4238 = vmatpush1.bf16.msra.mxu0 %v6117_v11  ;;  %v6153_v11 = vld [vmem:[%s7925_s13 + $0x18] sm:$0xff]  }
0x18da   : > { %4239 = vmatprep.subr.bf16.mxu0 %v6125_v9  ;;  %v6155_v9 = vld [vmem:[%s7925_s13 + $0x50] sm:$0xff]  }
0x18dd   : > { %4240 = vmatpush1.bf16.msra.mxu0 %v6123_v4  ;;  %v6157_v4 = vld [vmem:[%s7925_s13 + $0x10] sm:$0xff]  }
0x18de   : > { %4241 = vmatprep.subr.bf16.mxu0 %v6131_v7  ;;  %v6159_v7 = vld [vmem:[%s7925_s13 + $0x48] sm:$0xff]  }
0x18e1   : > { %4242 = vmatpush1.bf16.msra.mxu0 %v6129_v2  ;;  %v6161_v2 = vld [vmem:[%s7925_s13 + $0x8] sm:$0xff]  }
0x194d   : > { %v3948_v50 = vpop.xlane.xlu0 %3947 }
0x194e   : > { %v3955_v24 = vmul.f32 0.0078125, %v3948_v50 }
0x1950   : > { %v7514_v22 = vsub.f32 %v7487_v38, %v3955_v24 }
0x1951   : > { %v3952_v20 = vpop.xlane.xlu0 %3951  ;;  %v3950_v53 = vpop.xlane.xlu1 %3949 }
0x1952   : > { %v3957_v33 = vmul.f32 0.0078125, %v3952_v20  ;;  %v3956_v55 = vmul.f32 0.0078125, %v3950_v53  ;;  %v3963_v17 = vmul.f32 %v7514_v22, %v7514_v22 }
0x1954   : > { %v7519_v25 = vsub.f32 %v7492_v21, %v3957_v33  ;;  %v7522_v51 = vsub.f32 %v7494_v16, %v3956_v55  ;;  %3967 = vadd.xlane.f32.xlu0 %v3963_v17  ;;  %v5267_v33 = vld [vmem:[#allocation5] ss:$0 sm:$0xff] }
0x1955   : > { %v3954_v23 = vpop.xlane.xlu1 %3953 }
0x1956   : > { %v3958_v47 = vmul.f32 0.0078125, %v3954_v23  ;;  %v3965_v12 = vmul.f32 %v7519_v25, %v7519_v25  ;;  %v3964_v57 = vmul.f32 %v7522_v51, %v7522_v51 }
0x1958   : > { %v7529_v10 = vsub.f32 %v7498_v44, %v3958_v47  ;;  %3971 = vadd.xlane.f32.xlu0 %v3965_v12  ;;  %3969 = vadd.xlane.f32.xlu1 %v3964_v57 }
0x195a   : > { %v3966_v52 = vmul.f32 %v7529_v10, %v7529_v10 }
0x195c   : > { %3973 = vadd.xlane.f32.xlu1 %v3966_v52 }
0x19dd   : > { %v3968_v60 = vpop.xlane.xlu0 %3967 }
0x19de   : > { %v3975_v34 = vmul.f32 0.0078125, %v3968_v60  ;;  %v6163_v60 = vld [vmem:[%s7925_s13 + $0x40] sm:$0xff]  }
0x19e0   : > { %v3979_v28 = vadd.f32 1e-05, %v3975_v34  ;;  %v6164_v34 = vld [vmem:[%s7925_s13 + $0xc0] sm:$0xff]  }
0x19e1   : > { %v3972_v32 = vpop.xlane.xlu0 %3971  ;;  %v3970_v8 = vpop.xlane.xlu1 %3969 }
0x19e2   : > { %6303 = vrsqrt.f32 %v3979_v28  ;;  %v3977_v6 = vmul.f32 0.0078125, %v3972_v32  ;;  %v3976_v35 = vmul.f32 0.0078125, %v3970_v8  ;;  %v6165_v28 = vld [vmem:[%s7925_s13] sm:$0xff]   ;;  %v4047_v8 = vlaneseq }
0x19e3   : > { %v6166_v32 = vld [vmem:[%s7925_s13 + $0x80] sm:$0xff]  }
0x19e4   : > { %v3980_v36 = vadd.f32 1e-05, %v3976_v35  ;;  %v3981_v59 = vadd.f32 1e-05, %v3977_v6  ;;  %v4048_v6 = vshrl.u32 %v4047_v8, 7 }
0x19e5   : > { %v3974_v49 = vpop.xlane.xlu1 %3973 }
0x19e6   : > { %v3978_v45 = vmul.f32 0.0078125, %v3974_v49  ;;  %6305 = vrsqrt.f32 %v3980_v36  ;;  %v4049_v35 = vsub.s32 0, %v4048_v6  ;;  %v4057_v36 = vsub.s32 2, %v4048_v6 }
0x19e7   : > { %6307 = vrsqrt.f32 %v3981_v59  ;;  %v4045_v59 = vld [vmem:[#allocation7] sm:$0xf]  ;;  %v4053_v49 = vsub.s32 1, %v4048_v6 }
0x19e8   : > { %v3982_v3 = vadd.f32 1e-05, %v3978_v45  ;;  %v4061_v45 = vsub.s32 3, %v4048_v6 }
0x19ea   : > { %6309 = vrsqrt.f32 %v3982_v3  ;;  %v7719_v3 = vrot.slane %v4045_v59, %v4049_v35 }
0x19ef   : > { %v6304_v37 = vpop.eup %6303 }
0x19f0   : > { %v3987_v14 = vmul.f32 %v6304_v37, %v7514_v22  ;;  %v7721_v37 = vrot.slane %v4045_v59, %v4057_v36 }
0x19f2   : > { %v3997_v20 = vmul.f32 %v5266_v43, %v3987_v14 }
0x19f3   : > { %v6306_v50 = vpop.eup %6305 }
0x19f4   : > { %v3988_v24 = vmul.f32 %v6306_v50, %v7522_v51  ;;  %v6308_v53 = vpop.eup %6307  ;;  %v4007_v47 = vadd.f32 %v5267_v33, %v3997_v20  ;;  %v7723_v50 = vrot.slane %v4045_v59, %v4053_v49 }
0x19f5   : > { %v3989_v57 = vmul.f32 %v6308_v53, %v7519_v25  ;;  %v6136_v25 = vld [vmem:[%s7925_s13 + $0xf8] sm:$0xff]  }
0x19f6   : > { %v3998_v17 = vmul.f32 %v5266_v43, %v3988_v24  ;;  %5538 = vmatprep.subr.bf16.mxu1 %v6136_v25  ;;  %v7725_v24 = vrot.slane %v4045_v59, %v4061_v45 }
0x19f7   : > { %v6310_v55 = vpop.eup %6309  ;;  %v3999_v22 = vmul.f32 %v5266_v43, %v3989_v57 }
0x19f8   : > { %v3990_v23 = vmul.f32 %v6310_v55, %v7529_v10  ;;  %v4008_v12 = vadd.f32 %v5267_v33, %v3998_v17  ;;  %v6135_v10 = vld [vmem:[%s7925_s13 + $0x78] sm:$0xff]  }
0x19f9   : > { %v4009_v26 = vadd.f32 %v5267_v33, %v3999_v22  ;;  %5510 = vmatprep.subr.bf16.mxu0 %v6135_v10 }
0x19fa   : > { %v4011_v52 = vpack.c.bf16 %v4008_v12, %v4007_v47  ;;  %v4000_v30 = vmul.f32 %v5266_v43, %v3990_v23 }
0x19fc   : > { %4260 = vmatmul.mubr.bf16.vlgmr.msra.gmra.mxu0 %v4011_v52  ;;  %4313 = vmatmul.mubr.bf16.vlgmr.msra.gmra.mxu1 %v4011_v52  ;;  %v4010_v51 = vadd.f32 %v5267_v33, %v4000_v30 }
0x19fd   : > { %4269 = vmatprep.mubr.bf16.mxu0 %v6529_v31  ;;  %4322 = vmatprep.mubr.bf16.mxu1 %v6529_v31  ;;  %v6138_v31 = vld [vmem:[%s7925_s13 + $0xb8] sm:$0xff]  }
0x19fe   : > { %v4012_v46 = vpack.c.bf16 %v4010_v51, %v4009_v26  ;;  %5511 = vmatpush3.bf16.msra.mxu0 %v6137_v42  ;;  %5539 = vmatpush3.bf16.msra.mxu1 %v6138_v31 }
0x19ff   : > { %5512 = vmatprep.subr.bf16.mxu0 %v6139_v19  ;;  %5540 = vmatprep.subr.bf16.mxu1 %v6140_v54 }
0x1a02   : > { %5513 = vmatpush3.bf16.msra.mxu0 %v6141_v0  ;;  %5541 = vmatpush3.bf16.msra.mxu1 %v6142_v18 }
0x1a03   : > { %5514 = vmatprep.subr.bf16.mxu0 %v6143_v58  ;;  %5542 = vmatprep.subr.bf16.mxu1 %v6144_v56 }
0x1a04   : > { %4270 = vmatmul.mubr.bf16.gmra.mxu0 %v4012_v46  ;;  %4323 = vmatmul.mubr.bf16.gmra.mxu1 %v4012_v46 }
0x1a06   : > { %5515 = vmatpush3.bf16.msra.mxu0 %v6145_v48  ;;  %5543 = vmatpush3.bf16.msra.mxu1 %v6146_v62 }
0x1a07   : > { %5516 = vmatprep.subr.bf16.mxu0 %v6147_v5  ;;  %5544 = vmatprep.subr.bf16.mxu1 %v6148_v39 }
0x1a0a   : > { %5517 = vmatpush3.bf16.msra.mxu0 %v6149_v61  ;;  %5545 = vmatpush3.bf16.msra.mxu1 %v6150_v13 }
0x1a0b   : > { %5518 = vmatprep.subr.bf16.mxu0 %v6151_v63  ;;  %5546 = vmatprep.subr.bf16.mxu1 %v6152_v1 }
0x1a0e   : > { %5519 = vmatpush3.bf16.msra.mxu0 %v6153_v11  ;;  %5547 = vmatpush3.bf16.msra.mxu1 %v6154_v41 }
0x1a0f   : > { %5520 = vmatprep.subr.bf16.mxu0 %v6155_v9  ;;  %5548 = vmatprep.subr.bf16.mxu1 %v6156_v27 }
0x1a12   : > { %5521 = vmatpush3.bf16.msra.mxu0 %v6157_v4  ;;  %5549 = vmatpush3.bf16.msra.mxu1 %v6158_v15 }
0x1a13   : > { %5522 = vmatprep.subr.bf16.mxu0 %v6159_v7  ;;  %5550 = vmatprep.subr.bf16.mxu1 %v6160_v40 }
0x1a16   : > { %5523 = vmatpush3.bf16.msra.mxu0 %v6161_v2  ;;  %5551 = vmatpush3.bf16.msra.mxu1 %v6162_v29 }
0x1a17   : > { %5524 = vmatprep.subr.bf16.mxu0 %v6163_v60  ;;  %5552 = vmatprep.subr.bf16.mxu1 %v6164_v34 }
0x1a1a   : > { %5525 = vmatpush3.bf16.msra.mxu0 %v6165_v28  ;;  %5553 = vmatpush3.bf16.msra.mxu1 %v6166_v32 }
0x1abc   : > { %v4261_v14 = vpop.f32.mrf.mxu0  ;;  %v4314_v43 = vpop.f32.mrf.mxu1 }
0x1abd   : > { %v7728_v20 = vadd.f32 %v4261_v14, %v7719_v3  ;;  %v7731_v53 = vadd.f32 %v4314_v43, %v7721_v37 }
0x1abe   : > { %v4263_v33 = vpop.f32.mrf.mxu0  ;;  %v4316_v55 = vpop.f32.mrf.mxu1 }
0x1abf   : > { %v4349_v17 = vmul.f32 0.044715, %v7728_v20  ;;  %v4351_v23 = vmul.f32 0.044715, %v7731_v53  ;;  %v7736_v47 = vadd.f32 %v4263_v33, %v7723_v50  ;;  %v7739_v12 = vadd.f32 %v4316_v55, %v7725_v24 }
0x1ac0   : > { %v4265_v57 = vpop.f32.mrf.mxu0  ;;  %v4318_v52 = vpop.f32.mrf.mxu1 }
0x1ac1   : > { %v4365_v30 = vmul.f32 %v4349_v17, %v7728_v20  ;;  %v4367_v22 = vmul.f32 %v4351_v23, %v7731_v53  ;;  %v7744_v51 = vadd.f32 %v4265_v57, %v7719_v3  ;;  %v7747_v26 = vadd.f32 %v4318_v52, %v7721_v37 }
0x1ac2   : > { %v4267_v46 = vpop.f32.mrf.mxu0  ;;  %v4320_v10 = vpop.f32.mrf.mxu1  ;;  %v4350_v31 = vmul.f32 0.044715, %v7736_v47  ;;  %v4352_v54 = vmul.f32 0.044715, %v7739_v12 }
0x1ac3   : > { %v4381_v25 = vmul.f32 %v4365_v30, %v7728_v20  ;;  %v4383_v42 = vmul.f32 %v4367_v22, %v7731_v53  ;;  %v4353_v19 = vmul.f32 0.044715, %v7744_v51  ;;  %v4355_v0 = vmul.f32 0.044715, %v7747_v26 }
0x1ac4   : > { %v4271_v18 = vpop.f32.mrf.mxu0  ;;  %v4324_v58 = vpop.f32.mrf.mxu1  ;;  %v7758_v62 = vadd.f32 %v4267_v46, %v7723_v50  ;;  %v7762_v39 = vadd.f32 %v4320_v10, %v7725_v24  ;;  %v4366_v1 = vmul.f32 %v4350_v31, %v7736_v47  ;;  %v4368_v9 = vmul.f32 %v4352_v54, %v7739_v12 }
0x1ac5   : > { %v4397_v56 = vadd.f32 %v4381_v25, %v7728_v20  ;;  %v4369_v48 = vmul.f32 %v4353_v19, %v7744_v51  ;;  %v4371_v5 = vmul.f32 %v4355_v0, %v7747_v26  ;;  %v4399_v63 = vadd.f32 %v4383_v42, %v7731_v53 }
0x1ac6   : > { %v4273_v61 = vpop.f32.mrf.mxu0  ;;  %v4326_v13 = vpop.f32.mrf.mxu1  ;;  %v4354_v41 = vmul.f32 0.044715, %v7758_v62  ;;  %v4356_v4 = vmul.f32 0.044715, %v7762_v39  ;;  %v7772_v15 = vadd.f32 %v4271_v18, %v7719_v3  ;;  %v4382_v8 = vmul.f32 %v4366_v1, %v7736_v47 }
0x1ac7   : > { %v4385_v11 = vmul.f32 %v4369_v48, %v7744_v51  ;;  %v4387_v27 = vmul.f32 %v4371_v5, %v7747_v26  ;;  %v4413_v40 = vmul.f32 0.7978846, %v4397_v56  ;;  %v7777_v60 = vadd.f32 %v4273_v61, %v7723_v50 }
0x1ac8   : > { %v4275_v7 = vpop.f32.mrf.mxu0  ;;  %v4370_v29 = vmul.f32 %v4354_v41, %v7758_v62  ;;  %v4328_v34 = vpop.f32.mrf.mxu1  ;;  %v4415_v32 = vmul.f32 0.7978846, %v4399_v63  ;;  %v7782_v6 = vadd.f32 %v4324_v58, %v7721_v37  ;;  %v4384_v36 = vmul.f32 %v4368_v9, %v7739_v12 }
0x1ac9   : > { %v4401_v2 = vadd.f32 %v4385_v11, %v7744_v51  ;;  %v4403_v28 = vadd.f32 %v4387_v27, %v7747_v26  ;;  %v4358_v35 = vmul.f32 0.044715, %v7777_v60  ;;  %v4372_v59 = vmul.f32 %v4356_v4, %v7762_v39 }
0x1aca   : > { %v4357_v49 = vmul.f32 0.044715, %v7772_v15  ;;  %v7789_v45 = vadd.f32 %v4326_v13, %v7725_v24  ;;  %v4277_v14 = vpop.f32.mrf.mxu0  ;;  %6311 = vtanh.f32 %v4413_v40  ;;  %v4386_v33 = vmul.f32 %v4370_v29, %v7758_v62  ;;  %v4330_v17 = vpop.f32.mrf.mxu1 }
0x1acb   : > { %v4417_v43 = vmul.f32 0.7978846, %v4401_v2  ;;  %v7793_v55 = vadd.f32 %v4275_v7, %v7719_v3  ;;  %v4419_v23 = vmul.f32 0.7978846, %v4403_v28  ;;  %v4374_v57 = vmul.f32 %v4358_v35, %v7777_v60 }
0x1acc   : > { %v4360_v52 = vmul.f32 0.044715, %v7789_v45  ;;  %v7798_v30 = vadd.f32 %v4328_v34, %v7721_v37  ;;  %6313 = vtanh.f32 %v4415_v32  ;;  %v4359_v22 = vmul.f32 0.044715, %v7782_v6 }
0x1acd   : > { %v4361_v46 = vmul.f32 0.044715, %v7793_v55  ;;  %v7803_v10 = vadd.f32 %v4277_v14, %v7723_v50  ;;  %v4388_v3 = vmul.f32 %v4372_v59, %v7762_v39  ;;  %v4373_v25 = vmul.f32 %v4357_v49, %v7772_v15 }
0x1ace   : > { %v4376_v42 = vmul.f32 %v4360_v52, %v7789_v45  ;;  %v7809_v31 = vadd.f32 %v4330_v17, %v7725_v24  ;;  %6315 = vtanh.f32 %v4417_v43  ;;  %v4398_v19 = vadd.f32 %v4382_v8, %v7736_v47 }
0x1acf   : > { %v4362_v37 = vmul.f32 0.044715, %v7803_v10  ;;  %v4402_v54 = vadd.f32 %v4386_v33, %v7758_v62  ;;  %6317 = vtanh.f32 %v4419_v23  ;;  %v4390_v50 = vmul.f32 %v4374_v57, %v7777_v60 }
0x1ad0   : > { %v4363_v0 = vmul.f32 0.044715, %v7798_v30  ;;  %v4364_v18 = vmul.f32 0.044715, %v7809_v31  ;;  %v4377_v58 = vmul.f32 %v4361_v46, %v7793_v55  ;;  %v4414_v24 = vmul.f32 0.7978846, %v4398_v19 }
0x1ad1   : > { %v4378_v56 = vmul.f32 %v4362_v37, %v7803_v10  ;;  %v4418_v48 = vmul.f32 0.7978846, %v4402_v54  ;;  %v4392_v5 = vmul.f32 %v4376_v42, %v7789_v45  ;;  %v4400_v13 = vadd.f32 %v4384_v36, %v7739_v12 }
0x1ad2   : > { %v4380_v61 = vmul.f32 %v4364_v18, %v7809_v31  ;;  %v4404_v63 = vadd.f32 %v4388_v3, %v7762_v39  ;;  %v4375_v1 = vmul.f32 %v4359_v22, %v7782_v6  ;;  %6319 = vtanh.f32 %v4414_v24 }
0x1ad3   : > { %v4394_v11 = vmul.f32 %v4378_v56, %v7803_v10  ;;  %6321 = vtanh.f32 %v4418_v48  ;;  %v4416_v9 = vmul.f32 0.7978846, %v4400_v13  ;;  %v4389_v4 = vmul.f32 %v4373_v25, %v7772_v15 }
0x1ad4   : > { %v4396_v41 = vmul.f32 %v4380_v61, %v7809_v31  ;;  %v4420_v27 = vmul.f32 0.7978846, %v4404_v63  ;;  %v4379_v7 = vmul.f32 %v4363_v0, %v7798_v30  ;;  %v4406_v40 = vadd.f32 %v4390_v50, %v7777_v60 }
0x1ad5   : > { %v4410_v2 = vadd.f32 %v4394_v11, %v7803_v10  ;;  %v4393_v29 = vmul.f32 %v4377_v58, %v7793_v55  ;;  %6323 = vtanh.f32 %v4416_v9  ;;  %v4408_v34 = vadd.f32 %v4392_v5, %v7789_v45 }
0x1ad6   : > { %6325 = vtanh.f32 %v4420_v27  ;;  %v4422_v28 = vmul.f32 0.7978846, %v4406_v40  ;;  %v4412_v35 = vadd.f32 %v4396_v41, %v7809_v31  ;;  %v4391_v59 = vmul.f32 %v4375_v1, %v7782_v6 }
0x1ad7   : > { %v4426_v32 = vmul.f32 0.7978846, %v4410_v2  ;;  %v6312_v8 = vpop.eup %6311  ;;  %v4424_v36 = vmul.f32 0.7978846, %v4408_v34  ;;  %v4395_v49 = vmul.f32 %v4379_v7, %v7798_v30  ;;  %v4405_v14 = vadd.f32 %v4389_v4, %v7772_v15 }
0x1ad8   : > { %6327 = vtanh.f32 %v4422_v28  ;;  %v4428_v33 = vmul.f32 0.7978846, %v4412_v35  ;;  %v4409_v17 = vadd.f32 %v4393_v29, %v7793_v55  ;;  %v4407_v46 = vadd.f32 %v4391_v59, %v7782_v6 }
0x1ad9   : > { %v6314_v43 = vpop.eup %6313  ;;  %6329 = vtanh.f32 %v4426_v32  ;;  %v4421_v23 = vmul.f32 0.7978846, %v4405_v14  ;;  %v4411_v3 = vadd.f32 %v4395_v49, %v7798_v30  ;;  %v4334_v54 = vmul.f32 0.5, %v7736_v47 }
0x1ada   : > { %6331 = vtanh.f32 %v4424_v36  ;;  %v4425_v52 = vmul.f32 0.7978846, %v4409_v17  ;;  %v4423_v42 = vmul.f32 0.7978846, %v4407_v46  ;;  %v4337_v0 = vmul.f32 0.5, %v7744_v51 }
0x1adb   : > { %v6316_v57 = vpop.eup %6315  ;;  %6333 = vtanh.f32 %v4428_v33  ;;  %v4427_v37 = vmul.f32 0.7978846, %v4411_v3  ;;  %v4445_v58 = vadd.f32 1.0, %v6312_v8  ;;  %v4338_v56 = vmul.f32 0.5, %v7758_v62 }
0x1adc   : > { %v6318_v22 = vpop.eup %6317  ;;  %6335 = vtanh.f32 %v4421_v23  ;;  %v4449_v25 = vadd.f32 1.0, %v6316_v57  ;;  %v4333_v61 = vmul.f32 0.5, %v7728_v20  ;;  %v4339_v13 = vmul.f32 0.5, %v7747_v26 }
0x1add   : > { %6337 = vtanh.f32 %v4425_v52  ;;  %v4451_v48 = vadd.f32 1.0, %v6318_v22  ;;  %v4447_v9 = vadd.f32 1.0, %v6314_v43  ;;  %v4336_v51 = vmul.f32 0.5, %v7739_v12 }
0x1ade   : > { %6339 = vtanh.f32 %v4423_v42  ;;  %v4465_v63 = vmul.f32 %v4449_v25, %v4337_v0  ;;  %v4340_v27 = vmul.f32 0.5, %v7762_v39  ;;  %v4461_v62 = vmul.f32 %v4445_v58, %v4333_v61  ;;  %v5300_v61 = vld [vmem:[#allocation8] ss:$0 sm:$0xff] }
0x1adf   : > { %v6320_v19 = vpop.eup %6319  ;;  %6341 = vtanh.f32 %v4427_v37  ;;  %v4335_v40 = vmul.f32 0.5, %v7731_v53  ;;  %v4467_v29 = vmul.f32 %v4451_v48, %v4339_v13  ;;  %v4342_v36 = vmul.f32 0.5, %v7777_v60 }
0x1ae0   : > { %v6322_v50 = vpop.eup %6321  ;;  %v4446_v18 = vadd.f32 1.0, %v6320_v19  ;;  %v4477_v28 = vpack.c.bf16 %v4465_v63, %v4461_v62  ;;  %v4346_v12 = vmul.f32 0.5, %v7803_v10  ;;  %v4344_v53 = vmul.f32 0.5, %v7789_v45 }
0x1ae1   : > { %v4450_v24 = vadd.f32 1.0, %v6322_v50  ;;  %v4463_v35 = vmul.f32 %v4447_v9, %v4335_v40  ;;  %v4348_v14 = vmul.f32 0.5, %v7809_v31  ;;  %v4341_v60 = vmul.f32 0.5, %v7772_v15 }
0x1ae2   : > { %v6324_v5 = vpop.eup %6323  ;;  %v4462_v11 = vmul.f32 %v4446_v18, %v4334_v54  ;;  %v4345_v10 = vmul.f32 0.5, %v7793_v55  ;;  %v4343_v15 = vmul.f32 0.5, %v7782_v6  ;;  %v4347_v55 = vmul.f32 0.5, %v7798_v30 }
0x1ae3   : > { %v6326_v1 = vpop.eup %6325  ;;  %v4466_v47 = vmul.f32 %v4450_v24, %v4338_v56  ;;  %v4448_v41 = vadd.f32 1.0, %v6324_v5  ;;  %v4479_v17 = vpack.c.bf16 %v4467_v29, %v4463_v35 }
0x1ae4   : > { %v4452_v4 = vadd.f32 1.0, %v6326_v1 }
0x1ae5   : > { %v6328_v7 = vpop.eup %6327  ;;  %v4478_v2 = vpack.c.bf16 %v4466_v47, %v4462_v11  ;;  %v4464_v34 = vmul.f32 %v4448_v41, %v4336_v51 }
0x1ae6   : > { %v6330_v20 = vpop.eup %6329  ;;  %v4468_v26 = vmul.f32 %v4452_v4, %v4340_v27  ;;  %v4454_v32 = vadd.f32 1.0, %v6328_v7 }
0x1ae7   : > { %v6332_v8 = vpop.eup %6331  ;;  %4780 = vmatprep.mubr.bf16.mxu0 %v4478_v2  ;;  %v4458_v39 = vadd.f32 1.0, %v6330_v20 }
0x1ae8   : > { %v6334_v59 = vpop.eup %6333  ;;  %v4480_v49 = vpack.c.bf16 %v4468_v26, %v4464_v34  ;;  %4781 = vmatmul.mubr.bf16.vlgmr.msra.gmra.mxu0 %v4477_v28  ;;  %v4456_v43 = vadd.f32 1.0, %v6332_v8  ;;  %v4470_v23 = vmul.f32 %v4454_v32, %v4342_v36 }
0x1ae9   : > { %v6336_v33 = vpop.eup %6335  ;;  %v4474_v57 = vmul.f32 %v4458_v39, %v4346_v12  ;;  %v4460_v52 = vadd.f32 1.0, %v6334_v59 }
0x1aea   : > { %v6338_v22 = vpop.eup %6337  ;;  %4829 = vmatprep.mubr.bf16.mxu1 %v4480_v49  ;;  %v4453_v46 = vadd.f32 1.0, %v6336_v33  ;;  %v4472_v25 = vmul.f32 %v4456_v43, %v4344_v53 }
0x1aeb   : > { %4830 = vmatmul.mubr.bf16.vlgmr.msra.gmra.mxu1 %v4479_v17  ;;  %v4482_v3 = vpack.c.bf16 %v4474_v57, %v4470_v23  ;;  %v4476_v42 = vmul.f32 %v4460_v52, %v4348_v14  ;;  %v4457_v45 = vadd.f32 1.0, %v6338_v22  ;;  %v6340_v37 = vpop.eup %6339 }
0x1aec   : > { %v4469_v19 = vmul.f32 %v4453_v46, %v4341_v60  ;;  %v6342_v50 = vpop.eup %6341  ;;  %v4455_v0 = vadd.f32 1.0, %v6340_v37 }
0x1aed   : > { %4788 = vmatprep.mubr.bf16.mxu0 %v4482_v3  ;;  %v4484_v31 = vpack.c.bf16 %v4476_v42, %v4472_v25  ;;  %v4473_v54 = vmul.f32 %v4457_v45, %v4345_v10  ;;  %v4459_v58 = vadd.f32 1.0, %v6342_v50 }
0x1aee   : > { %v4471_v56 = vmul.f32 %v4455_v0, %v4343_v15 }
0x1aef   : > { %4837 = vmatprep.mubr.bf16.mxu1 %v4484_v31  ;;  %v4481_v18 = vpack.c.bf16 %v4473_v54, %v4469_v19  ;;  %v4475_v24 = vmul.f32 %v4459_v58, %v4347_v55 }
0x1af1   : > { %4789 = vmatmul.mubr.bf16.gmra.mxu0 %v4481_v18  ;;  %v4483_v48 = vpack.c.bf16 %v4475_v24, %v4471_v56 }
0x1af3   : > { %4838 = vmatmul.mubr.bf16.gmra.mxu1 %v4483_v48 }
0x1ba8   : > { %v5526_v5 = vpop.f32.mrf.mxu0 }
0x1baa   : > { %v5527_v13 = vpop.f32.mrf.mxu0 }
0x1bab   : > { %v5554_v63 = vpop.f32.mrf.mxu1  ;;  %v5528_v1 = vadd.f32 %v5527_v13, %v5526_v5 }
0x1bac   : > { %v5529_v11 = vpop.f32.mrf.mxu0 }
0x1bad   : > { %v4783_v47 = vadd.f32 %v5528_v1, %v5300_v61  ;;  %v5555_v41 = vpop.f32.mrf.mxu1 }
0x1bae   : > { %v5556_v6 = vadd.f32 %v5555_v41, %v5554_v63  ;;  %v5530_v30 = vpop.f32.mrf.mxu0 }
0x1baf   : > { %v5557_v9 = vpop.f32.mrf.mxu1  ;;  %v5531_v51 = vadd.f32 %v5530_v30, %v5529_v11 }
0x1bb0   : > { %v4832_v27 = vadd.f32 %v5556_v6, %v4783_v47 }
0x1bb1   : > { %v4786_v4 = vadd.f32 %v5531_v51, %v5300_v61  ;;  %v5558_v62 = vpop.f32.mrf.mxu1  ;;  %v5532_v7 = vpop.f32.mrf.mxu0 }
0x1bb2   : > { %v4846_v40 = vadd.f32 %v4832_v27, %v7487_v38  ;;  %v5559_v2 = vadd.f32 %v5558_v62, %v5557_v9 }
0x1bb3   : > { %v5533_v29 = vpop.f32.mrf.mxu0  ;;  %v5560_v26 = vpop.f32.mrf.mxu1 }
0x1bb4   : > { %4850 = vst [vmem:[%s538_s30] sm:$0xff] %v4846_v40  ;;  %v4835_v20 = vadd.f32 %v5559_v2, %v4786_v4  ;;  %v5534_v34 = vadd.f32 %v5533_v29, %v5532_v7 }
0x1bb5   : > { %v5535_v28 = vpop.f32.mrf.mxu0  ;;  %v5561_v35 = vpop.f32.mrf.mxu1 }
0x1bb6   : > { %v4847_v32 = vadd.f32 %v4835_v20, %v7494_v16  ;;  %v4791_v8 = vadd.f32 %v5534_v34, %v5300_v61  ;;  %v5562_v12 = vadd.f32 %v5561_v35, %v5560_v26 }
0x1bb7   : > { %v5536_v36 = vpop.f32.mrf.mxu0  ;;  %v5563_v59 = vpop.f32.mrf.mxu1 }
0x1bb8   : > { %4851 = vst [vmem:[%s538_s30 + $0x8] sm:$0xff] %v4847_v32  ;;  %v5537_v39 = vadd.f32 %v5536_v36, %v5535_v28  ;;  %v4840_v38 = vadd.f32 %v5562_v12, %v4791_v8 }
0x1bb9   : > { %v5564_v53 = vpop.f32.mrf.mxu1 }
0x1bba   : > { %v4794_v49 = vadd.f32 %v5537_v39, %v5300_v61  ;;  %v4848_v14 = vadd.f32 %v4840_v38, %v7492_v21  ;;  %v5565_v43 = vadd.f32 %v5564_v53, %v5563_v59 }
0x1bbc   : > { %4852 = vst [vmem:[%s538_s30 + $0x10] sm:$0xff] %v4848_v14  ;;  %v4843_v33 = vadd.f32 %v5565_v43, %v4794_v49 }
0x1bbe   : > { %v4849_v16 = vadd.f32 %v4843_v33, %v7498_v44 }
0x1bc0   : > { %4853 = vst [vmem:[%s538_s30 + $0x18] sm:$0xff] %v4849_v16 }
0x1bc1   : > { %6464 = shalt.err (!%p6461_p6)
}
0x1bc2   : > { %s6465_s29 = scalar_lea.hbm %s7868_s27, 512  ;;  %s6469_s18 = scalar_lea.hbm %s7927_s15, 1024 }
0x1bc3   : > { %p6466_p13 = scmp.ne.s32.totalorder %s7868_s27, %s6465_s29  ;;  %p6470_p8 = scmp.lt.s32.totalorder %s7868_s27, %s7927_s15 }
0x1bc4   : > { %p6471_p12 = scmp.lt.s32.totalorder %s6469_s18, %s6465_s29 }
0x1bc5   : > { %p6467_p5 = pnand %p6466_p13, %p7952_p0 }
0x1bc6   : > { %p6472_p10 = por %p6471_p12, %p6470_p8 }
0x1bc7   : > { %p6468_p7 = pneg %p6467_p5 }
0x1bc9   : > { %p6473_p11 = pnand %p6472_p10, %p6468_p7 }
0x1bcb   : > { %6476 = shalt.err (!%p6473_p11)
}
0x1bcc   : > { %s6531_s23 = smov 128   ;;  %s6532_s22 = smov 8  }
0x1bcd   : > { %5930 = dma.vmem_to_hbm [thread:$0]  (%p7952_p0), %s7862_s26, 512, %s7868_s27, %s7872_s16, %s6531_s23, %s6531_s23, %s6532_s22  }
0x1bce PF: > { %s7953_s0 = sld [smem:[#allocation15_spill]]  ;;  %p5957_p1 = scmp.ge.s32.totalorder %s6523_s21, 2 }
0x1bcf   : > { %s7954_s24 = sld [smem:[#allocation19_spill]] }
0x1bd4   : > { %s4883_s20 = sand.u32 1, %s7953_s0  }
0x1bd5   : > { %p7955_p3 = scmp.ne.s32.totalorder %s7954_s24, 0  ;;  %s4884_s29 = scalar_lea.sflag [#allocation4], %s4883_s20 }
0x1bd7   : > { %p5946_p2 = pnand %p5957_p1, %p7955_p3 }
0x1bd9   : > { %p5947_p9 = pneg %p5946_p2 }
0x1bdb   : > { %6506 = dma.done.wait (%p5947_p9), %s4884_s29, 512  }
0x1bdc   : > { %6508 = vsyncadd (%p5947_p9), %s4884_s29, 4294966784  ;;  %s7956_s21 = sld [smem:[#allocation17_spill]]  ;;  %s7959_s18 = smov %s6515_s19 }
0x1bdd   : > { %s7957_s30 = sld [smem:[#allocation16_spill]] }
0x1bde   : > { %s7958_s20 = sld [smem:[#allocation18_spill]] }
0x1be2   : > { %p28_p4 = scmp.ge.s32.totalorder %s7956_s21, 4  }
0x1be3   : > { %s7960_s19 = smov %s7957_s30 }
0x1be4   :  { %30 = sbr.rel (!%p28_p4) target bundleno = 8 (0x8), region = 153 }
0x1be9   :  { %4889 = vsyncpa [#allocation3], 1 }
0x1bea   :  { %4891 = vsyncpa [#allocation3 + $0x1], 1 }
0x1beb   :  { %4892 = vsyncpa [#allocation6], 1 }
0x1bec   :  { %4893 = vsyncpa [#allocation9], 1 }
0x1bed   :  { %4894 = vsyncpa [#allocation4], 1 }
0x1bee   :  { %4896 = vsyncpa [#allocation4 + $0x1], 1 }

</bundles_post_ra>
